<compile_context>
chip_gen: v7x
topology: tpu7x:2x2x1
jax: 0.10.0
libtpu: 0.0.40
codegen_flags: <defaults>
</compile_context>

<pallas_src>
import functools
import math

import jax
import jax.numpy as jnp
import numpy as np
from jax import lax
from jax.experimental import pallas as pl
from jax.experimental.pallas import tpu as pltpu

_EPS = 1e-6
_GELU_C = 0.7978845608028654  # sqrt(2/pi)


def _default_vmem_limit():
    """Generation-aware scoped-VMEM request (conservative fallback)."""
    cap = None
    try:
        cap = pltpu.get_tpu_info().vmem_capacity_bytes
    except Exception:
        cap = None
    if not cap:
        return 40 * 1024 * 1024                      # safe everywhere
    if cap <= 64 * 1024 * 1024:                      # v7x-class parts
        return int(cap * 0.6)
    return min(int(cap * 0.8), 110 * 1024 * 1024)    # 128 MiB parts (v5e/v6e)


_VMEM_LIMIT = _default_vmem_limit()


def _cparams(semantics):
    return pltpu.CompilerParams(dimension_semantics=semantics,
                                vmem_limit_bytes=_VMEM_LIMIT)


def _pick_seq_tile(n, target):
    """Largest tile <= target dividing n, multiple of 8 (else full dim)."""
    if n <= target:
        return n
    for t in range(target - (target % 8), 7, -8):
        if n % t == 0:
            return t
    return n


def _pick_lane_tile(n, target):
    """Largest tile <= target dividing n, multiple of 128 (else full dim)."""
    if n <= target:
        return n
    for t in range(target - (target % 128), 127, -128):
        if n % t == 0:
            return t
    return n


# ---------------------------------------------------------------------------
# 1. Fused modulation linears: silu(y) @ W_in + b_in  and  silu(y) @ W_ctx + b_ctx
# ---------------------------------------------------------------------------
def _modulation_kernel(y_ref, wi_ref, bi_ref, wc_ref, bc_ref, oi_ref, oc_ref):
    yv = y_ref[...]
    s = (yv * (1.0 / (1.0 + jnp.exp(-yv)))).astype(jnp.bfloat16)   # silu, once
    oi_ref[...] = (jnp.dot(s, wi_ref[...], preferred_element_type=jnp.float32)
                   + bi_ref[...]).astype(oi_ref.dtype)
    oc_ref[...] = (jnp.dot(s, wc_ref[...], preferred_element_type=jnp.float32)
                   + bc_ref[...]).astype(oc_ref.dtype)


def fused_modulation(y, w_in, b_in, w_ctx, b_ctx):
    bsz, e = y.shape
    d6i, d6c = w_in.shape[1], w_ctx.shape[1]
    di, dc = d6i // 6, d6c // 6
    assert di % 128 == 0 and dc % 128 == 0, "modulation dims must be 128-aligned"
    return pl.pallas_call(
        _modulation_kernel,
        out_shape=(jax.ShapeDtypeStruct((bsz, d6i), jnp.float32),
                   jax.ShapeDtypeStruct((bsz, d6c), jnp.float32)),
        grid=(6,),
        in_specs=[
            pl.BlockSpec((bsz, e), lambda j: (0, 0)),
            pl.BlockSpec((e, di), lambda j: (0, j)),
            pl.BlockSpec((1, di), lambda j: (0, j)),
            pl.BlockSpec((e, dc), lambda j: (0, j)),
            pl.BlockSpec((1, dc), lambda j: (0, j)),
        ],
        out_specs=(pl.BlockSpec((bsz, di), lambda j: (0, j)),
                   pl.BlockSpec((bsz, dc), lambda j: (0, j))),
        compiler_params=_cparams(("parallel",)),
    )(y, w_in, b_in.reshape(1, d6i), w_ctx, b_ctx.reshape(1, d6c))


# ---------------------------------------------------------------------------
# 2. RMSNorm + modulate + QKV matmul + QKNorm + RoPE (+ q pre-scale), fused.
#    RMSNorm/modulate computed once per seq tile; QKV weight VMEM-resident.
# ---------------------------------------------------------------------------
def _norm_mod_qkv_rope_kernel(x_ref, g_ref, sc_ref, sh_ref, w_ref, b_ref,
                              qq_ref, qk_ref, cos_ref, sin_ref, o_ref,
                              *, dim, nh, dh):
    half = dh // 2
    x = x_ref[0]                                            # (tm, dm) f32
    ms = jnp.mean(x * x, axis=-1, keepdims=True)
    xn = x * lax.rsqrt(ms + _EPS) * g_ref[...]
    xm = (xn * (1.0 + sc_ref[0]) + sh_ref[0]).astype(jnp.bfloat16)
    y = jnp.dot(xm, w_ref[...], preferred_element_type=jnp.float32) + b_ref[...]  # (tm, 3*dim)

    q = y[:, :dim]
    k = y[:, dim:2 * dim]
    v = y[:, 2 * dim:]

    # QKNorm over the full attention dim; 1/sqrt(head_dim) folded into qq gain.
    qn = q * lax.rsqrt(jnp.mean(q * q, axis=-1, keepdims=True) + _EPS) * qq_ref[...]
    kn = k * lax.rsqrt(jnp.mean(k * k, axis=-1, keepdims=True) + _EPS) * qk_ref[...]

    cos = cos_ref[...]
    sin = sin_ref[...]                                      # rotate-half sign folded in

    def rot_half(t):
        # per-head unsigned rotate: concat(t[half:], t[:half]) within each head
        parts = []
        for h in range(nh):
            blk = t[:, h * dh:(h + 1) * dh]
            parts.append(blk[:, half:])
            parts.append(blk[:, :half])
        return jnp.concatenate(parts, axis=-1)

    qr = qn * cos + rot_half(qn) * sin
    kr = kn * cos + rot_half(kn) * sin
    o_ref[0] = jnp.concatenate([qr, kr, v], axis=-1).astype(o_ref.dtype)


def norm_mod_qkv_rope(x, gamma, scale_mod, shift_mod, w, bias, qn_q, qn_k,
                      cos_t, sin_t, num_heads, *, block_seq=None):
    bsz, ns, dm = x.shape
    three_dim = w.shape[1]
    dim = three_dim // 3
    dh = dim // num_heads
    tm = block_seq or _pick_seq_tile(ns, 512)
    assert ns % tm == 0, "block_seq must divide the sequence length"
    grid = (bsz, ns // tm)
    kernel = functools.partial(_norm_mod_qkv_rope_kernel, dim=dim, nh=num_heads, dh=dh)
    return pl.pallas_call(
        kernel,
        out_shape=jax.ShapeDtypeStruct((bsz, ns, three_dim), jnp.bfloat16),
        grid=grid,
        in_specs=[
            pl.BlockSpec((1, tm, dm), lambda b, i: (b, i, 0)),
            pl.BlockSpec((1, dm), lambda b, i: (0, 0)),
            pl.BlockSpec((1, 1, dm), lambda b, i: (b, 0, 0)),           # alpha
            pl.BlockSpec((1, 1, dm), lambda b, i: (b, 0, 0)),           # beta
            pl.BlockSpec((dm, three_dim), lambda b, i: (0, 0)),         # resident weight
            pl.BlockSpec((1, three_dim), lambda b, i: (0, 0)),
            pl.BlockSpec((1, dim), lambda b, i: (0, 0)),                # qn_q (pre-scaled)
            pl.BlockSpec((1, dim), lambda b, i: (0, 0)),                # qn_k
            pl.BlockSpec((tm, dim), lambda b, i: (i, 0)),               # cos tile
            pl.BlockSpec((tm, dim), lambda b, i: (i, 0)),               # signed sin tile
        ],
        out_specs=pl.BlockSpec((1, tm, three_dim), lambda b, i: (b, i, 0)),
        compiler_params=_cparams(("parallel", "parallel")),
    )(x, gamma.reshape(1, dm), scale_mod.reshape(bsz, 1, dm), shift_mod.reshape(bsz, 1, dm),
      w, bias.reshape(1, three_dim), qn_q.reshape(1, dim), qn_k.reshape(1, dim),
      cos_t, sin_t)


# ---------------------------------------------------------------------------
# 3. Flash attention (online softmax).  q/k already normalized, roped and
#    scaled, read straight from the (B, N, 3*dim) qkv tensor via index_maps.
# ---------------------------------------------------------------------------
def _flash_kernel(q_ref, k_ref, v_ref, o_ref, m_sc, l_sc, acc_sc):
    kv = pl.program_id(3)

    @pl.when(kv == 0)
    def _():
        m_sc[...] = jnp.full(m_sc.shape, -jnp.inf, jnp.float32)
        l_sc[...] = jnp.zeros(l_sc.shape, jnp.float32)
        acc_sc[...] = jnp.zeros(acc_sc.shape, jnp.float32)

    s = lax.dot_general(q_ref[0], k_ref[0], (((1,), (1,)), ((), ())),
                        preferred_element_type=jnp.float32)            # (tq, tk)

    m_prev = m_sc[...]
    m_new = jnp.maximum(m_prev, jnp.max(s, axis=-1, keepdims=True))
    alpha = jnp.exp(m_prev - m_new)
    p = jnp.exp(s - m_new)
    l_sc[...] = alpha * l_sc[...] + jnp.sum(p, axis=-1, keepdims=True)
    acc_sc[...] = alpha * acc_sc[...] + jnp.dot(p.astype(jnp.bfloat16), v_ref[0],
                                                preferred_element_type=jnp.float32)
    m_sc[...] = m_new

    @pl.when(kv == pl.num_programs(3) - 1)
    def _():
        o_ref[0] = (acc_sc[...] / l_sc[...]).astype(o_ref.dtype)


def flash_attention(qkv, num_heads, *, block_q=None, block_kv=None):
    bsz, n, three_dim = qkv.shape
    dim = three_dim // 3
    nh = num_heads
    dh = dim // nh              # NOTE: head_dim must be a multiple of 128 (lane-aligned)
    tq = block_q or _pick_seq_tile(n, 512)
    tk = block_kv or _pick_seq_tile(n, 512)
    assert n % tq == 0 and n % tk == 0, "flash block sizes must divide the sequence"
    grid = (bsz, nh, n // tq, n // tk)
    return pl.pallas_call(
        _flash_kernel,
        out_shape=jax.ShapeDtypeStruct((bsz, n, dim), jnp.bfloat16),
        grid=grid,
        in_specs=[
            pl.BlockSpec((1, tq, dh), lambda b, h, qi, kv: (b, qi, h)),           # q head h
            pl.BlockSpec((1, tk, dh), lambda b, h, qi, kv: (b, kv, nh + h)),      # k head h
            pl.BlockSpec((1, tk, dh), lambda b, h, qi, kv: (b, kv, 2 * nh + h)),  # v head h
        ],
        out_specs=pl.BlockSpec((1, tq, dh), lambda b, h, qi, kv: (b, qi, h)),
        scratch_shapes=[
            pltpu.VMEM((tq, 1), jnp.float32),
            pltpu.VMEM((tq, 1), jnp.float32),
            pltpu.VMEM((tq, dh), jnp.float32),
        ],
        compiler_params=_cparams(("parallel", "parallel", "parallel", "arbitrary")),
    )(qkv, qkv, qkv)


# ---------------------------------------------------------------------------
# 4. Output projection + gated residual; reads directly from the full (B,N,dim)
#    attention output via a block offset (no XLA slice), weight VMEM-resident.
# ---------------------------------------------------------------------------
def _proj_residual_kernel(a_ref, w_ref, b_ref, r_ref, g_ref, o_ref):
    y = jnp.dot(a_ref[0], w_ref[...], preferred_element_type=jnp.float32) + b_ref[...]
    o_ref[0] = (r_ref[0] + y * g_ref[0]).astype(o_ref.dtype)


def proj_residual(attn, w, bias, res, gate, seq_offset, *, block_seq=None):
    bsz, ns, dm = res.shape
    dim = w.shape[0]
    if block_seq is not None:
        tm = block_seq
    else:
        tm = _pick_seq_tile(math.gcd(ns, seq_offset) if seq_offset else ns, 512)
    assert ns % tm == 0 and seq_offset % tm == 0, "seq tile must divide ns and the offset"
    off_blk = seq_offset // tm
    grid = (bsz, ns // tm)
    return pl.pallas_call(
        _proj_residual_kernel,
        out_shape=jax.ShapeDtypeStruct((bsz, ns, dm), jnp.float32),
        grid=grid,
        in_specs=[
            pl.BlockSpec((1, tm, dim), lambda b, i: (b, i + off_blk, 0)),   # attn (offset)
            pl.BlockSpec((dim, dm), lambda b, i: (0, 0)),                   # resident weight
            pl.BlockSpec((1, dm), lambda b, i: (0, 0)),
            pl.BlockSpec((1, tm, dm), lambda b, i: (b, i, 0)),              # residual
            pl.BlockSpec((1, 1, dm), lambda b, i: (b, 0, 0)),               # gate (gamma)
        ],
        out_specs=pl.BlockSpec((1, tm, dm), lambda b, i: (b, i, 0)),
        compiler_params=_cparams(("parallel", "parallel")),
    )(attn, w, bias.reshape(1, dm), res, gate.reshape(bsz, 1, dm))


# ---------------------------------------------------------------------------
# 5. RMSNorm + modulate + MLP (W1, gelu-tanh, W2) + gated residual (fused);
#    MLP hidden dim tiled as an "arbitrary" reduction axis, RMSNorm/modulate
#    hoisted into the first hidden step via a VMEM scratch.
# ---------------------------------------------------------------------------
def _mlp_residual_kernel(x_ref, g_ref, sc_ref, sh_ref, w1_ref, b1_ref, w2_ref, b2_ref,
                         z_ref, o_ref, xm_sc, acc_sc):
    hstep = pl.program_id(2)

    @pl.when(hstep == 0)
    def _():
        x = x_ref[0]
        ms = jnp.mean(x * x, axis=-1, keepdims=True)
        xn = x * lax.rsqrt(ms + _EPS) * g_ref[...]
        xm_sc[...] = (xn * (1.0 + sc_ref[0]) + sh_ref[0]).astype(jnp.bfloat16)
        acc_sc[...] = jnp.zeros(acc_sc.shape, jnp.float32)

    hpre = jnp.dot(xm_sc[...], w1_ref[...], preferred_element_type=jnp.float32) + b1_ref[...]
    hact = 0.5 * hpre * (1.0 + jnp.tanh(_GELU_C * (hpre + 0.044715 * hpre * hpre * hpre)))
    acc_sc[...] += jnp.dot(hact.astype(jnp.bfloat16), w2_ref[...],
                           preferred_element_type=jnp.float32)

    @pl.when(hstep == pl.num_programs(2) - 1)
    def _():
        y = acc_sc[...] + b2_ref[...]
        o_ref[0] = (x_ref[0] + y * z_ref[0]).astype(o_ref.dtype)


def mlp_residual(x1, gamma, scale_mod, shift_mod, w1, b1, w2, b2, gate, *,
                 block_seq=None, block_hidden=None):
    bsz, ns, dm = x1.shape
    hm = w1.shape[1]
    tm = block_seq or _pick_seq_tile(ns, 512)
    th = block_hidden or _pick_lane_tile(hm, 512)
    assert ns % tm == 0 and hm % th == 0
    grid = (bsz, ns // tm, hm // th)
    return pl.pallas_call(
        _mlp_residual_kernel,
        out_shape=jax.ShapeDtypeStruct((bsz, ns, dm), jnp.float32),
        grid=grid,
        in_specs=[
            pl.BlockSpec((1, tm, dm), lambda b, i, k: (b, i, 0)),
            pl.BlockSpec((1, dm), lambda b, i, k: (0, 0)),
            pl.BlockSpec((1, 1, dm), lambda b, i, k: (b, 0, 0)),        # delta
            pl.BlockSpec((1, 1, dm), lambda b, i, k: (b, 0, 0)),        # epsilon
            pl.BlockSpec((dm, th), lambda b, i, k: (0, k)),
            pl.BlockSpec((1, th), lambda b, i, k: (0, k)),
            pl.BlockSpec((th, dm), lambda b, i, k: (k, 0)),
            pl.BlockSpec((1, dm), lambda b, i, k: (0, 0)),
            pl.BlockSpec((1, 1, dm), lambda b, i, k: (b, 0, 0)),        # zeta
        ],
        out_specs=pl.BlockSpec((1, tm, dm), lambda b, i, k: (b, i, 0)),
        scratch_shapes=[
            pltpu.VMEM((tm, dm), jnp.bfloat16),
            pltpu.VMEM((tm, dm), jnp.float32),
        ],
        compiler_params=_cparams(("parallel", "parallel", "arbitrary")),
    )(x1, gamma.reshape(1, dm), scale_mod.reshape(bsz, 1, dm), shift_mod.reshape(bsz, 1, dm),
      w1, b1.reshape(1, hm), w2, b2.reshape(1, dm), gate.reshape(bsz, 1, dm))


# ---------------------------------------------------------------------------
# MMDiTBlock forward (Pallas path)
# ---------------------------------------------------------------------------
def block_forward_pallas(p, x, y, ctx, num_heads, rope_base=10000.0,
                         block_seq=None, block_q=None, block_kv=None,
                         block_mlp_hidden=None):
    bsz, ni, din = x.shape
    _, nc, dc = ctx.shape
    dim = p["qkv_in_w"].shape[1] // 3
    nh = num_heads
    dh = dim // nh
    n = nc + ni

    mod_in, mod_ctx = fused_modulation(y, p["mod_in_w"], p["mod_in_b"],
                                       p["mod_ctx_w"], p["mod_ctx_b"])
    a_i, b_i, g_i, d_i, e_i, z_i = jnp.split(mod_in, 6, axis=-1)
    a_c, b_c, g_c, d_c, e_c, z_c = jnp.split(mod_ctx, 6, axis=-1)

    # RoPE tables: rotate-half sign folded into the sin table, per-head tiled to
    # the full attention dim; per-stream position offsets follow the
    # (context ++ input) concatenation order.  partial_rotary_factor == 1.
    # TODO(synk): partial_rotary_factor < 1 (rotary_dim < head_dim) not handled in-kernel.
    inv_freq = 1.0 / (rope_base ** (jnp.arange(0, dh, 2, dtype=jnp.float32) / dh))
    pos = jnp.arange(n, dtype=jnp.float32)
    ang = pos[:, None] * inv_freq[None, :]
    cos_h = jnp.concatenate([jnp.cos(ang), jnp.cos(ang)], axis=-1)       # (N, Dh)
    sin_h = jnp.concatenate([-jnp.sin(ang), jnp.sin(ang)], axis=-1)      # sign folded
    cos_full = jnp.tile(cos_h, (1, nh))                                  # (N, dim)
    sin_full = jnp.tile(sin_h, (1, nh))
    cos_c, cos_i = cos_full[:nc], cos_full[nc:]
    sin_c, sin_i = sin_full[:nc], sin_full[nc:]

    scale = dh ** -0.5
    qn_in_q = p["qn_in_q"] * scale     # fold 1/sqrt(head_dim) into q's QKNorm gain
    qn_ctx_q = p["qn_ctx_q"] * scale

    qkv_c = norm_mod_qkv_rope(ctx, p["norm1_ctx_g"], a_c, b_c, p["qkv_ctx_w"],
                              p["qkv_ctx_b"], qn_ctx_q, p["qn_ctx_k"],
                              cos_c, sin_c, nh, block_seq=block_seq)
    qkv_i = norm_mod_qkv_rope(x, p["norm1_in_g"], a_i, b_i, p["qkv_in_w"],
                              p["qkv_in_b"], qn_in_q, p["qn_in_k"],
                              cos_i, sin_i, nh, block_seq=block_seq)

    # Context tokens first, then input tokens (matches torch.cat order).
    # TODO(synk): this concat is one XLA copy of the (B, N, 3*dim) bf16 tensor;
    # could be removed by letting the flash index_maps address the two streams.
    qkv = jnp.concatenate([qkv_c, qkv_i], axis=1)
    attn = flash_attention(qkv, nh, block_q=block_q, block_kv=block_kv)  # (B, N, dim) bf16

    x1 = proj_residual(attn, p["proj_in_w"], p["proj_in_b"], x, g_i, nc,
                       block_seq=block_seq)
    c1 = proj_residual(attn, p["proj_ctx_w"], p["proj_ctx_b"], ctx, g_c, 0,
                       block_seq=block_seq)

    x2 = mlp_residual(x1, p["norm2_in_g"], d_i, e_i, p["mlp_in_w1"], p["mlp_in_b1"],
                      p["mlp_in_w2"], p["mlp_in_b2"], z_i,
                      block_seq=block_seq, block_hidden=block_mlp_hidden)
    c2 = mlp_residual(c1, p["norm2_ctx_g"], d_c, e_c, p["mlp_ctx_w1"], p["mlp_ctx_b1"],
                      p["mlp_ctx_w2"], p["mlp_ctx_b2"], z_c,
                      block_seq=block_seq, block_hidden=block_mlp_hidden)
    return x2, c2


# ---------------------------------------------------------------------------
# Pure-JAX reference with the same numerics (bf16 MXU operands, f32 accumulate)
# ---------------------------------------------------------------------------
def block_forward_ref(p, x, y, ctx, num_heads, rope_base=10000.0):
    f32, bf16 = jnp.float32, jnp.bfloat16
    bsz, ni, din = x.shape
    _, nc, dc = ctx.shape
    dim = p["qkv_in_w"].shape[1] // 3
    nh = num_heads
    dh = dim // nh

    def rms(t, g):
        ms = jnp.mean(t * t, axis=-1, keepdims=True)
        return t * lax.rsqrt(ms + _EPS) * g

    ys = jax.nn.silu(y).astype(bf16)
    mod_in = jnp.dot(ys, p["mod_in_w"], preferred_element_type=f32) + p["mod_in_b"]
    mod_ctx = jnp.dot(ys, p["mod_ctx_w"], preferred_element_type=f32) + p["mod_ctx_b"]
    a_i, b_i, g_i, d_i, e_i, z_i = jnp.split(mod_in, 6, axis=-1)
    a_c, b_c, g_c, d_c, e_c, z_c = jnp.split(mod_ctx, 6, axis=-1)

    def qkv_stream(t, g1, sc, sh, w, b, gq, gk):
        tm_ = rms(t, g1) * (1.0 + sc[:, None, :]) + sh[:, None, :]
        qkv = jnp.dot(tm_.astype(bf16), w, preferred_element_type=f32) + b
        q, k, v = jnp.split(qkv, 3, axis=-1)
        return rms(q, gq), rms(k, gk), v                     # f32 (rope applied in f32)

    qc, kc, vc = qkv_stream(ctx, p["norm1_ctx_g"], a_c, b_c, p["qkv_ctx_w"],
                            p["qkv_ctx_b"], p["qn_ctx_q"], p["qn_ctx_k"])
    qi, ki, vi = qkv_stream(x, p["norm1_in_g"], a_i, b_i, p["qkv_in_w"],
                            p["qkv_in_b"], p["qn_in_q"], p["qn_in_k"])

    q = jnp.concatenate([qc, qi], axis=1)
    k = jnp.concatenate([kc, ki], axis=1)
    v = jnp.concatenate([vc, vi], axis=1)
    n = nc + ni

    def heads(t):
        return t.reshape(bsz, n, nh, dh).transpose(0, 2, 1, 3)   # (B, H, N, Dh)

    qh, kh, vh = heads(q), heads(k), heads(v)

    half = dh // 2
    inv_freq = 1.0 / (rope_base ** (jnp.arange(0, dh, 2, dtype=f32) / dh))
    pos = jnp.arange(n, dtype=f32)
    ang = pos[:, None] * inv_freq[None, :]
    cos_t = jnp.concatenate([jnp.cos(ang), jnp.cos(ang)], axis=-1)
    sin_t = jnp.concatenate([jnp.sin(ang), jnp.sin(ang)], axis=-1)

    def rope(t):
        rot = jnp.concatenate([-t[..., half:], t[..., :half]], axis=-1)
        return t * cos_t + rot * sin_t

    scale = dh ** -0.5
    qr = (rope(qh) * scale).astype(bf16)
    kr = rope(kh).astype(bf16)
    s = jnp.einsum("bhqd,bhkd->bhqk", qr, kr, preferred_element_type=f32)
    pa = jax.nn.softmax(s, axis=-1)
    o = jnp.einsum("bhqk,bhkd->bhqd", pa.astype(bf16), vh.astype(bf16),
                   preferred_element_type=f32)
    o = o.transpose(0, 2, 1, 3).reshape(bsz, n, dim).astype(bf16)

    def proj_res(a, w, b, res, gate):
        yv = jnp.dot(a, w, preferred_element_type=f32) + b
        return res + yv * gate[:, None, :]

    x1 = proj_res(o[:, nc:, :], p["proj_in_w"], p["proj_in_b"], x, g_i)
    c1 = proj_res(o[:, :nc, :], p["proj_ctx_w"], p["proj_ctx_b"], ctx, g_c)

    def mlp_res(t, g2, sc, sh, w1, b1, w2, b2, zg):
        tm_ = (rms(t, g2) * (1.0 + sc[:, None, :]) + sh[:, None, :]).astype(bf16)
        hpre = jnp.dot(tm_, w1, preferred_element_type=f32) + b1
        hact = 0.5 * hpre * (1.0 + jnp.tanh(_GELU_C * (hpre + 0.044715 * hpre * hpre * hpre)))
        yv = jnp.dot(hact.astype(bf16), w2, preferred_element_type=f32) + b2
        return t + yv * zg[:, None, :]

    x2 = mlp_res(x1, p["norm2_in_g"], d_i, e_i, p["mlp_in_w1"], p["mlp_in_b1"],
                 p["mlp_in_w2"], p["mlp_in_b2"], z_i)
    c2 = mlp_res(c1, p["norm2_ctx_g"], d_c, e_c, p["mlp_ctx_w1"], p["mlp_ctx_b1"],
                 p["mlp_ctx_w2"], p["mlp_ctx_b2"], z_c)
    return x2, c2


# ---------------------------------------------------------------------------
# Deterministic parameter init (shapes follow MMDiTBlock.__init__)
# ---------------------------------------------------------------------------
def init_params(key, context_dim, input_dim, hidden_dim, embedding_dim, mlp_ratio):
    keys = iter(jax.random.split(key, 40))

    def lin(din, dout):
        w = (jax.random.normal(next(keys), (din, dout), jnp.float32) * 0.02).astype(jnp.bfloat16)
        b = jax.random.normal(next(keys), (dout,), jnp.float32) * 0.02
        return w, b

    p = {}
    p["mod_in_w"], p["mod_in_b"] = lin(embedding_dim, 6 * input_dim)
    p["mod_ctx_w"], p["mod_ctx_b"] = lin(embedding_dim, 6 * context_dim)
    p["norm1_in_g"] = jnp.ones((input_dim,), jnp.float32)
    p["norm1_ctx_g"] = jnp.ones((context_dim,), jnp.float32)
    p["qkv_in_w"], p["qkv_in_b"] = lin(input_dim, 3 * hidden_dim)
    p["qkv_ctx_w"], p["qkv_ctx_b"] = lin(context_dim, 3 * hidden_dim)
    p["qn_in_q"] = jnp.ones((hidden_dim,), jnp.float32)
    p["qn_in_k"] = jnp.ones((hidden_dim,), jnp.float32)
    p["qn_ctx_q"] = jnp.ones((hidden_dim,), jnp.float32)
    p["qn_ctx_k"] = jnp.ones((hidden_dim,), jnp.float32)
    p["proj_in_w"], p["proj_in_b"] = lin(hidden_dim, input_dim)
    p["proj_ctx_w"], p["proj_ctx_b"] = lin(hidden_dim, context_dim)
    p["norm2_in_g"] = jnp.ones((input_dim,), jnp.float32)
    p["norm2_ctx_g"] = jnp.ones((context_dim,), jnp.float32)
    p["mlp_in_w1"], p["mlp_in_b1"] = lin(input_dim, mlp_ratio * input_dim)
    p["mlp_in_w2"], p["mlp_in_b2"] = lin(mlp_ratio * input_dim, input_dim)
    p["mlp_ctx_w1"], p["mlp_ctx_b1"] = lin(context_dim, mlp_ratio * context_dim)
    p["mlp_ctx_w2"], p["mlp_ctx_b2"] = lin(mlp_ratio * context_dim, context_dim)
    return p


if __name__ == "__main__":
    # Small, lane-aligned config: head_dim = 128 so every attention block is a
    # multiple of 128 lanes; forced small seq / hidden tiles exercise the
    # multi-step flash / MLP / seq-tile pipelines.
    B, Ni, Nc = 2, 16, 8
    input_dim = context_dim = embedding_dim = 128
    hidden_dim = 256
    num_heads = 2          # head_dim = 128
    mlp_ratio = 4

    root = jax.random.PRNGKey(0)
    kp, kx, ky, kc = jax.random.split(root, 4)
    params = init_params(kp, context_dim, input_dim, hidden_dim, embedding_dim, mlp_ratio)

    x = jax.random.normal(kx, (B, Ni, input_dim), jnp.float32)
    y = jax.random.normal(ky, (B, embedding_dim), jnp.float32)
    ctx = jax.random.normal(kc, (B, Nc, context_dim), jnp.float32)

    fwd = jax.jit(functools.partial(block_forward_pallas, num_heads=num_heads,
                                    block_seq=8, block_q=8, block_kv=8,
                                    block_mlp_hidden=256))
    out_in, out_ctx = fwd(params, x, y, ctx)
    jax.block_until_ready((out_in, out_ctx))

    ref_in, ref_ctx = block_forward_ref(params, x, y, ctx, num_heads)
    np.testing.assert_allclose(np.asarray(out_in), np.asarray(ref_in), rtol=2e-2, atol=2e-2)
    np.testing.assert_allclose(np.asarray(out_ctx), np.asarray(ref_ctx), rtol=2e-2, atol=2e-2)
    assert out_in.shape == (B, Ni, input_dim) and out_ctx.shape == (B, Nc, context_dim)

    print("KERNEL_OK")
</pallas_src>

<mosaic_0001>
module attributes {stable_mosaic.version = 11 : i64} {
  func.func @_modulation_kernel(%arg0: i32, %arg1: memref<2x128xf32, #tpu.memory_space<vmem>>, %arg2: memref<128x128xbf16, #tpu.memory_space<vmem>>, %arg3: memref<1x128xf32, #tpu.memory_space<vmem>>, %arg4: memref<128x128xbf16, #tpu.memory_space<vmem>>, %arg5: memref<1x128xf32, #tpu.memory_space<vmem>>, %arg6: memref<2x128xf32, #tpu.memory_space<vmem>>, %arg7: memref<2x128xf32, #tpu.memory_space<vmem>>) attributes {dimension_semantics = [#tpu.dimension_semantics<parallel>], iteration_bounds = array<i64: 6>, scalar_prefetch = 0 : i64, scratch_operands = 0 : i64, tpu.core_type = #tpu.core_type<tc>, window_params = [{pipeline_mode = #tpu.pipeline_mode<synchronous>, transform_indices = @transform_0, window_bounds = array<i64: 2, 128>}, {transform_indices = @transform_1, window_bounds = array<i64: 128, 128>}, {transform_indices = @transform_2, window_bounds = array<i64: 1, 128>}, {transform_indices = @transform_3, window_bounds = array<i64: 128, 128>}, {transform_indices = @transform_4, window_bounds = array<i64: 1, 128>}, {transform_indices = @transform_5, window_bounds = array<i64: 2, 128>}, {transform_indices = @transform_6, window_bounds = array<i64: 2, 128>}]} {
    %c0 = arith.constant 0 : index
    %c0_0 = arith.constant 0 : index
    %0 = vector.load %arg1[%c0, %c0_0] : memref<2x128xf32, #tpu.memory_space<vmem>>, vector<2x128xf32>
    %cst = arith.constant 0.000000e+00 : f32
    %1 = vector.broadcast %cst : f32 to vector<2x128xf32>
    %2 = arith.subf %1, %0 : vector<2x128xf32>
    %3 = math.exp %2 : vector<2x128xf32>
    %cst_1 = arith.constant 1.000000e+00 : f32
    %4 = vector.broadcast %cst_1 : f32 to vector<2x128xf32>
    %5 = arith.addf %4, %3 : vector<2x128xf32>
    %cst_2 = arith.constant 1.000000e+00 : f32
    %6 = vector.broadcast %cst_2 : f32 to vector<2x128xf32>
    %7 = arith.divf %6, %5 : vector<2x128xf32>
    %8 = arith.mulf %0, %7 : vector<2x128xf32>
    %9 = arith.truncf %8 : vector<2x128xf32> to vector<2x128xbf16>
    %c0_3 = arith.constant 0 : index
    %c0_4 = arith.constant 0 : index
    %10 = vector.load %arg2[%c0_3, %c0_4] : memref<128x128xbf16, #tpu.memory_space<vmem>>, vector<128x128xbf16>
    %cst_5 = arith.constant dense<0.000000e+00> : vector<2x128xf32>
    %11 = tpu.matmul %9, %10, %cst_5 {dimension_numbers = #tpu.dot_dimension_numbers<[1], [0], [0], [1], [0, 0, 1, 1], [], []>} : vector<2x128xbf16>, vector<128x128xbf16>, vector<2x128xf32> -> vector<2x128xf32>
    %c0_6 = arith.constant 0 : index
    %c0_7 = arith.constant 0 : index
    %12 = vector.load %arg3[%c0_6, %c0_7] : memref<1x128xf32, #tpu.memory_space<vmem>>, vector<1x128xf32>
    %13 = vector.broadcast %12 : vector<1x128xf32> to vector<2x128xf32>
    %14 = arith.addf %11, %13 : vector<2x128xf32>
    %c0_8 = arith.constant 0 : index
    %c0_9 = arith.constant 0 : index
    %15 = vector.load %arg6[%c0_8, %c0_9] : memref<2x128xf32, #tpu.memory_space<vmem>>, vector<2x128xf32>
    tpu.vector_store %arg6[%c0_8, %c0_9], %14 {strides = array<i32>} : memref<2x128xf32, #tpu.memory_space<vmem>>, vector<2x128xf32>,
    %c0_10 = arith.constant 0 : index
    %c0_11 = arith.constant 0 : index
    %16 = vector.load %arg4[%c0_10, %c0_11] : memref<128x128xbf16, #tpu.memory_space<vmem>>, vector<128x128xbf16>
    %cst_12 = arith.constant dense<0.000000e+00> : vector<2x128xf32>
    %17 = tpu.matmul %9, %16, %cst_12 {dimension_numbers = #tpu.dot_dimension_numbers<[1], [0], [0], [1], [0, 0, 1, 1], [], []>} : vector<2x128xbf16>, vector<128x128xbf16>, vector<2x128xf32> -> vector<2x128xf32>
    %c0_13 = arith.constant 0 : index
    %c0_14 = arith.constant 0 : index
    %18 = vector.load %arg5[%c0_13, %c0_14] : memref<1x128xf32, #tpu.memory_space<vmem>>, vector<1x128xf32>
    %19 = vector.broadcast %18 : vector<1x128xf32> to vector<2x128xf32>
    %20 = arith.addf %17, %19 : vector<2x128xf32>
    %c0_15 = arith.constant 0 : index
    %c0_16 = arith.constant 0 : index
    %21 = vector.load %arg7[%c0_15, %c0_16] : memref<2x128xf32, #tpu.memory_space<vmem>>, vector<2x128xf32>
    tpu.vector_store %arg7[%c0_15, %c0_16], %20 {strides = array<i32>} : memref<2x128xf32, #tpu.memory_space<vmem>>, vector<2x128xf32>,
    return
  }
  func.func @transform_0(%arg0: i32) -> (i32, i32) {
    %c0_i32 = arith.constant 0 : i32
    %c0_i32_0 = arith.constant 0 : i32
    %c0_i32_1 = arith.constant 0 : i32
    return %c0_i32, %c0_i32_0 : i32, i32
  }
  func.func @transform_1(%arg0: i32) -> (i32, i32) {
    %c0_i32 = arith.constant 0 : i32
    %c0_i32_0 = arith.constant 0 : i32
    return %c0_i32, %arg0 : i32, i32
  }
  func.func @transform_2(%arg0: i32) -> (i32, i32) {
    %c0_i32 = arith.constant 0 : i32
    %c0_i32_0 = arith.constant 0 : i32
    return %c0_i32, %arg0 : i32, i32
  }
  func.func @transform_3(%arg0: i32) -> (i32, i32) {
    %c0_i32 = arith.constant 0 : i32
    %c0_i32_0 = arith.constant 0 : i32
    return %c0_i32, %arg0 : i32, i32
  }
  func.func @transform_4(%arg0: i32) -> (i32, i32) {
    %c0_i32 = arith.constant 0 : i32
    %c0_i32_0 = arith.constant 0 : i32
    return %c0_i32, %arg0 : i32, i32
  }
  func.func @transform_5(%arg0: i32) -> (i32, i32) {
    %c0_i32 = arith.constant 0 : i32
    %c0_i32_0 = arith.constant 0 : i32
    return %c0_i32, %arg0 : i32, i32
  }
  func.func @transform_6(%arg0: i32) -> (i32, i32) {
    %c0_i32 = arith.constant 0 : i32
    %c0_i32_0 = arith.constant 0 : i32
    return %c0_i32, %arg0 : i32, i32
  }
}

module attributes {stable_mosaic.version = 11 : i64} {
  func.func @_norm_mod_qkv_rope_kernel(%arg0: i32, %arg1: i32, %arg2: memref<1x8x128xf32, #tpu.memory_space<vmem>>, %arg3: memref<1x128xf32, #tpu.memory_space<vmem>>, %arg4: memref<1x1x128xf32, #tpu.memory_space<vmem>>, %arg5: memref<1x1x128xf32, #tpu.memory_space<vmem>>, %arg6: memref<128x768xbf16, #tpu.memory_space<vmem>>, %arg7: memref<1x768xf32, #tpu.memory_space<vmem>>, %arg8: memref<1x256xf32, #tpu.memory_space<vmem>>, %arg9: memref<1x256xf32, #tpu.memory_space<vmem>>, %arg10: memref<8x256xf32, #tpu.memory_space<vmem>>, %arg11: memref<8x256xf32, #tpu.memory_space<vmem>>, %arg12: memref<1x8x768xbf16, #tpu.memory_space<vmem>>) attributes {dimension_semantics = [#tpu.dimension_semantics<parallel>, #tpu.dimension_semantics<parallel>], iteration_bounds = array<i64: 2, 1>, scalar_prefetch = 0 : i64, scratch_operands = 0 : i64, tpu.core_type = #tpu.core_type<tc>, window_params = [{transform_indices = @transform_0, window_bounds = array<i64: 1, 8, 128>}, {pipeline_mode = #tpu.pipeline_mode<synchronous>, transform_indices = @transform_1, window_bounds = array<i64: 1, 128>}, {transform_indices = @transform_2, window_bounds = array<i64: 1, 1, 128>}, {transform_indices = @transform_3, window_bounds = array<i64: 1, 1, 128>}, {pipeline_mode = #tpu.pipeline_mode<synchronous>, transform_indices = @transform_4, window_bounds = array<i64: 128, 768>}, {pipeline_mode = #tpu.pipeline_mode<synchronous>, transform_indices = @transform_5, window_bounds = array<i64: 1, 768>}, {pipeline_mode = #tpu.pipeline_mode<synchronous>, transform_indices = @transform_6, window_bounds = array<i64: 1, 256>}, {pipeline_mode = #tpu.pipeline_mode<synchronous>, transform_indices = @transform_7, window_bounds = array<i64: 1, 256>}, {transform_indices = @transform_8, window_bounds = array<i64: 8, 256>}, {transform_indices = @transform_9, window_bounds = array<i64: 8, 256>}, {transform_indices = @transform_10, window_bounds = array<i64: 1, 8, 768>}]} {
    %c0 = arith.constant 0 : index
    %c0_0 = arith.constant 0 : index
    %c0_1 = arith.constant 0 : index
    %0 = vector.load %arg2[%c0, %c0_0, %c0_1] : memref<1x8x128xf32, #tpu.memory_space<vmem>>, vector<1x8x128xf32>
    %1 = vector.shape_cast %0 : vector<1x8x128xf32> to vector<8x128xf32>
    %2 = arith.mulf %1, %1 : vector<8x128xf32>
    %cst = arith.constant dense<0.000000e+00> : vector<8xf32>
    %3 = vector.multi_reduction <add>, %2, %cst [1] : vector<8x128xf32> to vector<8xf32>
    %4 = vector.shape_cast %3 : vector<8xf32> to vector<8x1xf32>
    %cst_2 = arith.constant 1.280000e+02 : f32
    %5 = vector.broadcast %cst_2 : f32 to vector<8x1xf32>
    %6 = arith.divf %4, %5 : vector<8x1xf32>
    %cst_3 = arith.constant 9.99999997E-7 : f32
    %7 = vector.broadcast %cst_3 : f32 to vector<8x1xf32>
    %8 = arith.addf %6, %7 : vector<8x1xf32>
    %9 = math.rsqrt %8 : vector<8x1xf32>
    %10 = vector.broadcast %9 : vector<8x1xf32> to vector<8x128xf32>
    %11 = arith.mulf %1, %10 : vector<8x128xf32>
    %c0_4 = arith.constant 0 : index
    %c0_5 = arith.constant 0 : index
    %12 = vector.load %arg3[%c0_4, %c0_5] : memref<1x128xf32, #tpu.memory_space<vmem>>, vector<1x128xf32>
    %13 = vector.broadcast %12 : vector<1x128xf32> to vector<8x128xf32>
    %14 = arith.mulf %11, %13 : vector<8x128xf32>
    %c0_6 = arith.constant 0 : index
    %c0_7 = arith.constant 0 : index
    %c0_8 = arith.constant 0 : index
    %15 = vector.load %arg4[%c0_6, %c0_7, %c0_8] : memref<1x1x128xf32, #tpu.memory_space<vmem>>, vector<1x1x128xf32>
    %16 = vector.shape_cast %15 : vector<1x1x128xf32> to vector<1x128xf32>
    %cst_9 = arith.constant 1.000000e+00 : f32
    %17 = vector.broadcast %cst_9 : f32 to vector<1x128xf32>
    %18 = arith.addf %17, %16 : vector<1x128xf32>
    %19 = vector.broadcast %18 : vector<1x128xf32> to vector<8x128xf32>
    %20 = arith.mulf %14, %19 : vector<8x128xf32>
    %c0_10 = arith.constant 0 : index
    %c0_11 = arith.constant 0 : index
    %c0_12 = arith.constant 0 : index
    %21 = vector.load %arg5[%c0_10, %c0_11, %c0_12] : memref<1x1x128xf32, #tpu.memory_space<vmem>>, vector<1x1x128xf32>
    %22 = vector.shape_cast %21 : vector<1x1x128xf32> to vector<1x128xf32>
    %23 = vector.broadcast %22 : vector<1x128xf32> to vector<8x128xf32>
    %24 = arith.addf %20, %23 : vector<8x128xf32>
    %25 = arith.truncf %24 : vector<8x128xf32> to vector<8x128xbf16>
    %c0_13 = arith.constant 0 : index
    %c0_14 = arith.constant 0 : index
    %26 = vector.load %arg6[%c0_13, %c0_14] : memref<128x768xbf16, #tpu.memory_space<vmem>>, vector<128x768xbf16>
    %cst_15 = arith.constant dense<0.000000e+00> : vector<8x768xf32>
    %27 = tpu.matmul %25, %26, %cst_15 {dimension_numbers = #tpu.dot_dimension_numbers<[1], [0], [0], [1], [0, 0, 1, 1], [], []>} : vector<8x128xbf16>, vector<128x768xbf16>, vector<8x768xf32> -> vector<8x768xf32>
    %c0_16 = arith.constant 0 : index
    %c0_17 = arith.constant 0 : index
    %28 = vector.load %arg7[%c0_16, %c0_17] : memref<1x768xf32, #tpu.memory_space<vmem>>, vector<1x768xf32>
    %29 = vector.broadcast %28 : vector<1x768xf32> to vector<8x768xf32>
    %30 = arith.addf %27, %29 : vector<8x768xf32>
    %31 = vector.extract_strided_slice %30 {offsets = [0, 0], sizes = [8, 256], strides = [1, 1]} : vector<8x768xf32> to vector<8x256xf32>
    %32 = vector.extract_strided_slice %30 {offsets = [0, 256], sizes = [8, 256], strides = [1, 1]} : vector<8x768xf32> to vector<8x256xf32>
    %33 = vector.extract_strided_slice %30 {offsets = [0, 512], sizes = [8, 256], strides = [1, 1]} : vector<8x768xf32> to vector<8x256xf32>
    %34 = arith.mulf %31, %31 : vector<8x256xf32>
    %cst_18 = arith.constant dense<0.000000e+00> : vector<8xf32>
    %35 = vector.multi_reduction <add>, %34, %cst_18 [1] : vector<8x256xf32> to vector<8xf32>
    %36 = vector.shape_cast %35 : vector<8xf32> to vector<8x1xf32>
    %cst_19 = arith.constant 2.560000e+02 : f32
    %37 = vector.broadcast %cst_19 : f32 to vector<8x1xf32>
    %38 = arith.divf %36, %37 : vector<8x1xf32>
    %cst_20 = arith.constant 9.99999997E-7 : f32
    %39 = vector.broadcast %cst_20 : f32 to vector<8x1xf32>
    %40 = arith.addf %38, %39 : vector<8x1xf32>
    %41 = math.rsqrt %40 : vector<8x1xf32>
    %42 = vector.broadcast %41 : vector<8x1xf32> to vector<8x256xf32>
    %43 = arith.mulf %31, %42 : vector<8x256xf32>
    %c0_21 = arith.constant 0 : index
    %c0_22 = arith.constant 0 : index
    %44 = vector.load %arg8[%c0_21, %c0_22] : memref<1x256xf32, #tpu.memory_space<vmem>>, vector<1x256xf32>
    %45 = vector.broadcast %44 : vector<1x256xf32> to vector<8x256xf32>
    %46 = arith.mulf %43, %45 : vector<8x256xf32>
    %47 = arith.mulf %32, %32 : vector<8x256xf32>
    %cst_23 = arith.constant dense<0.000000e+00> : vector<8xf32>
    %48 = vector.multi_reduction <add>, %47, %cst_23 [1] : vector<8x256xf32> to vector<8xf32>
    %49 = vector.shape_cast %48 : vector<8xf32> to vector<8x1xf32>
    %cst_24 = arith.constant 2.560000e+02 : f32
    %50 = vector.broadcast %cst_24 : f32 to vector<8x1xf32>
    %51 = arith.divf %49, %50 : vector<8x1xf32>
    %cst_25 = arith.constant 9.99999997E-7 : f32
    %52 = vector.broadcast %cst_25 : f32 to vector<8x1xf32>
    %53 = arith.addf %51, %52 : vector<8x1xf32>
    %54 = math.rsqrt %53 : vector<8x1xf32>
    %55 = vector.broadcast %54 : vector<8x1xf32> to vector<8x256xf32>
    %56 = arith.mulf %32, %55 : vector<8x256xf32>
    %c0_26 = arith.constant 0 : index
    %c0_27 = arith.constant 0 : index
    %57 = vector.load %arg9[%c0_26, %c0_27] : memref<1x256xf32, #tpu.memory_space<vmem>>, vector<1x256xf32>
    %58 = vector.broadcast %57 : vector<1x256xf32> to vector<8x256xf32>
    %59 = arith.mulf %56, %58 : vector<8x256xf32>
    %c0_28 = arith.constant 0 : index
    %c0_29 = arith.constant 0 : index
    %60 = vector.load %arg10[%c0_28, %c0_29] : memref<8x256xf32, #tpu.memory_space<vmem>>, vector<8x256xf32>
    %c0_30 = arith.constant 0 : index
    %c0_31 = arith.constant 0 : index
    %61 = vector.load %arg11[%c0_30, %c0_31] : memref<8x256xf32, #tpu.memory_space<vmem>>, vector<8x256xf32>
    %62 = arith.mulf %46, %60 : vector<8x256xf32>
    %63 = vector.extract_strided_slice %46 {offsets = [0, 0], sizes = [8, 128], strides = [1, 1]} : vector<8x256xf32> to vector<8x128xf32>
    %64 = vector.extract_strided_slice %63 {offsets = [0, 64], sizes = [8, 64], strides = [1, 1]} : vector<8x128xf32> to vector<8x64xf32>
    %65 = vector.extract_strided_slice %63 {offsets = [0, 0], sizes = [8, 64], strides = [1, 1]} : vector<8x128xf32> to vector<8x64xf32>
    %66 = vector.extract_strided_slice %46 {offsets = [0, 128], sizes = [8, 128], strides = [1, 1]} : vector<8x256xf32> to vector<8x128xf32>
    %67 = vector.extract_strided_slice %66 {offsets = [0, 64], sizes = [8, 64], strides = [1, 1]} : vector<8x128xf32> to vector<8x64xf32>
    %68 = vector.extract_strided_slice %66 {offsets = [0, 0], sizes = [8, 64], strides = [1, 1]} : vector<8x128xf32> to vector<8x64xf32>
    %69 = tpu.concatenate %64, %65, %67, %68 in 1 : vector<8x64xf32>, vector<8x64xf32>, vector<8x64xf32>, vector<8x64xf32> -> vector<8x256xf32>
    %70 = arith.mulf %69, %61 : vector<8x256xf32>
    %71 = arith.addf %62, %70 : vector<8x256xf32>
    %72 = arith.mulf %59, %60 : vector<8x256xf32>
    %73 = vector.extract_strided_slice %59 {offsets = [0, 0], sizes = [8, 128], strides = [1, 1]} : vector<8x256xf32> to vector<8x128xf32>
    %74 = vector.extract_strided_slice %73 {offsets = [0, 64], sizes = [8, 64], strides = [1, 1]} : vector<8x128xf32> to vector<8x64xf32>
    %75 = vector.extract_strided_slice %73 {offsets = [0, 0], sizes = [8, 64], strides = [1, 1]} : vector<8x128xf32> to vector<8x64xf32>
    %76 = vector.extract_strided_slice %59 {offsets = [0, 128], sizes = [8, 128], strides = [1, 1]} : vector<8x256xf32> to vector<8x128xf32>
    %77 = vector.extract_strided_slice %76 {offsets = [0, 64], sizes = [8, 64], strides = [1, 1]} : vector<8x128xf32> to vector<8x64xf32>
    %78 = vector.extract_strided_slice %76 {offsets = [0, 0], sizes = [8, 64], strides = [1, 1]} : vector<8x128xf32> to vector<8x64xf32>
    %79 = tpu.concatenate %74, %75, %77, %78 in 1 : vector<8x64xf32>, vector<8x64xf32>, vector<8x64xf32>, vector<8x64xf32> -> vector<8x256xf32>
    %80 = arith.mulf %79, %61 : vector<8x256xf32>
    %81 = arith.addf %72, %80 : vector<8x256xf32>
    %82 = tpu.concatenate %71, %81, %33 in 1 : vector<8x256xf32>, vector<8x256xf32>, vector<8x256xf32> -> vector<8x768xf32>
    %83 = arith.truncf %82 : vector<8x768xf32> to vector<8x768xbf16>
    %c0_32 = arith.constant 0 : index
    %c0_33 = arith.constant 0 : index
    %c0_34 = arith.constant 0 : index
    %84 = vector.load %arg12[%c0_32, %c0_33, %c0_34] : memref<1x8x768xbf16, #tpu.memory_space<vmem>>, vector<1x8x768xbf16>
    %85 = vector.shape_cast %84 : vector<1x8x768xbf16> to vector<8x768xbf16>
    %86 = vector.shape_cast %83 : vector<8x768xbf16> to vector<1x8x768xbf16>
    tpu.vector_store %arg12[%c0_32, %c0_33, %c0_34], %86 {strides = array<i32>} : memref<1x8x768xbf16, #tpu.memory_space<vmem>>, vector<1x8x768xbf16>,
    return
  }
  func.func @transform_0(%arg0: i32, %arg1: i32) -> (i32, i32, i32) {
    %c0_i32 = arith.constant 0 : i32
    %c0_i32_0 = arith.constant 0 : i32
    return %arg0, %arg1, %c0_i32 : i32, i32, i32
  }
  func.func @transform_1(%arg0: i32, %arg1: i32) -> (i32, i32) {
    %c0_i32 = arith.constant 0 : i32
    %c0_i32_0 = arith.constant 0 : i32
    %c0_i32_1 = arith.constant 0 : i32
    return %c0_i32, %c0_i32_0 : i32, i32
  }
  func.func @transform_2(%arg0: i32, %arg1: i32) -> (i32, i32, i32) {
    %c0_i32 = arith.constant 0 : i32
    %c0_i32_0 = arith.constant 0 : i32
    %c0_i32_1 = arith.constant 0 : i32
    return %arg0, %c0_i32, %c0_i32_0 : i32, i32, i32
  }
  func.func @transform_3(%arg0: i32, %arg1: i32) -> (i32, i32, i32) {
    %c0_i32 = arith.constant 0 : i32
    %c0_i32_0 = arith.constant 0 : i32
    %c0_i32_1 = arith.constant 0 : i32
    return %arg0, %c0_i32, %c0_i32_0 : i32, i32, i32
  }
  func.func @transform_4(%arg0: i32, %arg1: i32) -> (i32, i32) {
    %c0_i32 = arith.constant 0 : i32
    %c0_i32_0 = arith.constant 0 : i32
    %c0_i32_1 = arith.constant 0 : i32
    return %c0_i32, %c0_i32_0 : i32, i32
  }
  func.func @transform_5(%arg0: i32, %arg1: i32) -> (i32, i32) {
    %c0_i32 = arith.constant 0 : i32
    %c0_i32_0 = arith.constant 0 : i32
    %c0_i32_1 = arith.constant 0 : i32
    return %c0_i32, %c0_i32_0 : i32, i32
  }
  func.func @transform_6(%arg0: i32, %arg1: i32) -> (i32, i32) {
    %c0_i32 = arith.constant 0 : i32
    %c0_i32_0 = arith.constant 0 : i32
    %c0_i32_1 = arith.constant 0 : i32
    return %c0_i32, %c0_i32_0 : i32, i32
  }
  func.func @transform_7(%arg0: i32, %arg1: i32) -> (i32, i32) {
    %c0_i32 = arith.constant 0 : i32
    %c0_i32_0 = arith.constant 0 : i32
    %c0_i32_1 = arith.constant 0 : i32
    return %c0_i32, %c0_i32_0 : i32, i32
  }
  func.func @transform_8(%arg0: i32, %arg1: i32) -> (i32, i32) {
    %c0_i32 = arith.constant 0 : i32
    %c0_i32_0 = arith.constant 0 : i32
    return %arg1, %c0_i32 : i32, i32
  }
  func.func @transform_9(%arg0: i32, %arg1: i32) -> (i32, i32) {
    %c0_i32 = arith.constant 0 : i32
    %c0_i32_0 = arith.constant 0 : i32
    return %arg1, %c0_i32 : i32, i32
  }
  func.func @transform_10(%arg0: i32, %arg1: i32) -> (i32, i32, i32) {
    %c0_i32 = arith.constant 0 : i32
    %c0_i32_0 = arith.constant 0 : i32
    return %arg0, %arg1, %c0_i32 : i32, i32, i32
  }
}

module attributes {stable_mosaic.version = 11 : i64} {
  func.func @_norm_mod_qkv_rope_kernel(%arg0: i32, %arg1: i32, %arg2: memref<1x8x128xf32, #tpu.memory_space<vmem>>, %arg3: memref<1x128xf32, #tpu.memory_space<vmem>>, %arg4: memref<1x1x128xf32, #tpu.memory_space<vmem>>, %arg5: memref<1x1x128xf32, #tpu.memory_space<vmem>>, %arg6: memref<128x768xbf16, #tpu.memory_space<vmem>>, %arg7: memref<1x768xf32, #tpu.memory_space<vmem>>, %arg8: memref<1x256xf32, #tpu.memory_space<vmem>>, %arg9: memref<1x256xf32, #tpu.memory_space<vmem>>, %arg10: memref<8x256xf32, #tpu.memory_space<vmem>>, %arg11: memref<8x256xf32, #tpu.memory_space<vmem>>, %arg12: memref<1x8x768xbf16, #tpu.memory_space<vmem>>) attributes {dimension_semantics = [#tpu.dimension_semantics<parallel>, #tpu.dimension_semantics<parallel>], iteration_bounds = array<i64: 2, 2>, scalar_prefetch = 0 : i64, scratch_operands = 0 : i64, tpu.core_type = #tpu.core_type<tc>, window_params = [{transform_indices = @transform_0, window_bounds = array<i64: 1, 8, 128>}, {pipeline_mode = #tpu.pipeline_mode<synchronous>, transform_indices = @transform_1, window_bounds = array<i64: 1, 128>}, {transform_indices = @transform_2, window_bounds = array<i64: 1, 1, 128>}, {transform_indices = @transform_3, window_bounds = array<i64: 1, 1, 128>}, {pipeline_mode = #tpu.pipeline_mode<synchronous>, transform_indices = @transform_4, window_bounds = array<i64: 128, 768>}, {pipeline_mode = #tpu.pipeline_mode<synchronous>, transform_indices = @transform_5, window_bounds = array<i64: 1, 768>}, {pipeline_mode = #tpu.pipeline_mode<synchronous>, transform_indices = @transform_6, window_bounds = array<i64: 1, 256>}, {pipeline_mode = #tpu.pipeline_mode<synchronous>, transform_indices = @transform_7, window_bounds = array<i64: 1, 256>}, {transform_indices = @transform_8, window_bounds = array<i64: 8, 256>}, {transform_indices = @transform_9, window_bounds = array<i64: 8, 256>}, {transform_indices = @transform_10, window_bounds = array<i64: 1, 8, 768>}]} {
    %c0 = arith.constant 0 : index
    %c0_0 = arith.constant 0 : index
    %c0_1 = arith.constant 0 : index
    %0 = vector.load %arg2[%c0, %c0_0, %c0_1] : memref<1x8x128xf32, #tpu.memory_space<vmem>>, vector<1x8x128xf32>
    %1 = vector.shape_cast %0 : vector<1x8x128xf32> to vector<8x128xf32>
    %2 = arith.mulf %1, %1 : vector<8x128xf32>
    %cst = arith.constant dense<0.000000e+00> : vector<8xf32>
    %3 = vector.multi_reduction <add>, %2, %cst [1] : vector<8x128xf32> to vector<8xf32>
    %4 = vector.shape_cast %3 : vector<8xf32> to vector<8x1xf32>
    %cst_2 = arith.constant 1.280000e+02 : f32
    %5 = vector.broadcast %cst_2 : f32 to vector<8x1xf32>
    %6 = arith.divf %4, %5 : vector<8x1xf32>
    %cst_3 = arith.constant 9.99999997E-7 : f32
    %7 = vector.broadcast %cst_3 : f32 to vector<8x1xf32>
    %8 = arith.addf %6, %7 : vector<8x1xf32>
    %9 = math.rsqrt %8 : vector<8x1xf32>
    %10 = vector.broadcast %9 : vector<8x1xf32> to vector<8x128xf32>
    %11 = arith.mulf %1, %10 : vector<8x128xf32>
    %c0_4 = arith.constant 0 : index
    %c0_5 = arith.constant 0 : index
    %12 = vector.load %arg3[%c0_4, %c0_5] : memref<1x128xf32, #tpu.memory_space<vmem>>, vector<1x128xf32>
    %13 = vector.broadcast %12 : vector<1x128xf32> to vector<8x128xf32>
    %14 = arith.mulf %11, %13 : vector<8x128xf32>
    %c0_6 = arith.constant 0 : index
    %c0_7 = arith.constant 0 : index
    %c0_8 = arith.constant 0 : index
    %15 = vector.load %arg4[%c0_6, %c0_7, %c0_8] : memref<1x1x128xf32, #tpu.memory_space<vmem>>, vector<1x1x128xf32>
    %16 = vector.shape_cast %15 : vector<1x1x128xf32> to vector<1x128xf32>
    %cst_9 = arith.constant 1.000000e+00 : f32
    %17 = vector.broadcast %cst_9 : f32 to vector<1x128xf32>
    %18 = arith.addf %17, %16 : vector<1x128xf32>
    %19 = vector.broadcast %18 : vector<1x128xf32> to vector<8x128xf32>
    %20 = arith.mulf %14, %19 : vector<8x128xf32>
    %c0_10 = arith.constant 0 : index
    %c0_11 = arith.constant 0 : index
    %c0_12 = arith.constant 0 : index
    %21 = vector.load %arg5[%c0_10, %c0_11, %c0_12] : memref<1x1x128xf32, #tpu.memory_space<vmem>>, vector<1x1x128xf32>
    %22 = vector.shape_cast %21 : vector<1x1x128xf32> to vector<1x128xf32>
    %23 = vector.broadcast %22 : vector<1x128xf32> to vector<8x128xf32>
    %24 = arith.addf %20, %23 : vector<8x128xf32>
    %25 = arith.truncf %24 : vector<8x128xf32> to vector<8x128xbf16>
    %c0_13 = arith.constant 0 : index
    %c0_14 = arith.constant 0 : index
    %26 = vector.load %arg6[%c0_13, %c0_14] : memref<128x768xbf16, #tpu.memory_space<vmem>>, vector<128x768xbf16>
    %cst_15 = arith.constant dense<0.000000e+00> : vector<8x768xf32>
    %27 = tpu.matmul %25, %26, %cst_15 {dimension_numbers = #tpu.dot_dimension_numbers<[1], [0], [0], [1], [0, 0, 1, 1], [], []>} : vector<8x128xbf16>, vector<128x768xbf16>, vector<8x768xf32> -> vector<8x768xf32>
    %c0_16 = arith.constant 0 : index
    %c0_17 = arith.constant 0 : index
    %28 = vector.load %arg7[%c0_16, %c0_17] : memref<1x768xf32, #tpu.memory_space<vmem>>, vector<1x768xf32>
    %29 = vector.broadcast %28 : vector<1x768xf32> to vector<8x768xf32>
    %30 = arith.addf %27, %29 : vector<8x768xf32>
    %31 = vector.extract_strided_slice %30 {offsets = [0, 0], sizes = [8, 256], strides = [1, 1]} : vector<8x768xf32> to vector<8x256xf32>
    %32 = vector.extract_strided_slice %30 {offsets = [0, 256], sizes = [8, 256], strides = [1, 1]} : vector<8x768xf32> to vector<8x256xf32>
    %33 = vector.extract_strided_slice %30 {offsets = [0, 512], sizes = [8, 256], strides = [1, 1]} : vector<8x768xf32> to vector<8x256xf32>
    %34 = arith.mulf %31, %31 : vector<8x256xf32>
    %cst_18 = arith.constant dense<0.000000e+00> : vector<8xf32>
    %35 = vector.multi_reduction <add>, %34, %cst_18 [1] : vector<8x256xf32> to vector<8xf32>
    %36 = vector.shape_cast %35 : vector<8xf32> to vector<8x1xf32>
    %cst_19 = arith.constant 2.560000e+02 : f32
    %37 = vector.broadcast %cst_19 : f32 to vector<8x1xf32>
    %38 = arith.divf %36, %37 : vector<8x1xf32>
    %cst_20 = arith.constant 9.99999997E-7 : f32
    %39 = vector.broadcast %cst_20 : f32 to vector<8x1xf32>
    %40 = arith.addf %38, %39 : vector<8x1xf32>
    %41 = math.rsqrt %40 : vector<8x1xf32>
    %42 = vector.broadcast %41 : vector<8x1xf32> to vector<8x256xf32>
    %43 = arith.mulf %31, %42 : vector<8x256xf32>
    %c0_21 = arith.constant 0 : index
    %c0_22 = arith.constant 0 : index
    %44 = vector.load %arg8[%c0_21, %c0_22] : memref<1x256xf32, #tpu.memory_space<vmem>>, vector<1x256xf32>
    %45 = vector.broadcast %44 : vector<1x256xf32> to vector<8x256xf32>
    %46 = arith.mulf %43, %45 : vector<8x256xf32>
    %47 = arith.mulf %32, %32 : vector<8x256xf32>
    %cst_23 = arith.constant dense<0.000000e+00> : vector<8xf32>
    %48 = vector.multi_reduction <add>, %47, %cst_23 [1] : vector<8x256xf32> to vector<8xf32>
    %49 = vector.shape_cast %48 : vector<8xf32> to vector<8x1xf32>
    %cst_24 = arith.constant 2.560000e+02 : f32
    %50 = vector.broadcast %cst_24 : f32 to vector<8x1xf32>
    %51 = arith.divf %49, %50 : vector<8x1xf32>
    %cst_25 = arith.constant 9.99999997E-7 : f32
    %52 = vector.broadcast %cst_25 : f32 to vector<8x1xf32>
    %53 = arith.addf %51, %52 : vector<8x1xf32>
    %54 = math.rsqrt %53 : vector<8x1xf32>
    %55 = vector.broadcast %54 : vector<8x1xf32> to vector<8x256xf32>
    %56 = arith.mulf %32, %55 : vector<8x256xf32>
    %c0_26 = arith.constant 0 : index
    %c0_27 = arith.constant 0 : index
    %57 = vector.load %arg9[%c0_26, %c0_27] : memref<1x256xf32, #tpu.memory_space<vmem>>, vector<1x256xf32>
    %58 = vector.broadcast %57 : vector<1x256xf32> to vector<8x256xf32>
    %59 = arith.mulf %56, %58 : vector<8x256xf32>
    %c0_28 = arith.constant 0 : index
    %c0_29 = arith.constant 0 : index
    %60 = vector.load %arg10[%c0_28, %c0_29] : memref<8x256xf32, #tpu.memory_space<vmem>>, vector<8x256xf32>
    %c0_30 = arith.constant 0 : index
    %c0_31 = arith.constant 0 : index
    %61 = vector.load %arg11[%c0_30, %c0_31] : memref<8x256xf32, #tpu.memory_space<vmem>>, vector<8x256xf32>
    %62 = arith.mulf %46, %60 : vector<8x256xf32>
    %63 = vector.extract_strided_slice %46 {offsets = [0, 0], sizes = [8, 128], strides = [1, 1]} : vector<8x256xf32> to vector<8x128xf32>
    %64 = vector.extract_strided_slice %63 {offsets = [0, 64], sizes = [8, 64], strides = [1, 1]} : vector<8x128xf32> to vector<8x64xf32>
    %65 = vector.extract_strided_slice %63 {offsets = [0, 0], sizes = [8, 64], strides = [1, 1]} : vector<8x128xf32> to vector<8x64xf32>
    %66 = vector.extract_strided_slice %46 {offsets = [0, 128], sizes = [8, 128], strides = [1, 1]} : vector<8x256xf32> to vector<8x128xf32>
    %67 = vector.extract_strided_slice %66 {offsets = [0, 64], sizes = [8, 64], strides = [1, 1]} : vector<8x128xf32> to vector<8x64xf32>
    %68 = vector.extract_strided_slice %66 {offsets = [0, 0], sizes = [8, 64], strides = [1, 1]} : vector<8x128xf32> to vector<8x64xf32>
    %69 = tpu.concatenate %64, %65, %67, %68 in 1 : vector<8x64xf32>, vector<8x64xf32>, vector<8x64xf32>, vector<8x64xf32> -> vector<8x256xf32>
    %70 = arith.mulf %69, %61 : vector<8x256xf32>
    %71 = arith.addf %62, %70 : vector<8x256xf32>
    %72 = arith.mulf %59, %60 : vector<8x256xf32>
    %73 = vector.extract_strided_slice %59 {offsets = [0, 0], sizes = [8, 128], strides = [1, 1]} : vector<8x256xf32> to vector<8x128xf32>
    %74 = vector.extract_strided_slice %73 {offsets = [0, 64], sizes = [8, 64], strides = [1, 1]} : vector<8x128xf32> to vector<8x64xf32>
    %75 = vector.extract_strided_slice %73 {offsets = [0, 0], sizes = [8, 64], strides = [1, 1]} : vector<8x128xf32> to vector<8x64xf32>
    %76 = vector.extract_strided_slice %59 {offsets = [0, 128], sizes = [8, 128], strides = [1, 1]} : vector<8x256xf32> to vector<8x128xf32>
    %77 = vector.extract_strided_slice %76 {offsets = [0, 64], sizes = [8, 64], strides = [1, 1]} : vector<8x128xf32> to vector<8x64xf32>
    %78 = vector.extract_strided_slice %76 {offsets = [0, 0], sizes = [8, 64], strides = [1, 1]} : vector<8x128xf32> to vector<8x64xf32>
    %79 = tpu.concatenate %74, %75, %77, %78 in 1 : vector<8x64xf32>, vector<8x64xf32>, vector<8x64xf32>, vector<8x64xf32> -> vector<8x256xf32>
    %80 = arith.mulf %79, %61 : vector<8x256xf32>
    %81 = arith.addf %72, %80 : vector<8x256xf32>
    %82 = tpu.concatenate %71, %81, %33 in 1 : vector<8x256xf32>, vector<8x256xf32>, vector<8x256xf32> -> vector<8x768xf32>
    %83 = arith.truncf %82 : vector<8x768xf32> to vector<8x768xbf16>
    %c0_32 = arith.constant 0 : index
    %c0_33 = arith.constant 0 : index
    %c0_34 = arith.constant 0 : index
    %84 = vector.load %arg12[%c0_32, %c0_33, %c0_34] : memref<1x8x768xbf16, #tpu.memory_space<vmem>>, vector<1x8x768xbf16>
    %85 = vector.shape_cast %84 : vector<1x8x768xbf16> to vector<8x768xbf16>
    %86 = vector.shape_cast %83 : vector<8x768xbf16> to vector<1x8x768xbf16>
    tpu.vector_store %arg12[%c0_32, %c0_33, %c0_34], %86 {strides = array<i32>} : memref<1x8x768xbf16, #tpu.memory_space<vmem>>, vector<1x8x768xbf16>,
    return
  }
  func.func @transform_0(%arg0: i32, %arg1: i32) -> (i32, i32, i32) {
    %c0_i32 = arith.constant 0 : i32
    %c0_i32_0 = arith.constant 0 : i32
    return %arg0, %arg1, %c0_i32 : i32, i32, i32
  }
  func.func @transform_1(%arg0: i32, %arg1: i32) -> (i32, i32) {
    %c0_i32 = arith.constant 0 : i32
    %c0_i32_0 = arith.constant 0 : i32
    %c0_i32_1 = arith.constant 0 : i32
    return %c0_i32, %c0_i32_0 : i32, i32
  }
  func.func @transform_2(%arg0: i32, %arg1: i32) -> (i32, i32, i32) {
    %c0_i32 = arith.constant 0 : i32
    %c0_i32_0 = arith.constant 0 : i32
    %c0_i32_1 = arith.constant 0 : i32
    return %arg0, %c0_i32, %c0_i32_0 : i32, i32, i32
  }
  func.func @transform_3(%arg0: i32, %arg1: i32) -> (i32, i32, i32) {
    %c0_i32 = arith.constant 0 : i32
    %c0_i32_0 = arith.constant 0 : i32
    %c0_i32_1 = arith.constant 0 : i32
    return %arg0, %c0_i32, %c0_i32_0 : i32, i32, i32
  }
  func.func @transform_4(%arg0: i32, %arg1: i32) -> (i32, i32) {
    %c0_i32 = arith.constant 0 : i32
    %c0_i32_0 = arith.constant 0 : i32
    %c0_i32_1 = arith.constant 0 : i32
    return %c0_i32, %c0_i32_0 : i32, i32
  }
  func.func @transform_5(%arg0: i32, %arg1: i32) -> (i32, i32) {
    %c0_i32 = arith.constant 0 : i32
    %c0_i32_0 = arith.constant 0 : i32
    %c0_i32_1 = arith.constant 0 : i32
    return %c0_i32, %c0_i32_0 : i32, i32
  }
  func.func @transform_6(%arg0: i32, %arg1: i32) -> (i32, i32) {
    %c0_i32 = arith.constant 0 : i32
    %c0_i32_0 = arith.constant 0 : i32
    %c0_i32_1 = arith.constant 0 : i32
    return %c0_i32, %c0_i32_0 : i32, i32
  }
  func.func @transform_7(%arg0: i32, %arg1: i32) -> (i32, i32) {
    %c0_i32 = arith.constant 0 : i32
    %c0_i32_0 = arith.constant 0 : i32
    %c0_i32_1 = arith.constant 0 : i32
    return %c0_i32, %c0_i32_0 : i32, i32
  }
  func.func @transform_8(%arg0: i32, %arg1: i32) -> (i32, i32) {
    %c0_i32 = arith.constant 0 : i32
    %c0_i32_0 = arith.constant 0 : i32
    return %arg1, %c0_i32 : i32, i32
  }
  func.func @transform_9(%arg0: i32, %arg1: i32) -> (i32, i32) {
    %c0_i32 = arith.constant 0 : i32
    %c0_i32_0 = arith.constant 0 : i32
    return %arg1, %c0_i32 : i32, i32
  }
  func.func @transform_10(%arg0: i32, %arg1: i32) -> (i32, i32, i32) {
    %c0_i32 = arith.constant 0 : i32
    %c0_i32_0 = arith.constant 0 : i32
    return %arg0, %arg1, %c0_i32 : i32, i32, i32
  }
}

module attributes {stable_mosaic.version = 11 : i64} {
  func.func @_flash_kernel(%arg0: i32, %arg1: i32, %arg2: i32, %arg3: i32, %arg4: memref<1x8x128xbf16, #tpu.memory_space<vmem>>, %arg5: memref<1x8x128xbf16, #tpu.memory_space<vmem>>, %arg6: memref<1x8x128xbf16, #tpu.memory_space<vmem>>, %arg7: memref<1x8x128xbf16, #tpu.memory_space<vmem>>, %arg8: memref<8x1xf32, #tpu.memory_space<vmem>>, %arg9: memref<8x1xf32, #tpu.memory_space<vmem>>, %arg10: memref<8x128xf32, #tpu.memory_space<vmem>>) attributes {dimension_semantics = [#tpu.dimension_semantics<parallel>, #tpu.dimension_semantics<parallel>, #tpu.dimension_semantics<parallel>, #tpu.dimension_semantics<arbitrary>], iteration_bounds = array<i64: 2, 2, 3, 3>, scalar_prefetch = 0 : i64, scratch_operands = 3 : i64, tpu.core_type = #tpu.core_type<tc>, window_params = [{transform_indices = @transform_0, window_bounds = array<i64: 1, 8, 128>}, {transform_indices = @transform_1, window_bounds = array<i64: 1, 8, 128>}, {transform_indices = @transform_2, window_bounds = array<i64: 1, 8, 128>}, {transform_indices = @transform_3, window_bounds = array<i64: 1, 8, 128>}]} {
    %c0_i32 = arith.constant 0 : i32
    %0 = arith.cmpi eq, %arg3, %c0_i32 : i32
    %1 = arith.extui %0 : i1 to i32
    %c0_i32_0 = arith.constant 0 : i32
    %2 = arith.cmpi ne, %1, %c0_i32_0 : i32
    scf.if %2 {
      %cst_25 = arith.constant 0xFF800000 : f32
      %36 = vector.broadcast %cst_25 : f32 to vector<8x1xf32>
      %c0_26 = arith.constant 0 : index
      %c0_27 = arith.constant 0 : index
      %37 = vector.load %arg8[%c0_26, %c0_27] : memref<8x1xf32, #tpu.memory_space<vmem>>, vector<8x1xf32>
      tpu.vector_store %arg8[%c0_26, %c0_27], %36 {strides = array<i32>} : memref<8x1xf32, #tpu.memory_space<vmem>>, vector<8x1xf32>,
      %cst_28 = arith.constant 0.000000e+00 : f32
      %38 = vector.broadcast %cst_28 : f32 to vector<8x1xf32>
      %c0_29 = arith.constant 0 : index
      %c0_30 = arith.constant 0 : index
      %39 = vector.load %arg9[%c0_29, %c0_30] : memref<8x1xf32, #tpu.memory_space<vmem>>, vector<8x1xf32>
      tpu.vector_store %arg9[%c0_29, %c0_30], %38 {strides = array<i32>} : memref<8x1xf32, #tpu.memory_space<vmem>>, vector<8x1xf32>,
      %cst_31 = arith.constant 0.000000e+00 : f32
      %40 = vector.broadcast %cst_31 : f32 to vector<8x128xf32>
      %c0_32 = arith.constant 0 : index
      %c0_33 = arith.constant 0 : index
      %41 = vector.load %arg10[%c0_32, %c0_33] : memref<8x128xf32, #tpu.memory_space<vmem>>, vector<8x128xf32>
      tpu.vector_store %arg10[%c0_32, %c0_33], %40 {strides = array<i32>} : memref<8x128xf32, #tpu.memory_space<vmem>>, vector<8x128xf32>,
    } else {
    }
    %c0 = arith.constant 0 : index
    %c0_1 = arith.constant 0 : index
    %c0_2 = arith.constant 0 : index
    %3 = vector.load %arg4[%c0, %c0_1, %c0_2] : memref<1x8x128xbf16, #tpu.memory_space<vmem>>, vector<1x8x128xbf16>
    %4 = vector.shape_cast %3 : vector<1x8x128xbf16> to vector<8x128xbf16>
    %c0_3 = arith.constant 0 : index
    %c0_4 = arith.constant 0 : index
    %c0_5 = arith.constant 0 : index
    %5 = vector.load %arg5[%c0_3, %c0_4, %c0_5] : memref<1x8x128xbf16, #tpu.memory_space<vmem>>, vector<1x8x128xbf16>
    %6 = vector.shape_cast %5 : vector<1x8x128xbf16> to vector<8x128xbf16>
    %cst = arith.constant dense<0.000000e+00> : vector<8x8xf32>
    %7 = tpu.matmul %4, %6, %cst {dimension_numbers = #tpu.dot_dimension_numbers<[1], [1], [0], [0], [0, 0, 1, 0], [], []>} : vector<8x128xbf16>, vector<8x128xbf16>, vector<8x8xf32> -> vector<8x8xf32>
    %c0_6 = arith.constant 0 : index
    %c0_7 = arith.constant 0 : index
    %8 = vector.load %arg8[%c0_6, %c0_7] : memref<8x1xf32, #tpu.memory_space<vmem>>, vector<8x1xf32>
    %cst_8 = arith.constant dense<0xFF800000> : vector<8xf32>
    %9 = vector.multi_reduction <maximumf>, %7, %cst_8 [1] : vector<8x8xf32> to vector<8xf32>
    %10 = vector.shape_cast %9 : vector<8xf32> to vector<8x1xf32>
    %11 = arith.maximumf %8, %10 : vector<8x1xf32>
    %12 = arith.subf %8, %11 : vector<8x1xf32>
    %13 = math.exp %12 : vector<8x1xf32>
    %14 = vector.broadcast %11 : vector<8x1xf32> to vector<8x8xf32>
    %15 = arith.subf %7, %14 : vector<8x8xf32>
    %16 = math.exp %15 : vector<8x8xf32>
    %c0_9 = arith.constant 0 : index
    %c0_10 = arith.constant 0 : index
    %17 = vector.load %arg9[%c0_9, %c0_10] : memref<8x1xf32, #tpu.memory_space<vmem>>, vector<8x1xf32>
    %18 = arith.mulf %13, %17 : vector<8x1xf32>
    %cst_11 = arith.constant dense<0.000000e+00> : vector<8xf32>
    %19 = vector.multi_reduction <add>, %16, %cst_11 [1] : vector<8x8xf32> to vector<8xf32>
    %20 = vector.shape_cast %19 : vector<8xf32> to vector<8x1xf32>
    %21 = arith.addf %18, %20 : vector<8x1xf32>
    %c0_12 = arith.constant 0 : index
    %c0_13 = arith.constant 0 : index
    %22 = vector.load %arg9[%c0_12, %c0_13] : memref<8x1xf32, #tpu.memory_space<vmem>>, vector<8x1xf32>
    tpu.vector_store %arg9[%c0_12, %c0_13], %21 {strides = array<i32>} : memref<8x1xf32, #tpu.memory_space<vmem>>, vector<8x1xf32>,
    %c0_14 = arith.constant 0 : index
    %c0_15 = arith.constant 0 : index
    %23 = vector.load %arg10[%c0_14, %c0_15] : memref<8x128xf32, #tpu.memory_space<vmem>>, vector<8x128xf32>
    %24 = vector.broadcast %13 : vector<8x1xf32> to vector<8x128xf32>
    %25 = arith.mulf %24, %23 : vector<8x128xf32>
    %26 = arith.truncf %16 : vector<8x8xf32> to vector<8x8xbf16>
    %c0_16 = arith.constant 0 : index
    %c0_17 = arith.constant 0 : index
    %c0_18 = arith.constant 0 : index
    %27 = vector.load %arg6[%c0_16, %c0_17, %c0_18] : memref<1x8x128xbf16, #tpu.memory_space<vmem>>, vector<1x8x128xbf16>
    %28 = vector.shape_cast %27 : vector<1x8x128xbf16> to vector<8x128xbf16>
    %cst_19 = arith.constant dense<0.000000e+00> : vector<8x128xf32>
    %29 = tpu.matmul %26, %28, %cst_19 {dimension_numbers = #tpu.dot_dimension_numbers<[1], [0], [0], [1], [0, 0, 1, 1], [], []>} : vector<8x8xbf16>, vector<8x128xbf16>, vector<8x128xf32> -> vector<8x128xf32>
    %30 = arith.addf %25, %29 : vector<8x128xf32>
    %c0_20 = arith.constant 0 : index
    %c0_21 = arith.constant 0 : index
    %31 = vector.load %arg10[%c0_20, %c0_21] : memref<8x128xf32, #tpu.memory_space<vmem>>, vector<8x128xf32>
    tpu.vector_store %arg10[%c0_20, %c0_21], %30 {strides = array<i32>} : memref<8x128xf32, #tpu.memory_space<vmem>>, vector<8x128xf32>,
    %c0_22 = arith.constant 0 : index
    %c0_23 = arith.constant 0 : index
    %32 = vector.load %arg8[%c0_22, %c0_23] : memref<8x1xf32, #tpu.memory_space<vmem>>, vector<8x1xf32>
    tpu.vector_store %arg8[%c0_22, %c0_23], %11 {strides = array<i32>} : memref<8x1xf32, #tpu.memory_space<vmem>>, vector<8x1xf32>,
    %c2_i32 = arith.constant 2 : i32
    %33 = arith.cmpi eq, %arg3, %c2_i32 : i32
    %34 = arith.extui %33 : i1 to i32
    %c0_i32_24 = arith.constant 0 : i32
    %35 = arith.cmpi ne, %34, %c0_i32_24 : i32
    scf.if %35 {
      %c0_25 = arith.constant 0 : index
      %c0_26 = arith.constant 0 : index
      %36 = vector.load %arg10[%c0_25, %c0_26] : memref<8x128xf32, #tpu.memory_space<vmem>>, vector<8x128xf32>
      %c0_27 = arith.constant 0 : index
      %c0_28 = arith.constant 0 : index
      %37 = vector.load %arg9[%c0_27, %c0_28] : memref<8x1xf32, #tpu.memory_space<vmem>>, vector<8x1xf32>
      %38 = vector.broadcast %37 : vector<8x1xf32> to vector<8x128xf32>
      %39 = arith.divf %36, %38 : vector<8x128xf32>
      %40 = arith.truncf %39 : vector<8x128xf32> to vector<8x128xbf16>
      %c0_29 = arith.constant 0 : index
      %c0_30 = arith.constant 0 : index
      %c0_31 = arith.constant 0 : index
      %41 = vector.load %arg7[%c0_29, %c0_30, %c0_31] : memref<1x8x128xbf16, #tpu.memory_space<vmem>>, vector<1x8x128xbf16>
      %42 = vector.shape_cast %41 : vector<1x8x128xbf16> to vector<8x128xbf16>
      %43 = vector.shape_cast %40 : vector<8x128xbf16> to vector<1x8x128xbf16>
      tpu.vector_store %arg7[%c0_29, %c0_30, %c0_31], %43 {strides = array<i32>} : memref<1x8x128xbf16, #tpu.memory_space<vmem>>, vector<1x8x128xbf16>,
    } else {
    }
    return
  }
  func.func @transform_0(%arg0: i32, %arg1: i32, %arg2: i32, %arg3: i32) -> (i32, i32, i32) {
    %c0_i32 = arith.constant 0 : i32
    return %arg0, %arg2, %arg1 : i32, i32, i32
  }
  func.func @transform_1(%arg0: i32, %arg1: i32, %arg2: i32, %arg3: i32) -> (i32, i32, i32) {
    %c2_i32 = arith.constant 2 : i32
    %0 = arith.addi %c2_i32, %arg1 : i32
    %c0_i32 = arith.constant 0 : i32
    return %arg0, %arg3, %0 : i32, i32, i32
  }
  func.func @transform_2(%arg0: i32, %arg1: i32, %arg2: i32, %arg3: i32) -> (i32, i32, i32) {
    %c4_i32 = arith.constant 4 : i32
    %0 = arith.addi %c4_i32, %arg1 : i32
    %c0_i32 = arith.constant 0 : i32
    return %arg0, %arg3, %0 : i32, i32, i32
  }
  func.func @transform_3(%arg0: i32, %arg1: i32, %arg2: i32, %arg3: i32) -> (i32, i32, i32) {
    %c0_i32 = arith.constant 0 : i32
    return %arg0, %arg2, %arg1 : i32, i32, i32
  }
}

module attributes {stable_mosaic.version = 11 : i64} {
  func.func @_proj_residual_kernel(%arg0: i32, %arg1: i32, %arg2: memref<1x8x256xbf16, #tpu.memory_space<vmem>>, %arg3: memref<256x128xbf16, #tpu.memory_space<vmem>>, %arg4: memref<1x128xf32, #tpu.memory_space<vmem>>, %arg5: memref<1x8x128xf32, #tpu.memory_space<vmem>>, %arg6: memref<1x1x128xf32, #tpu.memory_space<vmem>>, %arg7: memref<1x8x128xf32, #tpu.memory_space<vmem>>) attributes {dimension_semantics = [#tpu.dimension_semantics<parallel>, #tpu.dimension_semantics<parallel>], iteration_bounds = array<i64: 2, 1>, scalar_prefetch = 0 : i64, scratch_operands = 0 : i64, tpu.core_type = #tpu.core_type<tc>, window_params = [{transform_indices = @transform_0, window_bounds = array<i64: 1, 8, 256>}, {pipeline_mode = #tpu.pipeline_mode<synchronous>, transform_indices = @transform_1, window_bounds = array<i64: 256, 128>}, {pipeline_mode = #tpu.pipeline_mode<synchronous>, transform_indices = @transform_2, window_bounds = array<i64: 1, 128>}, {transform_indices = @transform_3, window_bounds = array<i64: 1, 8, 128>}, {transform_indices = @transform_4, window_bounds = array<i64: 1, 1, 128>}, {transform_indices = @transform_5, window_bounds = array<i64: 1, 8, 128>}]} {
    %c0 = arith.constant 0 : index
    %c0_0 = arith.constant 0 : index
    %c0_1 = arith.constant 0 : index
    %0 = vector.load %arg2[%c0, %c0_0, %c0_1] : memref<1x8x256xbf16, #tpu.memory_space<vmem>>, vector<1x8x256xbf16>
    %1 = vector.shape_cast %0 : vector<1x8x256xbf16> to vector<8x256xbf16>
    %c0_2 = arith.constant 0 : index
    %c0_3 = arith.constant 0 : index
    %2 = vector.load %arg3[%c0_2, %c0_3] : memref<256x128xbf16, #tpu.memory_space<vmem>>, vector<256x128xbf16>
    %cst = arith.constant dense<0.000000e+00> : vector<8x128xf32>
    %3 = tpu.matmul %1, %2, %cst {dimension_numbers = #tpu.dot_dimension_numbers<[1], [0], [0], [1], [0, 0, 1, 1], [], []>} : vector<8x256xbf16>, vector<256x128xbf16>, vector<8x128xf32> -> vector<8x128xf32>
    %c0_4 = arith.constant 0 : index
    %c0_5 = arith.constant 0 : index
    %4 = vector.load %arg4[%c0_4, %c0_5] : memref<1x128xf32, #tpu.memory_space<vmem>>, vector<1x128xf32>
    %5 = vector.broadcast %4 : vector<1x128xf32> to vector<8x128xf32>
    %6 = arith.addf %3, %5 : vector<8x128xf32>
    %c0_6 = arith.constant 0 : index
    %c0_7 = arith.constant 0 : index
    %c0_8 = arith.constant 0 : index
    %7 = vector.load %arg5[%c0_6, %c0_7, %c0_8] : memref<1x8x128xf32, #tpu.memory_space<vmem>>, vector<1x8x128xf32>
    %8 = vector.shape_cast %7 : vector<1x8x128xf32> to vector<8x128xf32>
    %c0_9 = arith.constant 0 : index
    %c0_10 = arith.constant 0 : index
    %c0_11 = arith.constant 0 : index
    %9 = vector.load %arg6[%c0_9, %c0_10, %c0_11] : memref<1x1x128xf32, #tpu.memory_space<vmem>>, vector<1x1x128xf32>
    %10 = vector.shape_cast %9 : vector<1x1x128xf32> to vector<1x128xf32>
    %11 = vector.broadcast %10 : vector<1x128xf32> to vector<8x128xf32>
    %12 = arith.mulf %6, %11 : vector<8x128xf32>
    %13 = arith.addf %8, %12 : vector<8x128xf32>
    %c0_12 = arith.constant 0 : index
    %c0_13 = arith.constant 0 : index
    %c0_14 = arith.constant 0 : index
    %14 = vector.load %arg7[%c0_12, %c0_13, %c0_14] : memref<1x8x128xf32, #tpu.memory_space<vmem>>, vector<1x8x128xf32>
    %15 = vector.shape_cast %14 : vector<1x8x128xf32> to vector<8x128xf32>
    %16 = vector.shape_cast %13 : vector<8x128xf32> to vector<1x8x128xf32>
    tpu.vector_store %arg7[%c0_12, %c0_13, %c0_14], %16 {strides = array<i32>} : memref<1x8x128xf32, #tpu.memory_space<vmem>>, vector<1x8x128xf32>,
    return
  }
  func.func @transform_0(%arg0: i32, %arg1: i32) -> (i32, i32, i32) {
    %c0_i32 = arith.constant 0 : i32
    %0 = arith.addi %arg1, %c0_i32 : i32
    %c0_i32_0 = arith.constant 0 : i32
    %c0_i32_1 = arith.constant 0 : i32
    return %arg0, %0, %c0_i32_0 : i32, i32, i32
  }
  func.func @transform_1(%arg0: i32, %arg1: i32) -> (i32, i32) {
    %c0_i32 = arith.constant 0 : i32
    %c0_i32_0 = arith.constant 0 : i32
    %c0_i32_1 = arith.constant 0 : i32
    return %c0_i32, %c0_i32_0 : i32, i32
  }
  func.func @transform_2(%arg0: i32, %arg1: i32) -> (i32, i32) {
    %c0_i32 = arith.constant 0 : i32
    %c0_i32_0 = arith.constant 0 : i32
    %c0_i32_1 = arith.constant 0 : i32
    return %c0_i32, %c0_i32_0 : i32, i32
  }
  func.func @transform_3(%arg0: i32, %arg1: i32) -> (i32, i32, i32) {
    %c0_i32 = arith.constant 0 : i32
    %c0_i32_0 = arith.constant 0 : i32
    return %arg0, %arg1, %c0_i32 : i32, i32, i32
  }
  func.func @transform_4(%arg0: i32, %arg1: i32) -> (i32, i32, i32) {
    %c0_i32 = arith.constant 0 : i32
    %c0_i32_0 = arith.constant 0 : i32
    %c0_i32_1 = arith.constant 0 : i32
    return %arg0, %c0_i32, %c0_i32_0 : i32, i32, i32
  }
  func.func @transform_5(%arg0: i32, %arg1: i32) -> (i32, i32, i32) {
    %c0_i32 = arith.constant 0 : i32
    %c0_i32_0 = arith.constant 0 : i32
    return %arg0, %arg1, %c0_i32 : i32, i32, i32
  }
}

module attributes {stable_mosaic.version = 11 : i64} {
  func.func @_proj_residual_kernel(%arg0: i32, %arg1: i32, %arg2: memref<1x8x256xbf16, #tpu.memory_space<vmem>>, %arg3: memref<256x128xbf16, #tpu.memory_space<vmem>>, %arg4: memref<1x128xf32, #tpu.memory_space<vmem>>, %arg5: memref<1x8x128xf32, #tpu.memory_space<vmem>>, %arg6: memref<1x1x128xf32, #tpu.memory_space<vmem>>, %arg7: memref<1x8x128xf32, #tpu.memory_space<vmem>>) attributes {dimension_semantics = [#tpu.dimension_semantics<parallel>, #tpu.dimension_semantics<parallel>], iteration_bounds = array<i64: 2, 2>, scalar_prefetch = 0 : i64, scratch_operands = 0 : i64, tpu.core_type = #tpu.core_type<tc>, window_params = [{transform_indices = @transform_0, window_bounds = array<i64: 1, 8, 256>}, {pipeline_mode = #tpu.pipeline_mode<synchronous>, transform_indices = @transform_1, window_bounds = array<i64: 256, 128>}, {pipeline_mode = #tpu.pipeline_mode<synchronous>, transform_indices = @transform_2, window_bounds = array<i64: 1, 128>}, {transform_indices = @transform_3, window_bounds = array<i64: 1, 8, 128>}, {transform_indices = @transform_4, window_bounds = array<i64: 1, 1, 128>}, {transform_indices = @transform_5, window_bounds = array<i64: 1, 8, 128>}]} {
    %c0 = arith.constant 0 : index
    %c0_0 = arith.constant 0 : index
    %c0_1 = arith.constant 0 : index
    %0 = vector.load %arg2[%c0, %c0_0, %c0_1] : memref<1x8x256xbf16, #tpu.memory_space<vmem>>, vector<1x8x256xbf16>
    %1 = vector.shape_cast %0 : vector<1x8x256xbf16> to vector<8x256xbf16>
    %c0_2 = arith.constant 0 : index
    %c0_3 = arith.constant 0 : index
    %2 = vector.load %arg3[%c0_2, %c0_3] : memref<256x128xbf16, #tpu.memory_space<vmem>>, vector<256x128xbf16>
    %cst = arith.constant dense<0.000000e+00> : vector<8x128xf32>
    %3 = tpu.matmul %1, %2, %cst {dimension_numbers = #tpu.dot_dimension_numbers<[1], [0], [0], [1], [0, 0, 1, 1], [], []>} : vector<8x256xbf16>, vector<256x128xbf16>, vector<8x128xf32> -> vector<8x128xf32>
    %c0_4 = arith.constant 0 : index
    %c0_5 = arith.constant 0 : index
    %4 = vector.load %arg4[%c0_4, %c0_5] : memref<1x128xf32, #tpu.memory_space<vmem>>, vector<1x128xf32>
    %5 = vector.broadcast %4 : vector<1x128xf32> to vector<8x128xf32>
    %6 = arith.addf %3, %5 : vector<8x128xf32>
    %c0_6 = arith.constant 0 : index
    %c0_7 = arith.constant 0 : index
    %c0_8 = arith.constant 0 : index
    %7 = vector.load %arg5[%c0_6, %c0_7, %c0_8] : memref<1x8x128xf32, #tpu.memory_space<vmem>>, vector<1x8x128xf32>
    %8 = vector.shape_cast %7 : vector<1x8x128xf32> to vector<8x128xf32>
    %c0_9 = arith.constant 0 : index
    %c0_10 = arith.constant 0 : index
    %c0_11 = arith.constant 0 : index
    %9 = vector.load %arg6[%c0_9, %c0_10, %c0_11] : memref<1x1x128xf32, #tpu.memory_space<vmem>>, vector<1x1x128xf32>
    %10 = vector.shape_cast %9 : vector<1x1x128xf32> to vector<1x128xf32>
    %11 = vector.broadcast %10 : vector<1x128xf32> to vector<8x128xf32>
    %12 = arith.mulf %6, %11 : vector<8x128xf32>
    %13 = arith.addf %8, %12 : vector<8x128xf32>
    %c0_12 = arith.constant 0 : index
    %c0_13 = arith.constant 0 : index
    %c0_14 = arith.constant 0 : index
    %14 = vector.load %arg7[%c0_12, %c0_13, %c0_14] : memref<1x8x128xf32, #tpu.memory_space<vmem>>, vector<1x8x128xf32>
    %15 = vector.shape_cast %14 : vector<1x8x128xf32> to vector<8x128xf32>
    %16 = vector.shape_cast %13 : vector<8x128xf32> to vector<1x8x128xf32>
    tpu.vector_store %arg7[%c0_12, %c0_13, %c0_14], %16 {strides = array<i32>} : memref<1x8x128xf32, #tpu.memory_space<vmem>>, vector<1x8x128xf32>,
    return
  }
  func.func @transform_0(%arg0: i32, %arg1: i32) -> (i32, i32, i32) {
    %c1_i32 = arith.constant 1 : i32
    %0 = arith.addi %arg1, %c1_i32 : i32
    %c0_i32 = arith.constant 0 : i32
    %c0_i32_0 = arith.constant 0 : i32
    return %arg0, %0, %c0_i32 : i32, i32, i32
  }
  func.func @transform_1(%arg0: i32, %arg1: i32) -> (i32, i32) {
    %c0_i32 = arith.constant 0 : i32
    %c0_i32_0 = arith.constant 0 : i32
    %c0_i32_1 = arith.constant 0 : i32
    return %c0_i32, %c0_i32_0 : i32, i32
  }
  func.func @transform_2(%arg0: i32, %arg1: i32) -> (i32, i32) {
    %c0_i32 = arith.constant 0 : i32
    %c0_i32_0 = arith.constant 0 : i32
    %c0_i32_1 = arith.constant 0 : i32
    return %c0_i32, %c0_i32_0 : i32, i32
  }
  func.func @transform_3(%arg0: i32, %arg1: i32) -> (i32, i32, i32) {
    %c0_i32 = arith.constant 0 : i32
    %c0_i32_0 = arith.constant 0 : i32
    return %arg0, %arg1, %c0_i32 : i32, i32, i32
  }
  func.func @transform_4(%arg0: i32, %arg1: i32) -> (i32, i32, i32) {
    %c0_i32 = arith.constant 0 : i32
    %c0_i32_0 = arith.constant 0 : i32
    %c0_i32_1 = arith.constant 0 : i32
    return %arg0, %c0_i32, %c0_i32_0 : i32, i32, i32
  }
  func.func @transform_5(%arg0: i32, %arg1: i32) -> (i32, i32, i32) {
    %c0_i32 = arith.constant 0 : i32
    %c0_i32_0 = arith.constant 0 : i32
    return %arg0, %arg1, %c0_i32 : i32, i32, i32
  }
}

module attributes {stable_mosaic.version = 11 : i64} {
  func.func @_mlp_residual_kernel(%arg0: i32, %arg1: i32, %arg2: i32, %arg3: memref<1x8x128xf32, #tpu.memory_space<vmem>>, %arg4: memref<1x128xf32, #tpu.memory_space<vmem>>, %arg5: memref<1x1x128xf32, #tpu.memory_space<vmem>>, %arg6: memref<1x1x128xf32, #tpu.memory_space<vmem>>, %arg7: memref<128x256xbf16, #tpu.memory_space<vmem>>, %arg8: memref<1x256xf32, #tpu.memory_space<vmem>>, %arg9: memref<256x128xbf16, #tpu.memory_space<vmem>>, %arg10: memref<1x128xf32, #tpu.memory_space<vmem>>, %arg11: memref<1x1x128xf32, #tpu.memory_space<vmem>>, %arg12: memref<1x8x128xf32, #tpu.memory_space<vmem>>, %arg13: memref<8x128xbf16, #tpu.memory_space<vmem>>, %arg14: memref<8x128xf32, #tpu.memory_space<vmem>>) attributes {dimension_semantics = [#tpu.dimension_semantics<parallel>, #tpu.dimension_semantics<parallel>, #tpu.dimension_semantics<arbitrary>], iteration_bounds = array<i64: 2, 2, 2>, scalar_prefetch = 0 : i64, scratch_operands = 2 : i64, tpu.core_type = #tpu.core_type<tc>, window_params = [{transform_indices = @transform_0, window_bounds = array<i64: 1, 8, 128>}, {pipeline_mode = #tpu.pipeline_mode<synchronous>, transform_indices = @transform_1, window_bounds = array<i64: 1, 128>}, {transform_indices = @transform_2, window_bounds = array<i64: 1, 1, 128>}, {transform_indices = @transform_3, window_bounds = array<i64: 1, 1, 128>}, {transform_indices = @transform_4, window_bounds = array<i64: 128, 256>}, {transform_indices = @transform_5, window_bounds = array<i64: 1, 256>}, {transform_indices = @transform_6, window_bounds = array<i64: 256, 128>}, {pipeline_mode = #tpu.pipeline_mode<synchronous>, transform_indices = @transform_7, window_bounds = array<i64: 1, 128>}, {transform_indices = @transform_8, window_bounds = array<i64: 1, 1, 128>}, {transform_indices = @transform_9, window_bounds = array<i64: 1, 8, 128>}]} {
    %c0_i32 = arith.constant 0 : i32
    %0 = arith.cmpi eq, %arg2, %c0_i32 : i32
    %1 = arith.extui %0 : i1 to i32
    %c0_i32_0 = arith.constant 0 : i32
    %2 = arith.cmpi ne, %1, %c0_i32_0 : i32
    scf.if %2 {
      %c0_18 = arith.constant 0 : index
      %c0_19 = arith.constant 0 : index
      %c0_20 = arith.constant 0 : index
      %31 = vector.load %arg3[%c0_18, %c0_19, %c0_20] : memref<1x8x128xf32, #tpu.memory_space<vmem>>, vector<1x8x128xf32>
      %32 = vector.shape_cast %31 : vector<1x8x128xf32> to vector<8x128xf32>
      %33 = arith.mulf %32, %32 : vector<8x128xf32>
      %cst_21 = arith.constant dense<0.000000e+00> : vector<8xf32>
      %34 = vector.multi_reduction <add>, %33, %cst_21 [1] : vector<8x128xf32> to vector<8xf32>
      %35 = vector.shape_cast %34 : vector<8xf32> to vector<8x1xf32>
      %cst_22 = arith.constant 1.280000e+02 : f32
      %36 = vector.broadcast %cst_22 : f32 to vector<8x1xf32>
      %37 = arith.divf %35, %36 : vector<8x1xf32>
      %cst_23 = arith.constant 9.99999997E-7 : f32
      %38 = vector.broadcast %cst_23 : f32 to vector<8x1xf32>
      %39 = arith.addf %37, %38 : vector<8x1xf32>
      %40 = math.rsqrt %39 : vector<8x1xf32>
      %41 = vector.broadcast %40 : vector<8x1xf32> to vector<8x128xf32>
      %42 = arith.mulf %32, %41 : vector<8x128xf32>
      %c0_24 = arith.constant 0 : index
      %c0_25 = arith.constant 0 : index
      %43 = vector.load %arg4[%c0_24, %c0_25] : memref<1x128xf32, #tpu.memory_space<vmem>>, vector<1x128xf32>
      %44 = vector.broadcast %43 : vector<1x128xf32> to vector<8x128xf32>
      %45 = arith.mulf %42, %44 : vector<8x128xf32>
      %c0_26 = arith.constant 0 : index
      %c0_27 = arith.constant 0 : index
      %c0_28 = arith.constant 0 : index
      %46 = vector.load %arg5[%c0_26, %c0_27, %c0_28] : memref<1x1x128xf32, #tpu.memory_space<vmem>>, vector<1x1x128xf32>
      %47 = vector.shape_cast %46 : vector<1x1x128xf32> to vector<1x128xf32>
      %cst_29 = arith.constant 1.000000e+00 : f32
      %48 = vector.broadcast %cst_29 : f32 to vector<1x128xf32>
      %49 = arith.addf %48, %47 : vector<1x128xf32>
      %50 = vector.broadcast %49 : vector<1x128xf32> to vector<8x128xf32>
      %51 = arith.mulf %45, %50 : vector<8x128xf32>
      %c0_30 = arith.constant 0 : index
      %c0_31 = arith.constant 0 : index
      %c0_32 = arith.constant 0 : index
      %52 = vector.load %arg6[%c0_30, %c0_31, %c0_32] : memref<1x1x128xf32, #tpu.memory_space<vmem>>, vector<1x1x128xf32>
      %53 = vector.shape_cast %52 : vector<1x1x128xf32> to vector<1x128xf32>
      %54 = vector.broadcast %53 : vector<1x128xf32> to vector<8x128xf32>
      %55 = arith.addf %51, %54 : vector<8x128xf32>
      %56 = arith.truncf %55 : vector<8x128xf32> to vector<8x128xbf16>
      %c0_33 = arith.constant 0 : index
      %c0_34 = arith.constant 0 : index
      %57 = vector.load %arg13[%c0_33, %c0_34] : memref<8x128xbf16, #tpu.memory_space<vmem>>, vector<8x128xbf16>
      tpu.vector_store %arg13[%c0_33, %c0_34], %56 {strides = array<i32>} : memref<8x128xbf16, #tpu.memory_space<vmem>>, vector<8x128xbf16>,
      %cst_35 = arith.constant 0.000000e+00 : f32
      %58 = vector.broadcast %cst_35 : f32 to vector<8x128xf32>
      %c0_36 = arith.constant 0 : index
      %c0_37 = arith.constant 0 : index
      %59 = vector.load %arg14[%c0_36, %c0_37] : memref<8x128xf32, #tpu.memory_space<vmem>>, vector<8x128xf32>
      tpu.vector_store %arg14[%c0_36, %c0_37], %58 {strides = array<i32>} : memref<8x128xf32, #tpu.memory_space<vmem>>, vector<8x128xf32>,
    } else {
    }
    %c0 = arith.constant 0 : index
    %c0_1 = arith.constant 0 : index
    %3 = vector.load %arg13[%c0, %c0_1] : memref<8x128xbf16, #tpu.memory_space<vmem>>, vector<8x128xbf16>
    %c0_2 = arith.constant 0 : index
    %c0_3 = arith.constant 0 : index
    %4 = vector.load %arg7[%c0_2, %c0_3] : memref<128x256xbf16, #tpu.memory_space<vmem>>, vector<128x256xbf16>
    %cst = arith.constant dense<0.000000e+00> : vector<8x256xf32>
    %5 = tpu.matmul %3, %4, %cst {dimension_numbers = #tpu.dot_dimension_numbers<[1], [0], [0], [1], [0, 0, 1, 1], [], []>} : vector<8x128xbf16>, vector<128x256xbf16>, vector<8x256xf32> -> vector<8x256xf32>
    %c0_4 = arith.constant 0 : index
    %c0_5 = arith.constant 0 : index
    %6 = vector.load %arg8[%c0_4, %c0_5] : memref<1x256xf32, #tpu.memory_space<vmem>>, vector<1x256xf32>
    %7 = vector.broadcast %6 : vector<1x256xf32> to vector<8x256xf32>
    %8 = arith.addf %5, %7 : vector<8x256xf32>
    %cst_6 = arith.constant 5.000000e-01 : f32
    %9 = vector.broadcast %cst_6 : f32 to vector<8x256xf32>
    %10 = arith.mulf %9, %8 : vector<8x256xf32>
    %cst_7 = arith.constant 4.471500e-02 : f32
    %11 = vector.broadcast %cst_7 : f32 to vector<8x256xf32>
    %12 = arith.mulf %11, %8 : vector<8x256xf32>
    %13 = arith.mulf %12, %8 : vector<8x256xf32>
    %14 = arith.mulf %13, %8 : vector<8x256xf32>
    %15 = arith.addf %8, %14 : vector<8x256xf32>
    %cst_8 = arith.constant 0.797884583 : f32
    %16 = vector.broadcast %cst_8 : f32 to vector<8x256xf32>
    %17 = arith.mulf %16, %15 : vector<8x256xf32>
    %18 = math.tanh %17 : vector<8x256xf32>
    %cst_9 = arith.constant 1.000000e+00 : f32
    %19 = vector.broadcast %cst_9 : f32 to vector<8x256xf32>
    %20 = arith.addf %19, %18 : vector<8x256xf32>
    %21 = arith.mulf %10, %20 : vector<8x256xf32>
    %c0_10 = arith.constant 0 : index
    %c0_11 = arith.constant 0 : index
    %22 = vector.load %arg14[%c0_10, %c0_11] : memref<8x128xf32, #tpu.memory_space<vmem>>, vector<8x128xf32>
    %23 = arith.truncf %21 : vector<8x256xf32> to vector<8x256xbf16>
    %c0_12 = arith.constant 0 : index
    %c0_13 = arith.constant 0 : index
    %24 = vector.load %arg9[%c0_12, %c0_13] : memref<256x128xbf16, #tpu.memory_space<vmem>>, vector<256x128xbf16>
    %cst_14 = arith.constant dense<0.000000e+00> : vector<8x128xf32>
    %25 = tpu.matmul %23, %24, %cst_14 {dimension_numbers = #tpu.dot_dimension_numbers<[1], [0], [0], [1], [0, 0, 1, 1], [], []>} : vector<8x256xbf16>, vector<256x128xbf16>, vector<8x128xf32> -> vector<8x128xf32>
    %26 = arith.addf %22, %25 : vector<8x128xf32>
    %c0_15 = arith.constant 0 : index
    %c0_16 = arith.constant 0 : index
    %27 = vector.load %arg14[%c0_15, %c0_16] : memref<8x128xf32, #tpu.memory_space<vmem>>, vector<8x128xf32>
    tpu.vector_store %arg14[%c0_15, %c0_16], %26 {strides = array<i32>} : memref<8x128xf32, #tpu.memory_space<vmem>>, vector<8x128xf32>,
    %c1_i32 = arith.constant 1 : i32
    %28 = arith.cmpi eq, %arg2, %c1_i32 : i32
    %29 = arith.extui %28 : i1 to i32
    %c0_i32_17 = arith.constant 0 : i32
    %30 = arith.cmpi ne, %29, %c0_i32_17 : i32
    scf.if %30 {
      %c0_18 = arith.constant 0 : index
      %c0_19 = arith.constant 0 : index
      %31 = vector.load %arg14[%c0_18, %c0_19] : memref<8x128xf32, #tpu.memory_space<vmem>>, vector<8x128xf32>
      %c0_20 = arith.constant 0 : index
      %c0_21 = arith.constant 0 : index
      %32 = vector.load %arg10[%c0_20, %c0_21] : memref<1x128xf32, #tpu.memory_space<vmem>>, vector<1x128xf32>
      %33 = vector.broadcast %32 : vector<1x128xf32> to vector<8x128xf32>
      %34 = arith.addf %31, %33 : vector<8x128xf32>
      %c0_22 = arith.constant 0 : index
      %c0_23 = arith.constant 0 : index
      %c0_24 = arith.constant 0 : index
      %35 = vector.load %arg3[%c0_22, %c0_23, %c0_24] : memref<1x8x128xf32, #tpu.memory_space<vmem>>, vector<1x8x128xf32>
      %36 = vector.shape_cast %35 : vector<1x8x128xf32> to vector<8x128xf32>
      %c0_25 = arith.constant 0 : index
      %c0_26 = arith.constant 0 : index
      %c0_27 = arith.constant 0 : index
      %37 = vector.load %arg11[%c0_25, %c0_26, %c0_27] : memref<1x1x128xf32, #tpu.memory_space<vmem>>, vector<1x1x128xf32>
      %38 = vector.shape_cast %37 : vector<1x1x128xf32> to vector<1x128xf32>
      %39 = vector.broadcast %38 : vector<1x128xf32> to vector<8x128xf32>
      %40 = arith.mulf %34, %39 : vector<8x128xf32>
      %41 = arith.addf %36, %40 : vector<8x128xf32>
      %c0_28 = arith.constant 0 : index
      %c0_29 = arith.constant 0 : index
      %c0_30 = arith.constant 0 : index
      %42 = vector.load %arg12[%c0_28, %c0_29, %c0_30] : memref<1x8x128xf32, #tpu.memory_space<vmem>>, vector<1x8x128xf32>
      %43 = vector.shape_cast %42 : vector<1x8x128xf32> to vector<8x128xf32>
      %44 = vector.shape_cast %41 : vector<8x128xf32> to vector<1x8x128xf32>
      tpu.vector_store %arg12[%c0_28, %c0_29, %c0_30], %44 {strides = array<i32>} : memref<1x8x128xf32, #tpu.memory_space<vmem>>, vector<1x8x128xf32>,
    } else {
    }
    return
  }
  func.func @transform_0(%arg0: i32, %arg1: i32, %arg2: i32) -> (i32, i32, i32) {
    %c0_i32 = arith.constant 0 : i32
    %c0_i32_0 = arith.constant 0 : i32
    return %arg0, %arg1, %c0_i32 : i32, i32, i32
  }
  func.func @transform_1(%arg0: i32, %arg1: i32, %arg2: i32) -> (i32, i32) {
    %c0_i32 = arith.constant 0 : i32
    %c0_i32_0 = arith.constant 0 : i32
    %c0_i32_1 = arith.constant 0 : i32
    return %c0_i32, %c0_i32_0 : i32, i32
  }
  func.func @transform_2(%arg0: i32, %arg1: i32, %arg2: i32) -> (i32, i32, i32) {
    %c0_i32 = arith.constant 0 : i32
    %c0_i32_0 = arith.constant 0 : i32
    %c0_i32_1 = arith.constant 0 : i32
    return %arg0, %c0_i32, %c0_i32_0 : i32, i32, i32
  }
  func.func @transform_3(%arg0: i32, %arg1: i32, %arg2: i32) -> (i32, i32, i32) {
    %c0_i32 = arith.constant 0 : i32
    %c0_i32_0 = arith.constant 0 : i32
    %c0_i32_1 = arith.constant 0 : i32
    return %arg0, %c0_i32, %c0_i32_0 : i32, i32, i32
  }
  func.func @transform_4(%arg0: i32, %arg1: i32, %arg2: i32) -> (i32, i32) {
    %c0_i32 = arith.constant 0 : i32
    %c0_i32_0 = arith.constant 0 : i32
    return %c0_i32, %arg2 : i32, i32
  }
  func.func @transform_5(%arg0: i32, %arg1: i32, %arg2: i32) -> (i32, i32) {
    %c0_i32 = arith.constant 0 : i32
    %c0_i32_0 = arith.constant 0 : i32
    return %c0_i32, %arg2 : i32, i32
  }
  func.func @transform_6(%arg0: i32, %arg1: i32, %arg2: i32) -> (i32, i32) {
    %c0_i32 = arith.constant 0 : i32
    %c0_i32_0 = arith.constant 0 : i32
    return %arg2, %c0_i32 : i32, i32
  }
  func.func @transform_7(%arg0: i32, %arg1: i32, %arg2: i32) -> (i32, i32) {
    %c0_i32 = arith.constant 0 : i32
    %c0_i32_0 = arith.constant 0 : i32
    %c0_i32_1 = arith.constant 0 : i32
    return %c0_i32, %c0_i32_0 : i32, i32
  }
  func.func @transform_8(%arg0: i32, %arg1: i32, %arg2: i32) -> (i32, i32, i32) {
    %c0_i32 = arith.constant 0 : i32
    %c0_i32_0 = arith.constant 0 : i32
    %c0_i32_1 = arith.constant 0 : i32
    return %arg0, %c0_i32, %c0_i32_0 : i32, i32, i32
  }
  func.func @transform_9(%arg0: i32, %arg1: i32, %arg2: i32) -> (i32, i32, i32) {
    %c0_i32 = arith.constant 0 : i32
    %c0_i32_0 = arith.constant 0 : i32
    return %arg0, %arg1, %c0_i32 : i32, i32, i32
  }
}

module attributes {stable_mosaic.version = 11 : i64} {
  func.func @_mlp_residual_kernel(%arg0: i32, %arg1: i32, %arg2: i32, %arg3: memref<1x8x128xf32, #tpu.memory_space<vmem>>, %arg4: memref<1x128xf32, #tpu.memory_space<vmem>>, %arg5: memref<1x1x128xf32, #tpu.memory_space<vmem>>, %arg6: memref<1x1x128xf32, #tpu.memory_space<vmem>>, %arg7: memref<128x256xbf16, #tpu.memory_space<vmem>>, %arg8: memref<1x256xf32, #tpu.memory_space<vmem>>, %arg9: memref<256x128xbf16, #tpu.memory_space<vmem>>, %arg10: memref<1x128xf32, #tpu.memory_space<vmem>>, %arg11: memref<1x1x128xf32, #tpu.memory_space<vmem>>, %arg12: memref<1x8x128xf32, #tpu.memory_space<vmem>>, %arg13: memref<8x128xbf16, #tpu.memory_space<vmem>>, %arg14: memref<8x128xf32, #tpu.memory_space<vmem>>) attributes {dimension_semantics = [#tpu.dimension_semantics<parallel>, #tpu.dimension_semantics<parallel>, #tpu.dimension_semantics<arbitrary>], iteration_bounds = array<i64: 2, 1, 2>, scalar_prefetch = 0 : i64, scratch_operands = 2 : i64, tpu.core_type = #tpu.core_type<tc>, window_params = [{transform_indices = @transform_0, window_bounds = array<i64: 1, 8, 128>}, {pipeline_mode = #tpu.pipeline_mode<synchronous>, transform_indices = @transform_1, window_bounds = array<i64: 1, 128>}, {transform_indices = @transform_2, window_bounds = array<i64: 1, 1, 128>}, {transform_indices = @transform_3, window_bounds = array<i64: 1, 1, 128>}, {transform_indices = @transform_4, window_bounds = array<i64: 128, 256>}, {transform_indices = @transform_5, window_bounds = array<i64: 1, 256>}, {transform_indices = @transform_6, window_bounds = array<i64: 256, 128>}, {pipeline_mode = #tpu.pipeline_mode<synchronous>, transform_indices = @transform_7, window_bounds = array<i64: 1, 128>}, {transform_indices = @transform_8, window_bounds = array<i64: 1, 1, 128>}, {transform_indices = @transform_9, window_bounds = array<i64: 1, 8, 128>}]} {
    %c0_i32 = arith.constant 0 : i32
    %0 = arith.cmpi eq, %arg2, %c0_i32 : i32
    %1 = arith.extui %0 : i1 to i32
    %c0_i32_0 = arith.constant 0 : i32
    %2 = arith.cmpi ne, %1, %c0_i32_0 : i32
    scf.if %2 {
      %c0_18 = arith.constant 0 : index
      %c0_19 = arith.constant 0 : index
      %c0_20 = arith.constant 0 : index
      %31 = vector.load %arg3[%c0_18, %c0_19, %c0_20] : memref<1x8x128xf32, #tpu.memory_space<vmem>>, vector<1x8x128xf32>
      %32 = vector.shape_cast %31 : vector<1x8x128xf32> to vector<8x128xf32>
      %33 = arith.mulf %32, %32 : vector<8x128xf32>
      %cst_21 = arith.constant dense<0.000000e+00> : vector<8xf32>
      %34 = vector.multi_reduction <add>, %33, %cst_21 [1] : vector<8x128xf32> to vector<8xf32>
      %35 = vector.shape_cast %34 : vector<8xf32> to vector<8x1xf32>
      %cst_22 = arith.constant 1.280000e+02 : f32
      %36 = vector.broadcast %cst_22 : f32 to vector<8x1xf32>
      %37 = arith.divf %35, %36 : vector<8x1xf32>
      %cst_23 = arith.constant 9.99999997E-7 : f32
      %38 = vector.broadcast %cst_23 : f32 to vector<8x1xf32>
      %39 = arith.addf %37, %38 : vector<8x1xf32>
      %40 = math.rsqrt %39 : vector<8x1xf32>
      %41 = vector.broadcast %40 : vector<8x1xf32> to vector<8x128xf32>
      %42 = arith.mulf %32, %41 : vector<8x128xf32>
      %c0_24 = arith.constant 0 : index
      %c0_25 = arith.constant 0 : index
      %43 = vector.load %arg4[%c0_24, %c0_25] : memref<1x128xf32, #tpu.memory_space<vmem>>, vector<1x128xf32>
      %44 = vector.broadcast %43 : vector<1x128xf32> to vector<8x128xf32>
      %45 = arith.mulf %42, %44 : vector<8x128xf32>
      %c0_26 = arith.constant 0 : index
      %c0_27 = arith.constant 0 : index
      %c0_28 = arith.constant 0 : index
      %46 = vector.load %arg5[%c0_26, %c0_27, %c0_28] : memref<1x1x128xf32, #tpu.memory_space<vmem>>, vector<1x1x128xf32>
      %47 = vector.shape_cast %46 : vector<1x1x128xf32> to vector<1x128xf32>
      %cst_29 = arith.constant 1.000000e+00 : f32
      %48 = vector.broadcast %cst_29 : f32 to vector<1x128xf32>
      %49 = arith.addf %48, %47 : vector<1x128xf32>
      %50 = vector.broadcast %49 : vector<1x128xf32> to vector<8x128xf32>
      %51 = arith.mulf %45, %50 : vector<8x128xf32>
      %c0_30 = arith.constant 0 : index
      %c0_31 = arith.constant 0 : index
      %c0_32 = arith.constant 0 : index
      %52 = vector.load %arg6[%c0_30, %c0_31, %c0_32] : memref<1x1x128xf32, #tpu.memory_space<vmem>>, vector<1x1x128xf32>
      %53 = vector.shape_cast %52 : vector<1x1x128xf32> to vector<1x128xf32>
      %54 = vector.broadcast %53 : vector<1x128xf32> to vector<8x128xf32>
      %55 = arith.addf %51, %54 : vector<8x128xf32>
      %56 = arith.truncf %55 : vector<8x128xf32> to vector<8x128xbf16>
      %c0_33 = arith.constant 0 : index
      %c0_34 = arith.constant 0 : index
      %57 = vector.load %arg13[%c0_33, %c0_34] : memref<8x128xbf16, #tpu.memory_space<vmem>>, vector<8x128xbf16>
      tpu.vector_store %arg13[%c0_33, %c0_34], %56 {strides = array<i32>} : memref<8x128xbf16, #tpu.memory_space<vmem>>, vector<8x128xbf16>,
      %cst_35 = arith.constant 0.000000e+00 : f32
      %58 = vector.broadcast %cst_35 : f32 to vector<8x128xf32>
      %c0_36 = arith.constant 0 : index
      %c0_37 = arith.constant 0 : index
      %59 = vector.load %arg14[%c0_36, %c0_37] : memref<8x128xf32, #tpu.memory_space<vmem>>, vector<8x128xf32>
      tpu.vector_store %arg14[%c0_36, %c0_37], %58 {strides = array<i32>} : memref<8x128xf32, #tpu.memory_space<vmem>>, vector<8x128xf32>,
    } else {
    }
    %c0 = arith.constant 0 : index
    %c0_1 = arith.constant 0 : index
    %3 = vector.load %arg13[%c0, %c0_1] : memref<8x128xbf16, #tpu.memory_space<vmem>>, vector<8x128xbf16>
    %c0_2 = arith.constant 0 : index
    %c0_3 = arith.constant 0 : index
    %4 = vector.load %arg7[%c0_2, %c0_3] : memref<128x256xbf16, #tpu.memory_space<vmem>>, vector<128x256xbf16>
    %cst = arith.constant dense<0.000000e+00> : vector<8x256xf32>
    %5 = tpu.matmul %3, %4, %cst {dimension_numbers = #tpu.dot_dimension_numbers<[1], [0], [0], [1], [0, 0, 1, 1], [], []>} : vector<8x128xbf16>, vector<128x256xbf16>, vector<8x256xf32> -> vector<8x256xf32>
    %c0_4 = arith.constant 0 : index
    %c0_5 = arith.constant 0 : index
    %6 = vector.load %arg8[%c0_4, %c0_5] : memref<1x256xf32, #tpu.memory_space<vmem>>, vector<1x256xf32>
    %7 = vector.broadcast %6 : vector<1x256xf32> to vector<8x256xf32>
    %8 = arith.addf %5, %7 : vector<8x256xf32>
    %cst_6 = arith.constant 5.000000e-01 : f32
    %9 = vector.broadcast %cst_6 : f32 to vector<8x256xf32>
    %10 = arith.mulf %9, %8 : vector<8x256xf32>
    %cst_7 = arith.constant 4.471500e-02 : f32
    %11 = vector.broadcast %cst_7 : f32 to vector<8x256xf32>
    %12 = arith.mulf %11, %8 : vector<8x256xf32>
    %13 = arith.mulf %12, %8 : vector<8x256xf32>
    %14 = arith.mulf %13, %8 : vector<8x256xf32>
    %15 = arith.addf %8, %14 : vector<8x256xf32>
    %cst_8 = arith.constant 0.797884583 : f32
    %16 = vector.broadcast %cst_8 : f32 to vector<8x256xf32>
    %17 = arith.mulf %16, %15 : vector<8x256xf32>
    %18 = math.tanh %17 : vector<8x256xf32>
    %cst_9 = arith.constant 1.000000e+00 : f32
    %19 = vector.broadcast %cst_9 : f32 to vector<8x256xf32>
    %20 = arith.addf %19, %18 : vector<8x256xf32>
    %21 = arith.mulf %10, %20 : vector<8x256xf32>
    %c0_10 = arith.constant 0 : index
    %c0_11 = arith.constant 0 : index
    %22 = vector.load %arg14[%c0_10, %c0_11] : memref<8x128xf32, #tpu.memory_space<vmem>>, vector<8x128xf32>
    %23 = arith.truncf %21 : vector<8x256xf32> to vector<8x256xbf16>
    %c0_12 = arith.constant 0 : index
    %c0_13 = arith.constant 0 : index
    %24 = vector.load %arg9[%c0_12, %c0_13] : memref<256x128xbf16, #tpu.memory_space<vmem>>, vector<256x128xbf16>
    %cst_14 = arith.constant dense<0.000000e+00> : vector<8x128xf32>
    %25 = tpu.matmul %23, %24, %cst_14 {dimension_numbers = #tpu.dot_dimension_numbers<[1], [0], [0], [1], [0, 0, 1, 1], [], []>} : vector<8x256xbf16>, vector<256x128xbf16>, vector<8x128xf32> -> vector<8x128xf32>
    %26 = arith.addf %22, %25 : vector<8x128xf32>
    %c0_15 = arith.constant 0 : index
    %c0_16 = arith.constant 0 : index
    %27 = vector.load %arg14[%c0_15, %c0_16] : memref<8x128xf32, #tpu.memory_space<vmem>>, vector<8x128xf32>
    tpu.vector_store %arg14[%c0_15, %c0_16], %26 {strides = array<i32>} : memref<8x128xf32, #tpu.memory_space<vmem>>, vector<8x128xf32>,
    %c1_i32 = arith.constant 1 : i32
    %28 = arith.cmpi eq, %arg2, %c1_i32 : i32
    %29 = arith.extui %28 : i1 to i32
    %c0_i32_17 = arith.constant 0 : i32
    %30 = arith.cmpi ne, %29, %c0_i32_17 : i32
    scf.if %30 {
      %c0_18 = arith.constant 0 : index
      %c0_19 = arith.constant 0 : index
      %31 = vector.load %arg14[%c0_18, %c0_19] : memref<8x128xf32, #tpu.memory_space<vmem>>, vector<8x128xf32>
      %c0_20 = arith.constant 0 : index
      %c0_21 = arith.constant 0 : index
      %32 = vector.load %arg10[%c0_20, %c0_21] : memref<1x128xf32, #tpu.memory_space<vmem>>, vector<1x128xf32>
      %33 = vector.broadcast %32 : vector<1x128xf32> to vector<8x128xf32>
      %34 = arith.addf %31, %33 : vector<8x128xf32>
      %c0_22 = arith.constant 0 : index
      %c0_23 = arith.constant 0 : index
      %c0_24 = arith.constant 0 : index
      %35 = vector.load %arg3[%c0_22, %c0_23, %c0_24] : memref<1x8x128xf32, #tpu.memory_space<vmem>>, vector<1x8x128xf32>
      %36 = vector.shape_cast %35 : vector<1x8x128xf32> to vector<8x128xf32>
      %c0_25 = arith.constant 0 : index
      %c0_26 = arith.constant 0 : index
      %c0_27 = arith.constant 0 : index
      %37 = vector.load %arg11[%c0_25, %c0_26, %c0_27] : memref<1x1x128xf32, #tpu.memory_space<vmem>>, vector<1x1x128xf32>
      %38 = vector.shape_cast %37 : vector<1x1x128xf32> to vector<1x128xf32>
      %39 = vector.broadcast %38 : vector<1x128xf32> to vector<8x128xf32>
      %40 = arith.mulf %34, %39 : vector<8x128xf32>
      %41 = arith.addf %36, %40 : vector<8x128xf32>
      %c0_28 = arith.constant 0 : index
      %c0_29 = arith.constant 0 : index
      %c0_30 = arith.constant 0 : index
      %42 = vector.load %arg12[%c0_28, %c0_29, %c0_30] : memref<1x8x128xf32, #tpu.memory_space<vmem>>, vector<1x8x128xf32>
      %43 = vector.shape_cast %42 : vector<1x8x128xf32> to vector<8x128xf32>
      %44 = vector.shape_cast %41 : vector<8x128xf32> to vector<1x8x128xf32>
      tpu.vector_store %arg12[%c0_28, %c0_29, %c0_30], %44 {strides = array<i32>} : memref<1x8x128xf32, #tpu.memory_space<vmem>>, vector<1x8x128xf32>,
    } else {
    }
    return
  }
  func.func @transform_0(%arg0: i32, %arg1: i32, %arg2: i32) -> (i32, i32, i32) {
    %c0_i32 = arith.constant 0 : i32
    %c0_i32_0 = arith.constant 0 : i32
    return %arg0, %arg1, %c0_i32 : i32, i32, i32
  }
  func.func @transform_1(%arg0: i32, %arg1: i32, %arg2: i32) -> (i32, i32) {
    %c0_i32 = arith.constant 0 : i32
    %c0_i32_0 = arith.constant 0 : i32
    %c0_i32_1 = arith.constant 0 : i32
    return %c0_i32, %c0_i32_0 : i32, i32
  }
  func.func @transform_2(%arg0: i32, %arg1: i32, %arg2: i32) -> (i32, i32, i32) {
    %c0_i32 = arith.constant 0 : i32
    %c0_i32_0 = arith.constant 0 : i32
    %c0_i32_1 = arith.constant 0 : i32
    return %arg0, %c0_i32, %c0_i32_0 : i32, i32, i32
  }
  func.func @transform_3(%arg0: i32, %arg1: i32, %arg2: i32) -> (i32, i32, i32) {
    %c0_i32 = arith.constant 0 : i32
    %c0_i32_0 = arith.constant 0 : i32
    %c0_i32_1 = arith.constant 0 : i32
    return %arg0, %c0_i32, %c0_i32_0 : i32, i32, i32
  }
  func.func @transform_4(%arg0: i32, %arg1: i32, %arg2: i32) -> (i32, i32) {
    %c0_i32 = arith.constant 0 : i32
    %c0_i32_0 = arith.constant 0 : i32
    return %c0_i32, %arg2 : i32, i32
  }
  func.func @transform_5(%arg0: i32, %arg1: i32, %arg2: i32) -> (i32, i32) {
    %c0_i32 = arith.constant 0 : i32
    %c0_i32_0 = arith.constant 0 : i32
    return %c0_i32, %arg2 : i32, i32
  }
  func.func @transform_6(%arg0: i32, %arg1: i32, %arg2: i32) -> (i32, i32) {
    %c0_i32 = arith.constant 0 : i32
    %c0_i32_0 = arith.constant 0 : i32
    return %arg2, %c0_i32 : i32, i32
  }
  func.func @transform_7(%arg0: i32, %arg1: i32, %arg2: i32) -> (i32, i32) {
    %c0_i32 = arith.constant 0 : i32
    %c0_i32_0 = arith.constant 0 : i32
    %c0_i32_1 = arith.constant 0 : i32
    return %c0_i32, %c0_i32_0 : i32, i32
  }
  func.func @transform_8(%arg0: i32, %arg1: i32, %arg2: i32) -> (i32, i32, i32) {
    %c0_i32 = arith.constant 0 : i32
    %c0_i32_0 = arith.constant 0 : i32
    %c0_i32_1 = arith.constant 0 : i32
    return %arg0, %c0_i32, %c0_i32_0 : i32, i32, i32
  }
  func.func @transform_9(%arg0: i32, %arg1: i32, %arg2: i32) -> (i32, i32, i32) {
    %c0_i32 = arith.constant 0 : i32
    %c0_i32_0 = arith.constant 0 : i32
    return %arg0, %arg1, %c0_i32 : i32, i32, i32
  }
}

</mosaic_0001>

<bundles_post_ra>
// kernel: block_forward_pallas.8
= control target key start
LH: loop header
LB: loop body
LE: loop exit
PB: predicated region body
PF: predicated region fallthrough
CT: control target
= control target key end

     0   :  { %12 = vsyncpa [#allocation3], 0  ;;  %s1217_s0 = inlined_call_operand.vmem [shape: f32[2,128], index: 0, kind: input, shape index: {}]   ;;  %s1218_s1 = inlined_call_operand.hbm [shape: bf16[128,768], index: 1, kind: input, shape index: {}]   ;;  %s1219_s2 = inlined_call_operand.vmem [shape: f32[1,768], index: 2, kind: input, shape index: {}]   ;;  %s1220_s3 = inlined_call_operand.hbm [shape: bf16[128,768], index: 3, kind: input, shape index: {}]   ;;  %s1221_s4 = inlined_call_operand.vmem [shape: f32[1,768], index: 4, kind: input, shape index: {}]   ;;  %s1222_s5 = inlined_call_operand.vmem [shape: f32[2,768], index: 5, kind: output, shape index: {0}]   ;;  %s1223_s6 = inlined_call_operand.vmem [shape: f32[2,768], index: 6, kind: output, shape index: {1}]  }
   0x1   :  { %14 = vsyncpa [#allocation3 + $0x1], 0 }
   0x2   :  { %15 = vsyncpa [#allocation5], 0 }
   0x3   :  { %17 = vsyncpa [#allocation5 + $0x1], 0  ;;  %s1019_s21 = smov 0   ;;  %s1021_s22 = smov 0  }
   0x4   :  { %s1023_s23 = smov 0   ;;  %s1025_s24 = smov 0  }
   0x5 LB: > { %s1038_s25 = sadd.s32 4294967295, %s975_s24   ;;  %s1041_s26 = sadd.s32 1, %s975_s24   ;;  %s975_s24 = sphi %s1025_s24, %s1232_s24   ;;  %s971_s23 = sphi %s1023_s23, %s1231_s23   ;;  %s967_s22 = sphi %s1021_s22, %s1230_s22   ;;  %s963_s21 = sphi %s1019_s21, %s1229_s21  }
   0x6   : > { %s48_s27 = ssub.s32 %s975_s24, %s1041_s26  ;;  %s51_s28 = sadd.s32 1, %s971_s23 }
   0x7   : > { %p49_p0 = scmp.eq.s32.totalorder %s48_s27, 0  ;;  %p58_p1 = scmp.ne.s32.totalorder %s971_s23, %s967_s22 }
   0x8   : > { %p59_p2 = scmp.eq.s32.totalorder %s975_s24, 0  ;;  %p64_p3 = scmp.ne.s32.totalorder %s967_s22, %s963_s21 }
   0x9   : > { %s1051_s29 = scalar_select %p49_p0, %s971_s23, %s51_s28  }
   0xa   : > { %p60_p4 = por %p59_p2, %p58_p1  ;;  %p65_p5 = scmp.eq.s32.totalorder %s1038_s25, 0 }
   0xb   : > { %p819_p6 = scmp.lt.s32.totalorder %s975_s24, 6  ;;  %s1060_s7 = sand.u32 1, %s971_s23  }
   0xc   : > { %p1055_p7 = por %p65_p5, %p64_p3  ;;  %s721_s8 = sshll.u32 %s1060_s7, 6 }
   0xd   : > { %s722_s9 = sshll.u32 %s975_s24, 6  ;;  %s225_s13 = scalar_lea.vmem [#allocation2], %s721_s8 }
   0xe   : > { %s1225_s30 = scalar_select %p1055_p7, 1, 0 }
   0xf   : > { %s1069_s12 = scalar_lea.hbm %s1218_s1, %s722_s9  ;;  %s231_s14 = sshll.u32 %s225_s13, 4  ;;  %s1073_s14 = int_to_ptr.vmem [resolvable:$true] %s231_s14 }
  0x10   : > { %p1075_p8 = pnand %p819_p6, %p60_p4  ;;  %s222_s16 = scalar_lea.sflag [#allocation3], %s1060_s7 }
  0x11   : > { %s877_s17 = scalar_lea.hbm %s1069_s12, 1024  ;;  %s882_s20 = scalar_lea.hbm %s1218_s1, 6144 }
  0x12   : > { %p878_p9 = scmp.ne.s32.totalorder %s1069_s12, %s877_s17  ;;  %p879_p10 = pneg %p1075_p8 }
  0x13   : > { %p883_p13 = scmp.lt.u32.totalorder %s1069_s12, %s1218_s1  ;;  %p884_p0 = scmp.lt.u32.totalorder %s882_s20, %s877_s17 }
  0x14   : > { %p880_p11 = pnand %p879_p10, %p878_p9  ;;  %p886_p2 = scmp.lt.u32.totalorder %s877_s17, %s1069_s12 }
  0x15   : > { %p885_p1 = por %p884_p0, %p883_p13 }
  0x16   : > { %p881_p12 = pneg %p880_p11 }
  0x17   : > { %p887_p3 = por %p886_p2, %p885_p1 }
  0x19   : > { %p888_p4 = pnand %p887_p3, %p881_p12 }
  0x1b   : > { %891 = shalt.err (!%p888_p4)
}
  0x1c   : > { %s892_s28 = scalar_lea.vmem %s1073_s14, 1024  ;;  %s977_s10 = smov [#allocation2]  }
  0x1d   : > { %p893_p5 = scmp.ne.s32.totalorder %s1073_s14, %s892_s28  ;;  %s897_s11 = sshll.u32 %s977_s10, 4  ;;  %s898_s11 = int_to_ptr.vmem [resolvable:$false] %s897_s11 }
  0x1e   : > { %s899_s13 = scalar_lea.vmem %s898_s11, 2048  ;;  %p900_p11 = scmp.lt.s32.totalorder %s1073_s14, %s898_s11 }
  0x1f   : > { %p895_p6 = pnand %p893_p5, %p879_p10  ;;  %p901_p13 = scmp.lt.s32.totalorder %s899_s13, %s892_s28 }
  0x21   : > { %p896_p9 = pneg %p895_p6  ;;  %p902_p0 = por %p901_p13, %p900_p11 }
  0x23   : > { %p903_p1 = pnand %p902_p0, %p896_p9 }
  0x25   : > { %906 = shalt.err (!%p903_p1)
}
  0x26   : > { %s978_s17 = smov 384   ;;  %s979_s18 = smov 64  }
  0x27   : > { %s980_s19 = smov 4   ;;  %p725_p12 = scmp.ge.s32.totalorder %s975_s24, 1 }
  0x28   : > { %815 = dma.hbm_to_vmem [thread:$0]  (!%p1075_p8), %s1069_s12, 1024, %s1073_s14, %s222_s16, %s978_s17, %s979_s18, %s980_s19  }
  0x29   : > { %p271_p2 = scmp.lt.s32.totalorder %s975_s24, 7  ;;  %s1121_s28 = scalar_lea.hbm %s1220_s3, %s722_s9 }
  0x2a   : > { %s251_s10 = scalar_lea.vmem [#allocation4], %s721_s8  ;;  %s248_s12 = scalar_lea.sflag [#allocation5], %s1060_s7 }
  0x2b   : > { %p1112_p3 = pnand %p725_p12, %p271_p2  ;;  %s257_s11 = sshll.u32 %s251_s10, 4  ;;  %s1125_s11 = int_to_ptr.vmem [resolvable:$true] %s257_s11 }
  0x2c   : > { %s907_s14 = scalar_lea.hbm %s1121_s28, 1024  ;;  %s912_s9 = scalar_lea.hbm %s1220_s3, 6144 }
  0x2d   : > { %p908_p4 = scmp.ne.s32.totalorder %s1121_s28, %s907_s14  ;;  %p913_p9 = scmp.lt.u32.totalorder %s1121_s28, %s1220_s3 }
  0x2e   : > { %p914_p11 = scmp.lt.u32.totalorder %s912_s9, %s907_s14  ;;  %p916_p0 = scmp.lt.u32.totalorder %s907_s14, %s1121_s28 }
  0x2f   : > { %p910_p5 = pnand %p908_p4, %p879_p10 }
  0x30   : > { %p915_p13 = por %p914_p11, %p913_p9 }
  0x31   : > { %p911_p6 = pneg %p910_p5 }
  0x32   : > { %p917_p1 = por %p916_p0, %p915_p13 }
  0x34   : > { %p918_p12 = pnand %p917_p1, %p911_p6 }
  0x36   : > { %921 = shalt.err (!%p918_p12)
}
  0x37   : > { %s922_s8 = scalar_lea.vmem %s1125_s11, 1024  ;;  %s981_s27 = smov [#allocation4]  }
  0x38   : > { %p923_p2 = scmp.ne.s32.totalorder %s1125_s11, %s922_s8  ;;  %s927_s10 = sshll.u32 %s981_s27, 4  ;;  %s928_s10 = int_to_ptr.vmem [resolvable:$false] %s927_s10 }
  0x39   : > { %s929_s24 = scalar_lea.vmem %s928_s10, 2048  ;;  %p930_p7 = scmp.lt.s32.totalorder %s1125_s11, %s928_s10 }
  0x3a   : > { %p925_p4 = pnand %p923_p2, %p879_p10  ;;  %p931_p9 = scmp.lt.s32.totalorder %s929_s24, %s922_s8 }
  0x3c   : > { %p926_p5 = pneg %p925_p4  ;;  %p932_p11 = por %p931_p9, %p930_p7 }
  0x3e   : > { %p933_p13 = pnand %p932_p11, %p926_p5 }
  0x40   : > { %936 = shalt.err (!%p933_p13)
}
  0x41   : > { %818 = dma.hbm_to_vmem [thread:$0]  (!%p1075_p8), %s1121_s28, 1024, %s1125_s11, %s248_s12, %s978_s17, %s979_s18, %s980_s19  }
  0x42   : > { %275 = sbr.rel (%p1112_p3) target bundleno = 328 (0x148), region = 40  ;;  %s277_s14 = sand.u32 (!%p1112_p3), 1, %s967_s22  }
  0x43   : > { %s726_s16 = sshll.u32 (!%p1112_p3), %s277_s14, 6  ;;  %s278_s9 = scalar_lea.sflag (!%p1112_p3), [#allocation3], %s277_s14 }
  0x44   : > { %s1159_s13 = scalar_lea.vmem (!%p1112_p3), [#allocation2], %s726_s16  ;;  %p1228_p7 = scmp.ne.s32.totalorder (!%p1112_p3), %s1225_s30, 0 }
  0x49   : > { %954 = dma.done.wait (%p1228_p7), %s278_s9, 1024  }
  0x4a   : > { %956 = vsyncadd (%p1228_p7), %s278_s9, 4294966272  ;;  %s287_s7 = scalar_lea.sflag [#allocation5], %s277_s14  ;;  %s1165_s15 = scalar_lea.vmem [#allocation4], %s726_s16 }
  0x4b   : > { %958 = dma.done.wait (%p1228_p7), %s287_s7, 1024  }
  0x4c   : > { %960 = vsyncadd (%p1228_p7), %s287_s7, 4294966272  ;;  %v982_v0 = vmov 0.0   ;;  %vm983_vm0 = vmmov 0   ;;  %v857_v1 = vld [vmem:[%s1159_s13] sm:$0xff]   ;;  %v859_v3 = vld [vmem:[%s1159_s13 + $0x8] sm:$0xff]   ;;  %p333_p8 = scmp.lt.s32.totalorder %s1038_s25, 5 }
  0x4d   : > { %768 = vmatprep.subr.bf16.mxu0 %v982_v0  ;;  %788 = vmatprep.subr.bf16.mxu1 %v982_v0  ;;  %v858_v2 = vld [vmem:[%s1165_s15] sm:$0xff]   ;;  %v860_v4 = vld [vmem:[%s1165_s15 + $0x8] sm:$0xff]   ;;  %v861_v5 = vld [vmem:[%s1159_s13 + $0x10] sm:$0xff]  }
  0x4e   : > { %784 = vmatprep.mubr.msk.bf16.mxu0 %vm983_vm0, %v982_v0  ;;  %804 = vmatprep.mubr.msk.bf16.mxu1 %vm983_vm0, %v982_v0  ;;  %v862_v6 = vld [vmem:[%s1165_s15 + $0x10] sm:$0xff]   ;;  %v863_v7 = vld [vmem:[%s1159_s13 + $0x18] sm:$0xff]   ;;  %v865_v9 = vld [vmem:[%s1159_s13 + $0x20] sm:$0xff]   ;;  %s1234_s25 = smov (!%p333_p8, %s1038_s25), 5 }
  0x4f   : > { %769 = vmatpush3.bf16.msra.mxu0 %v857_v1  ;;  %789 = vmatpush3.bf16.msra.mxu1 %v858_v2  ;;  %v864_v8 = vld [vmem:[%s1165_s15 + $0x18] sm:$0xff]   ;;  %v866_v10 = vld [vmem:[%s1165_s15 + $0x20] sm:$0xff]   ;;  %v867_v13 = vld [vmem:[%s1159_s13 + $0x28] sm:$0xff]   ;;  %s335_s20 = scalar_lea.vmem %s1219_s2, %s1234_s25  ;;  %s338_s12 = scalar_lea.vmem %s1221_s4, %s1234_s25 }
  0x50   : > { %770 = vmatprep.subr.bf16.mxu0 %v982_v0  ;;  %790 = vmatprep.subr.bf16.mxu1 %v982_v0  ;;  %v348_v11 = vld [vmem:[%s1217_s0] sm:$0x3]  ;;  %v868_v14 = vld [vmem:[%s1165_s15 + $0x28] sm:$0xff]   ;;  %v869_v16 = vld [vmem:[%s1159_s13 + $0x30] sm:$0xff]   ;;  %s728_s21 = sshll.u32 %s1234_s25, 1 }
  0x51   : > { %v349_v12 = vsub.f32 0.0, %v348_v11  ;;  %v870_v17 = vld [vmem:[%s1165_s15 + $0x30] sm:$0xff]   ;;  %v871_v18 = vld [vmem:[%s1159_s13 + $0x38] sm:$0xff]   ;;  %v730_v25 = vld [vmem:[%s335_s20] ss:$0 sm:$0xff]  ;;  %s342_s10 = scalar_lea.vmem %s1222_s5, %s728_s21  ;;  %s346_s16 = scalar_lea.vmem %s1223_s6, %s728_s21 }
  0x52   : > { %v872_v19 = vld [vmem:[%s1165_s15 + $0x38] sm:$0xff]   ;;  %v739_v26 = vld [vmem:[%s338_s12] ss:$0 sm:$0xff] }
  0x53   : > { %771 = vmatpush3.bf16.msra.mxu0 %v859_v3  ;;  %791 = vmatpush3.bf16.msra.mxu1 %v860_v4  ;;  %v350_v15 = vmul.f32 1.442695, %v349_v12 }
  0x54   : > { %772 = vmatprep.subr.bf16.mxu0 %v982_v0  ;;  %792 = vmatprep.subr.bf16.mxu1 %v982_v0 }
  0x55   : > { %873 = vpow2.f32 %v350_v15 }
  0x57   : > { %773 = vmatpush3.bf16.msra.mxu0 %v861_v5  ;;  %793 = vmatpush3.bf16.msra.mxu1 %v862_v6 }
  0x58   : > { %774 = vmatprep.subr.bf16.mxu0 %v982_v0  ;;  %794 = vmatprep.subr.bf16.mxu1 %v982_v0 }
  0x5b   : > { %775 = vmatpush3.bf16.msra.mxu0 %v863_v7  ;;  %795 = vmatpush3.bf16.msra.mxu1 %v864_v8 }
  0x5c   : > { %776 = vmatprep.subr.bf16.mxu0 %v982_v0  ;;  %796 = vmatprep.subr.bf16.mxu1 %v982_v0 }
  0x5f   : > { %777 = vmatpush3.bf16.msra.mxu0 %v865_v9  ;;  %797 = vmatpush3.bf16.msra.mxu1 %v866_v10  ;;  %v874_v20 = vpop.eup %873 }
  0x60   : > { %778 = vmatprep.subr.bf16.mxu0 %v982_v0  ;;  %798 = vmatprep.subr.bf16.mxu1 %v982_v0  ;;  %v352_v21 = vadd.f32 1.0, %v874_v20 }
  0x62   : > { %875 = vrcp.f32 %v352_v21 }
  0x63   : > { %779 = vmatpush3.bf16.msra.mxu0 %v867_v13  ;;  %799 = vmatpush3.bf16.msra.mxu1 %v868_v14 }
  0x64   : > { %780 = vmatprep.subr.bf16.mxu0 %v982_v0  ;;  %800 = vmatprep.subr.bf16.mxu1 %v982_v0 }
  0x67   : > { %781 = vmatpush3.bf16.msra.mxu0 %v869_v16  ;;  %801 = vmatpush3.bf16.msra.mxu1 %v870_v17 }
  0x68   : > { %782 = vmatprep.subr.bf16.mxu0 %v982_v0  ;;  %802 = vmatprep.subr.bf16.mxu1 %v982_v0 }
  0x6b   : > { %783 = vmatpush3.bf16.msra.mxu0 %v871_v18  ;;  %803 = vmatpush3.bf16.msra.mxu1 %v872_v19 }
  0x6c   : > { %v876_v22 = vpop.eup %875 }
  0x6d   : > { %v355_v23 = vmul.f32 %v876_v22, %v348_v11 }
  0x6f   : > { %v356_v24 = vpack.c.bf16 %v355_v23, %v355_v23 }
  0x71   : > { %785 = vmatmul.mubr.bf16.vlgmr.msra.gmra.mrb[0].mxu0 %v356_v24  ;;  %805 = vmatmul.mubr.bf16.vlgmr.msra.gmra.mrb[0].mxu1 %v356_v24 }
 0x144   : > { %v462_v27 = vpop.f32.mrb[0].mxu0  ;;  %v574_v28 = vpop.f32.mrb[0].mxu1 }
 0x145   : > { %v463_v29 = vadd.f32 %v730_v25, %v462_v27  ;;  %v575_v30 = vadd.f32 %v739_v26, %v574_v28  ;;  %v786_v31 = vpop.f32.mrb[1].mxu0  ;;  %v806_v32 = vpop.f32.mrb[1].mxu1 }
 0x146   : > { %v465_v33 = vpop.f32.mrb[2].mxu0  ;;  %v577_v34 = vpop.f32.mrb[2].mxu1 }
 0x147   : > { %468 = vst [vmem:[%s342_s10] sm:$0x3] %v463_v29  ;;  %580 = vst [vmem:[%s346_s16] sm:$0x3] %v575_v30  ;;  %v787_v35 = vpop.f32.mrb[3].mxu0  ;;  %v807_v36 = vpop.f32.mrb[3].mxu1 }
 0x148 PF: > { %p20_p10 = scmp.ge.s32.totalorder %s1041_s26, 8   ;;  %s1229_s21 = smov %s967_s22 }
 0x149   : > { %s1230_s22 = smov %s971_s23  ;;  %s1231_s23 = smov %s1051_s29 }
 0x14a   : > { %s1232_s24 = smov %s1041_s26  ;;  %22 = sbr.rel (!%p20_p10) target bundleno = 5 (0x5), region = 111 }
 0x151   :  { %614 = vsyncpa [#allocation3], 1 }
 0x152   :  { %616 = vsyncpa [#allocation3 + $0x1], 1 }
 0x153   :  { %617 = vsyncpa [#allocation5], 1 }
 0x154   :  { %619 = vsyncpa [#allocation5 + $0x1], 1 }

// kernel: block_forward_pallas.11
= control target key start
LH: loop header
LB: loop body
LE: loop exit
PB: predicated region body
PF: predicated region fallthrough
CT: control target
= control target key end

     0   :  { %s882_s12 = smov 0   ;;  %s884_s13 = smov 0   ;;  %s1025_s0 = inlined_call_operand.vmem [shape: bf16[2,24,768], index: 0, kind: input, shape index: {}, may-alias: {0,1,2}]   ;;  %s1026_s1 = inlined_call_operand.vmem [shape: bf16[2,24,768], index: 1, kind: input, shape index: {}, may-alias: {0,1,2}]   ;;  %s1027_s2 = inlined_call_operand.vmem [shape: bf16[2,24,768], index: 2, kind: input, shape index: {}, may-alias: {0,1,2}]   ;;  %s1028_s3 = inlined_call_operand.vmem [shape: bf16[2,24,256], index: 3, kind: output, shape index: {}]  }
   0x1   :  { %s886_s14 = smov 0   ;;  %s888_s15 = smov 0  }
   0x2   :  { %s890_s16 = smov 0   ;;  %s892_s17 = smov 0  }
   0x3   :  { %s894_s18 = smov 0   ;;  %s896_s19 = smov 0  }
   0x4   :  { %s898_s20 = smov 0  }
   0x5 LB: > { %1031 = sst [smem:[#allocation5_spill]] %s846_s18  ;;  %s28_s21 = sadd.s32 1, %s838_s16  ;;  %s854_s20 = sphi %s898_s20, %s13_s20   ;;  %s850_s19 = sphi %s896_s19, %s1048_s19   ;;  %s846_s18 = sphi %s894_s18, %s1042_s18   ;;  %s842_s17 = sphi %s892_s17, %s1047_s17   ;;  %s838_s16 = sphi %s890_s16, %s1046_s16   ;;  %s834_s15 = sphi %s888_s15, %s1039_s15   ;;  %s830_s14 = sphi %s886_s14, %s1038_s14   ;;  %s826_s13 = sphi %s884_s13, %s1045_s13   ;;  %s822_s12 = sphi %s882_s12, %s1044_s12  }
   0x6   : > { %1032 = sst [smem:[#allocation6_spill]] %s850_s19  ;;  %p29_p0 = scmp.ge.s32.totalorder %s28_s21, 3 }
   0x7   : > { %s31_s22 = sadd.s32 1, %s842_s17  ;;  %p666_p1 = scmp.ge.s32.totalorder %s854_s20, 1 }
   0x8   : > { %s1050_s21 = smov (%p29_p0, %s28_s21), 0  ;;  %s1052_s22 = smov (!%p29_p0, %s31_s22), %s842_s17 }
   0x9   : > { %1033 = sst [smem:[#allocation7_spill]] %s1050_s21  ;;  %p228_p2 = scmp.lt.s32.totalorder %s854_s20, 37 }
   0xa   : > { %p33_p3 = scmp.ge.s32.totalorder %s1052_s22, 3  ;;  %s35_s23 = sadd.s32 1, %s846_s18 }
   0xb   : > { %p229_p4 = pnand %p666_p1, %p228_p2  ;;  %s39_s24 = sadd.s32 1, %s850_s19 }
   0xc   : > { %s1054_s22 = smov (%p33_p3, %s1052_s22), 0  ;;  %s1056_s23 = smov (!%p33_p3, %s35_s23), %s846_s18 }
   0xd   : > { %1034 = sst [smem:[#allocation8_spill]] %s1054_s22  ;;  %p37_p5 = scmp.ge.s32.totalorder %s1056_s23, 2 }
   0xe   : > { %232 = sbr.rel (%p229_p4) target bundleno = 849 (0x351), region = 32  ;;  %p292_p7 = scmp.lt.s32.totalorder (!%p229_p4), %s834_s15, 1 }
   0xf   : > { %s1058_s23 = smov (%p37_p5, %s1056_s23), 0  ;;  %s1060_s24 = smov (!%p37_p5, %s39_s24), %s850_s19 }
  0x10   : > { %1035 = sst [smem:[#allocation9_spill]] %s1058_s23  ;;  %p41_p6 = scmp.ge.s32.totalorder %s1060_s24, 2 }
  0x11   : > { %p294_p8 = scmp.lt.s32.totalorder (!%p229_p4), %s826_s13, 2  ;;  %p296_p9 = scmp.lt.s32.totalorder (!%p229_p4), %s830_s14, 5 }
  0x12   : > { %s1062_s24 = smov (%p41_p6, %s1060_s24), 0  ;;  %s304_s27 = sadd.s32 (!%p229_p4), 2, %s830_s14 }
  0x13   : > { %1036 = sst [smem:[#allocation10_spill]] %s1062_s24  ;;  %p307_p10 = scmp.lt.s32.totalorder (!%p229_p4), %s822_s12, 2 }
  0x14   : > { %s318_s30 = sadd.s32 (!%p229_p4), 4, %s830_s14  ;;  %p309_p11 = scmp.lt.s32.totalorder (!%p229_p4), %s304_s27, 5 }
  0x15   : > { %s1064_s15 = smov (!%p292_p7, %s834_s15), 1  ;;  %s1066_s13 = smov (!%p294_p8, %s826_s13), 2 }
  0x16   : > { %s297_s25 = scalar_select %p296_p9, %s830_s14, 5 }
  0x17   : > { %s693_s26 = smul.u32 6, %s1066_s13  ;;  %p323_p12 = scmp.lt.s32.totalorder %s318_s30, 5 }
  0x18   : > { %s694_s28 = smul.u32 18, %s1064_s15  ;;  %s1068_s27 = smov (!%p309_p11, %s304_s27), 5 }
  0x19   : > { %s299_s29 = sadd.s32 %s693_s26, %s297_s25  ;;  %p336_p13 = scmp.lt.s32.totalorder %s830_s14, 1 }
  0x1a   : > { %s301_s4 = sadd.s32 %s694_s28, %s299_s29  ;;  %s1070_s30 = smov (!%p323_p12, %s318_s30), 5 }
  0x1b   : > { %s955_s5 = sshll.u32 %s301_s4, 2  ;;  %s670_s25 = sshll.u32 %s1066_s13, 1 }
  0x1c   : > { %s308_s9 = scalar_select %p307_p10, %s822_s12, 2 }
  0x1d   : > { %s1072_s14 = smov (!%p336_p13, %s830_s14), 1  ;;  %p672_p0 = scmp.ne.s32.totalorder %s822_s12, 0 }
  0x1e   : > { %s695_s10 = smul.u32 6, %s308_s9  ;;  %s339_s18 = sadd.s32 %s670_s25, %s1072_s14  ;;  %vm349_vm0 = vcmask (!%p672_p0), 7168   ;;  %v856_v0 = vmov (!%p672_p0), -inf   ;;  %v857_v1 = vmov (!%p672_p0), 0.0  }
  0x1f   : > { %s696_s9 = smul.u32 6, %s1064_s15  ;;  %350 = vst.msk [vmem:[#allocation2] sm:$0xff] (!%p672_p0), %vm349_vm0, %v856_v0  ;;  %351 = vst.msk [vmem:[#allocation3] sm:$0xff] (!%p672_p0), %vm349_vm0, %v857_v1 }
  0x20   : > { %s312_s11 = sadd.s32 %s695_s10, %s1068_s27  ;;  %s326_s29 = sadd.s32 %s695_s10, %s1070_s30  ;;  %352 = vst [vmem:[#allocation4] sm:$0xff] (!%p672_p0), %v857_v1 }
  0x21   : > { %s314_s26 = sadd.s32 %s694_s28, %s312_s11  ;;  %s328_s4 = sadd.s32 %s694_s28, %s326_s29 }
  0x22   : > { %s668_s24 = sshll.u32 %s314_s26, 2  ;;  %s967_s6 = sshll.u32 %s328_s4, 2 }
  0x23   : > { %s316_s21 = scalar_lea.vmem %s1026_s1, %s668_s24  ;;  %s330_s19 = scalar_lea.vmem %s1027_s2, %s967_s6 }
  0x24   : > { %s341_s27 = sadd.s32 %s696_s9, %s339_s18  ;;  %348 = sbr.rel (%p672_p0) target bundleno = 43 (0x2b), region = 36 }
  0x25   : > { %s671_s13 = sshll.u32 %s341_s27, 2 }
  0x26   : > { %s978_s28 = scalar_lea.vmem %s1028_s3, %s671_s13 }
  0x2b PF: > { %v354_v2 = vld [vmem:[%s316_s21] sm:$0xf]  ;;  %v858_v3 = vmov 0.0   ;;  %vm859_vm1 = vmmov 0   ;;  %s1037_s18 = scalar_lea.vmem %s1025_s0, %s955_s5  ;;  %vm396_vm2 = vcmask 64512   ;;  %v860_v10 = vmov 0  }
  0x2c   : > { %681 = vmatprep.subr.bf16.mxu0 %v858_v3  ;;  %683 = vmatprep.mubr.msk.bf16.mxu0 %vm859_vm1, %v858_v3  ;;  %v353_v4 = vld [vmem:[%s1037_s18] sm:$0xf]  ;;  %vm418_vm3 = vcmask 7168   ;;  %vm432_vm4 = vcmask 1043456   ;;  %v412_v25 = vld [vmem:[#allocation3] sm:$0xff]  ;;  %v420_v29 = vld [vmem:[#allocation4] sm:$0xff] }
  0x2d   : > { %682 = vmatpush3.bf16.xpose.msra.mxu0 %v354_v2  ;;  %687 = vmatprep.subr.bf16.mxu1 %v858_v3  ;;  %v395_v11 = vld [vmem:[#allocation2] sm:$0xff]  ;;  %p674_p1 = scmp.ne.s32.totalorder %s822_s12, 2 }
  0x2e   : > { %689 = vmatprep.mubr.msk.bf16.mxu1 %vm859_vm1, %v858_v3  ;;  %775 = vset.pattern.permute.xlu0 %v860_v10  ;;  %v428_v15 = vld [vmem:[%s330_s19] sm:$0xf]  ;;  %v861_v38 = vmov (!%p674_p1), 0  }
  0x2f   : > { %776 = vset.pattern.permute.xlu1 %v860_v10  ;;  %v434_v16 = vsel %vm432_vm4, %v428_v15, 0 }
  0x30   : > { %688 = vmatpush3.bf16.msra.mxu1 %v434_v16 }
  0x34   : > { %684 = vmatmul.mubr.bf16.vlgmr.msra.gmra.mrb[0].mxu0 %v353_v4 }
 0x107   : > { %v389_v5 = vpop.f32.mrb[0].mxu0 }
 0x108   : > { %v685_v6 = vpop.f32.mrb[1].mxu0  ;;  %v397_v7 = vsel %vm396_vm2, %v389_v5, -inf }
 0x109   : > { %398 = vmax.xlane.f32.xlu0 %v397_v7  ;;  %v392_v8 = vpop.f32.mrb[2].mxu0 }
 0x10a   : > { %v686_v9 = vpop.f32.mrb[3].mxu0 }
 0x196   : > { %v399_v12 = vpop.xlane.xlu0 %398 }
 0x197   : > { %v400_v13 = vmax.f32 %v395_v11, %v399_v12 }
 0x199   : > { %v401_v14 = vsub.f32 %v395_v11, %v400_v13  ;;  %478 = vst.msk [vmem:[#allocation2] sm:$0xff] %vm418_vm3, %v400_v13  ;;  %406 = vperm.xlu0 %775, %v400_v13  }
 0x19b   : > { %v402_v23 = vmul.f32 1.442695, %v401_v14 }
 0x19d   : > { %781 = vset.pattern.permute.xlu0 (!%p674_p1), %v861_v38 }
 0x218   : > { %v407_v17 = vpop.permute.xlu0 %406 }
 0x219   : > { %v409_v18 = vsub.f32 %v389_v5, %v407_v17 }
 0x21b   : > { %v410_v19 = vmul.f32 1.442695, %v409_v18 }
 0x21d   : > { %777 = vpow2.f32 %v410_v19 }
 0x21e   : > { %779 = vpow2.f32 %v402_v23 }
 0x227   : > { %v778_v20 = vpop.eup %777 }
 0x228   : > { %v414_v21 = vsel %vm396_vm2, %v778_v20, 0.0  ;;  %v427_v22 = vpack.c.bf16 %v778_v20, %v778_v20  ;;  %v780_v24 = vpop.eup %779 }
 0x229   : > { %415 = vadd.xlane.f32.xlu1 %v414_v21  ;;  %v413_v26 = vmul.f32 %v780_v24, %v412_v25 }
 0x22a   : > { %690 = vmatmul.mubr.msk.bf16.vlgmr.msra.gmra.mrb[0].mxu1 %vm396_vm2, %v427_v22 }
 0x23a   : > { %423 = vperm.xlu1 %776, %v780_v24  }
 0x2b6   : > { %v416_v27 = vpop.xlane.xlu1 %415 }
 0x2b7   : > { %v417_v28 = vadd.f32 %v416_v27, %v413_v26 }
 0x2b9   : > { %419 = vst.msk [vmem:[#allocation3] sm:$0xff] %vm418_vm3, %v417_v28 }
 0x2ba   : > { %v424_v30 = vpop.permute.xlu1 %423 }
 0x2bb   : > { %v426_v31 = vmul.f32 %v424_v30, %v420_v29 }
 0x2c0   : > { %v484_v37 = vld [vmem:[#allocation3] sm:$0xff] (!%p674_p1) }
 0x2c1   : > { %487 = vperm.xlu0 (!%p674_p1), %781, %v484_v37  }
 0x2fa   : > { %482 = sbr.rel (%p674_p1) target bundleno = 849 (0x351), region = 40 }
 0x2fd   : > { %v470_v32 = vpop.f32.mrb[0].mxu1 }
 0x2fe   : > { %v476_v33 = vadd.f32 %v470_v32, %v426_v31  ;;  %v691_v34 = vpop.f32.mrb[1].mxu1 }
 0x2ff   : > { %v473_v35 = vpop.f32.mrb[2].mxu1 }
 0x300   : > { %477 = vst [vmem:[#allocation4] sm:$0xff] %v476_v33  ;;  %v692_v36 = vpop.f32.mrb[3].mxu1 }
 0x307   : > { %v483_v40 = vld [vmem:[#allocation4] sm:$0xff] }
 0x340   : > { %v488_v39 = vpop.permute.xlu0 %487 }
 0x341   : > { %782 = vrcp.f32 %v488_v39 }
 0x34b   : > { %v783_v41 = vpop.eup %782 }
 0x34c   : > { %v491_v42 = vmul.f32 %v783_v41, %v483_v40 }
 0x34e   : > { %v492_v43 = vpack.c.bf16 %v491_v42, %v491_v42 }
 0x350   : > { %493 = vst [vmem:[%s978_s28] sm:$0xf] %v492_v43 }
 0x351 PF: > { %s13_s20 = sadd.s32 1, %s854_s20   ;;  %s1038_s14 = sld [smem:[#allocation5_spill]] }
 0x352   : > { %p10_p2 = scmp.ge.s32.totalorder %s13_s20, 38   ;;  %s1039_s15 = sld [smem:[#allocation6_spill]] }
 0x353   : > { %s1040_s19 = sld [smem:[#allocation7_spill]]  ;;  %s1041_s23 = sld [smem:[#allocation8_spill]] }
 0x354   : > { %s1042_s18 = sld [smem:[#allocation9_spill]]  ;;  %s1043_s24 = sld [smem:[#allocation10_spill]] }
 0x355   : > { %s1044_s12 = smov %s838_s16  ;;  %s1045_s13 = smov %s842_s17 }
 0x356   :  { %12 = sbr.rel (!%p10_p2) target bundleno = 5 (0x5), region = 76 }
 0x359   : > { %s1046_s16 = smov %s1040_s19  ;;  %s1047_s17 = smov %s1041_s23 }
 0x35a   : > { %s1048_s19 = smov %s1043_s24 }

// kernel: block_forward_pallas.10
= control target key start
LH: loop header
LB: loop body
LE: loop exit
PB: predicated region body
PF: predicated region fallthrough
CT: control target
= control target key end

     0   :  { %s1473_s13 = smov 0   ;;  %s1475_s14 = smov 0   ;;  %s1732_s0 = inlined_call_operand.vmem [shape: f32[2,16,128], index: 0, kind: input, shape index: {}]   ;;  %s1733_s1 = inlined_call_operand.vmem [shape: f32[1,128], index: 1, kind: input, shape index: {}]   ;;  %s1734_s2 = inlined_call_operand.vmem [shape: f32[2,1,128], index: 2, kind: input, shape index: {}]   ;;  %s1735_s3 = inlined_call_operand.vmem [shape: f32[2,1,128], index: 3, kind: input, shape index: {}]   ;;  %s1736_s4 = inlined_call_operand.vmem [shape: bf16[128,768], index: 4, kind: input, shape index: {}]   ;;  %s1737_s5 = inlined_call_operand.vmem [shape: f32[1,768], index: 5, kind: input, shape index: {}]   ;;  %s1738_s6 = inlined_call_operand.vmem [shape: f32[1,256], index: 6, kind: input, shape index: {}]   ;;  %s1739_s7 = inlined_call_operand.vmem [shape: f32[1,256], index: 7, kind: input, shape index: {}]   ;;  %s1740_s8 = inlined_call_operand.vmem [shape: f32[16,256], index: 8, kind: input, shape index: {}]   ;;  %s1741_s9 = inlined_call_operand.vmem [shape: f32[16,256], index: 9, kind: input, shape index: {}]   ;;  %s1742_s10 = inlined_call_operand.vmem [shape: bf16[2,16,768], index: 10, kind: output, shape index: {}]  }
   0x1   :  { %s1477_s15 = smov 0   ;;  %s1479_s16 = smov 0  }
   0x2   :  { %s1481_s17 = smov 0  }
   0x3 LB: > { %s29_s18 = sadd.s32 1, %s1406_s15  ;;  %s32_s19 = sadd.s32 1, %s1410_s16  ;;  %s1414_s17 = sphi %s1481_s17, %s20_s17   ;;  %s1410_s16 = sphi %s1479_s16, %s1746_s16   ;;  %s1406_s15 = sphi %s1477_s15, %s1745_s15   ;;  %s1402_s14 = sphi %s1475_s14, %s1744_s14   ;;  %s1398_s13 = sphi %s1473_s13, %s1743_s13  }
   0x4   : > { %p30_p0 = scmp.ge.s32.totalorder %s29_s18, 2  ;;  %p1186_p1 = scmp.ge.s32.totalorder %s1414_s17, 1 }
   0x5   : > { %p367_p2 = scmp.lt.s32.totalorder %s1414_s17, 5 }
   0x6   : > { %s1748_s18 = smov (%p30_p0, %s29_s18), 0  ;;  %s1750_s19 = smov (!%p30_p0, %s32_s19), %s1410_s16 }
   0x7   : > { %p368_p3 = pnand %p1186_p1, %p367_p2  ;;  %p34_p4 = scmp.ge.s32.totalorder %s1750_s19, 2 }
   0x8   : > { %p428_p5 = scmp.lt.s32.totalorder (!%p368_p3), %s1402_s14, 1  ;;  %p430_p6 = scmp.lt.s32.totalorder (!%p368_p3), %s1398_s13, 1  ;;  %v1298_v0 = vld [vmem:[%s1736_s4 + $0x4] ss:$24 sps:$4 sm:$0xff] (!%p368_p3)   ;;  %v1300_v1 = vld [vmem:[%s1736_s4] ss:$24 sps:$4 sm:$0xff] (!%p368_p3)   ;;  %v482_v39 = vlaneseq (!%p368_p3) }
   0x9   : > { %s1752_s19 = smov (%p34_p4, %s1750_s19), 0  ;;  %371 = sbr.rel (%p368_p3) target bundleno = 702 (0x2be), region = 60 }
   0xa   : > { %817 = vmatprep.subr.bf16.mxu0 (!%p368_p3), %v1298_v0  ;;  %v1301_v2 = vld [vmem:[%s1736_s4 + $0xc] ss:$24 sps:$4 sm:$0xff] (!%p368_p3)   ;;  %v1303_v3 = vld [vmem:[%s1736_s4 + $0x8] ss:$24 sps:$4 sm:$0xff] (!%p368_p3)   ;;  %v1307_v6 = vld [vmem:[%s1736_s4 + $0x3c] ss:$24 sps:$4 sm:$0xff] (!%p368_p3)  }
   0xb   : > { %818 = vmatpush1.bf16.msra.mxu0 (!%p368_p3), %v1300_v1  ;;  %v1304_v4 = vld [vmem:[%s1736_s4 + $0x34] ss:$24 sps:$4 sm:$0xff] (!%p368_p3)   ;;  %v1306_v5 = vld [vmem:[%s1736_s4 + $0x30] ss:$24 sps:$4 sm:$0xff] (!%p368_p3)   ;;  %858 = vmatprep.subr.bf16.mxu1 (!%p368_p3), %v1301_v2  ;;  %v1310_v10 = vld [vmem:[%s1736_s4 + $0x64] ss:$24 sps:$4 sm:$0xff] (!%p368_p3)  }
   0xc   : > { %859 = vmatpush1.bf16.msra.mxu1 (!%p368_p3), %v1303_v3  ;;  %819 = vmatprep.subr.bf16.mxu0 (!%p368_p3), %v1304_v4  ;;  %v1309_v7 = vld [vmem:[%s1736_s4 + $0x38] ss:$24 sps:$4 sm:$0xff] (!%p368_p3)   ;;  %v1313_v12 = vld [vmem:[%s1736_s4 + $0x6c] ss:$24 sps:$4 sm:$0xff] (!%p368_p3)   ;;  %v1315_v13 = vld [vmem:[%s1736_s4 + $0x68] ss:$24 sps:$4 sm:$0xff] (!%p368_p3)  }
   0xd   : > { %860 = vmatprep.subr.bf16.mxu1 (!%p368_p3), %v1307_v6  ;;  %v1312_v11 = vld [vmem:[%s1736_s4 + $0x60] ss:$24 sps:$4 sm:$0xff] (!%p368_p3)   ;;  %v1316_v14 = vld [vmem:[%s1736_s4 + $0x94] ss:$24 sps:$4 sm:$0xff] (!%p368_p3)   ;;  %v1318_v15 = vld [vmem:[%s1736_s4 + $0x90] ss:$24 sps:$4 sm:$0xff] (!%p368_p3)  }
   0xe   : > { %v1319_v16 = vld [vmem:[%s1736_s4 + $0x9c] ss:$24 sps:$4 sm:$0xff] (!%p368_p3)   ;;  %v1321_v17 = vld [vmem:[%s1736_s4 + $0x98] ss:$24 sps:$4 sm:$0xff] (!%p368_p3)   ;;  %v1325_v20 = vld [vmem:[%s1736_s4 + $0xcc] ss:$24 sps:$4 sm:$0xff] (!%p368_p3)  }
   0xf   : > { %820 = vmatpush1.bf16.msra.mxu0 (!%p368_p3), %v1306_v5  ;;  %v1322_v18 = vld [vmem:[%s1736_s4 + $0xc4] ss:$24 sps:$4 sm:$0xff] (!%p368_p3)   ;;  %v1324_v19 = vld [vmem:[%s1736_s4 + $0xc0] ss:$24 sps:$4 sm:$0xff] (!%p368_p3)   ;;  %v1328_v22 = vld [vmem:[%s1736_s4 + $0xf4] ss:$24 sps:$4 sm:$0xff] (!%p368_p3)  }
  0x10   : > { %s1754_s14 = smov (!%p428_p5, %s1402_s14), 1  ;;  %s1756_s13 = smov (!%p430_p6, %s1398_s13), 1  ;;  %861 = vmatpush1.bf16.msra.mxu1 %v1309_v7  ;;  %821 = vmatprep.subr.bf16.mxu0 %v1310_v10  ;;  %v1327_v21 = vld [vmem:[%s1736_s4 + $0xc8] ss:$24 sps:$4 sm:$0xff]   ;;  %v1331_v23 = vld [vmem:[%s1736_s4 + $0xfc] ss:$24 sps:$4 sm:$0xff]  }
  0x11   : > { %s1187_s12 = sshll.u32 %s1754_s14, 1  ;;  %862 = vmatprep.subr.bf16.mxu1 %v1313_v12  ;;  %v1330_v24 = vld [vmem:[%s1736_s4 + $0xf0] ss:$24 sps:$4 sm:$0xff]   ;;  %v1334_v26 = vld [vmem:[%s1736_s4 + $0x124] ss:$24 sps:$4 sm:$0xff]   ;;  %v1416_v28 = vmov 0   ;;  %s438_s29 = scalar_lea.vmem %s1734_s2, %s1754_s14 }
  0x12   : > { %s433_s22 = sadd.s32 %s1187_s12, %s1756_s13  ;;  %v1333_v25 = vld [vmem:[%s1736_s4 + $0xf8] ss:$24 sps:$4 sm:$0xff]   ;;  %v1337_v27 = vld [vmem:[%s1736_s4 + $0x12c] ss:$24 sps:$4 sm:$0xff]   ;;  %849 = vmatprep.mubr.bf16.mxu0 %v1416_v28  ;;  %890 = vmatprep.mubr.bf16.mxu1 %v1416_v28  ;;  %v1339_v30 = vld [vmem:[%s1736_s4 + $0x128] ss:$24 sps:$4 sm:$0xff]   ;;  %s441_s21 = scalar_lea.vmem %s1735_s3, %s1754_s14 }
  0x13   : > { %s1188_s25 = sshll.u32 %s433_s22, 3  ;;  %822 = vmatpush1.bf16.msra.mxu0 %v1312_v11  ;;  %v1336_v29 = vld [vmem:[%s1736_s4 + $0x120] ss:$24 sps:$4 sm:$0xff]   ;;  %v1340_v31 = vld [vmem:[%s1736_s4 + $0x154] ss:$24 sps:$4 sm:$0xff]   ;;  %v1619_v40 = vshrl.u32 %v482_v39, 7 }
  0x14   : > { %s435_s28 = scalar_lea.vmem %s1732_s0, %s1188_s25  ;;  %863 = vmatpush1.bf16.msra.mxu1 %v1315_v13  ;;  %823 = vmatprep.subr.bf16.mxu0 %v1316_v14  ;;  %v1343_v32 = vld [vmem:[%s1736_s4 + $0x15c] ss:$24 sps:$4 sm:$0xff]   ;;  %v1342_v33 = vld [vmem:[%s1736_s4 + $0x150] ss:$24 sps:$4 sm:$0xff]   ;;  %v479_v41 = vld [vmem:[%s438_s29] sm:$0x1] }
  0x15   : > { %v1536_v8 = vld [vmem:[%s435_s28] sm:$0xff]  ;;  %864 = vmatprep.subr.bf16.mxu1 %v1319_v16  ;;  %v1345_v34 = vld [vmem:[%s1736_s4 + $0x158] ss:$24 sps:$4 sm:$0xff]   ;;  %v1348_v35 = vld [vmem:[%s1736_s4 + $0x14] ss:$24 sps:$4 sm:$0xff]   ;;  %v480_v42 = vadd.f32 1.0, %v479_v41 }
  0x16   : > { %v463_v9 = vmul.f32 %v1536_v8, %v1536_v8  ;;  %v1622_v43 = vsub.s32 0, %v1619_v40  ;;  %v1194_v45 = vld [vmem:[%s1733_s1] ss:$0 sm:$0xff]  ;;  %v1346_v52 = vld [vmem:[%s1736_s4 + $0x10] ss:$24 sps:$4 sm:$0xff]   ;;  %v557_v4 = vsub.s32 2, %v1619_v40 }
  0x17   : > { %824 = vmatpush1.bf16.msra.mxu0 %v1318_v15  ;;  %v1195_v49 = vld [vmem:[%s441_s21] ss:$0 sm:$0xff]  ;;  %v1351_v54 = vld [vmem:[%s1736_s4 + $0x44] ss:$24 sps:$4 sm:$0xff]   ;;  %v1354_v56 = vld [vmem:[%s1736_s4 + $0x74] ss:$24 sps:$4 sm:$0xff]  }
  0x18   : > { %464 = vadd.xlane.f32.xlu0 %v463_v9  ;;  %865 = vmatpush1.bf16.msra.mxu1 %v1321_v17  ;;  %v485_v47 = vrot.slane %v480_v42, %v1622_v43  ;;  %v1349_v55 = vld [vmem:[%s1736_s4 + $0x40] ss:$24 sps:$4 sm:$0xff]   ;;  %v1352_v57 = vld [vmem:[%s1736_s4 + $0x70] ss:$24 sps:$4 sm:$0xff]   ;;  %v1357_v58 = vld [vmem:[%s1736_s4 + $0xa4] ss:$24 sps:$4 sm:$0xff]  }
  0x19   : > { %825 = vmatprep.subr.bf16.mxu0 %v1322_v18  ;;  %866 = vmatprep.subr.bf16.mxu1 %v1325_v20  ;;  %v1355_v59 = vld [vmem:[%s1736_s4 + $0xa0] ss:$24 sps:$4 sm:$0xff]   ;;  %v1360_v60 = vld [vmem:[%s1736_s4 + $0xd4] ss:$24 sps:$4 sm:$0xff]   ;;  %v1358_v61 = vld [vmem:[%s1736_s4 + $0xd0] ss:$24 sps:$4 sm:$0xff]  }
  0x1a   : > { %v1363_v62 = vld [vmem:[%s1736_s4 + $0x104] ss:$24 sps:$4 sm:$0xff]   ;;  %v1361_v63 = vld [vmem:[%s1736_s4 + $0x100] ss:$24 sps:$4 sm:$0xff]   ;;  %v1366_v0 = vld [vmem:[%s1736_s4 + $0x134] ss:$24 sps:$4 sm:$0xff]  }
  0x1b   : > { %826 = vmatpush1.bf16.msra.mxu0 %v1324_v19  ;;  %v1364_v1 = vld [vmem:[%s1736_s4 + $0x130] ss:$24 sps:$4 sm:$0xff]   ;;  %v1369_v2 = vld [vmem:[%s1736_s4 + $0x164] ss:$24 sps:$4 sm:$0xff]   ;;  %v1367_v3 = vld [vmem:[%s1736_s4 + $0x160] ss:$24 sps:$4 sm:$0xff]  }
  0x1c   : > { %867 = vmatpush1.bf16.msra.mxu1 %v1327_v21  ;;  %827 = vmatprep.subr.bf16.mxu0 %v1328_v22  ;;  %v545_v5 = vld [vmem:[%s1737_s5] sm:$0x3f]  ;;  %v1683_v6 = vsub.s32 1, %v1619_v40  ;;  %v561_v7 = vsub.s32 3, %v1619_v40  ;;  %s1254_s28 = smul.u32 6, %s1756_s13  ;;  %s1417_s25 = smov 64  }
  0x1d   : > { %868 = vmatprep.subr.bf16.mxu1 %v1331_v23  ;;  %v558_v9 = vrot.slane %v545_v5, %v557_v4  ;;  %s1255_s29 = smul.u32 12, %s1754_s14  ;;  %s1249_s26 = sshll.u32 %s1756_s13, 4 }
  0x1e   : > { %v554_v10 = vrot.slane %v545_v5, %v1683_v6  ;;  %v562_v11 = vrot.slane %v545_v5, %v561_v7  ;;  %s451_s12 = scalar_lea.vmem %s1741_s9, %s1249_s26 }
  0x1f   : > { %828 = vmatpush1.bf16.msra.mxu0 %v1330_v24  ;;  %s458_s30 = sadd.s32 %s1255_s29, %s1254_s28  ;;  %s446_s29 = scalar_lea.vmem %s1740_s8, %s1249_s26 }
  0x20   : > { %869 = vmatpush1.bf16.msra.mxu1 %v1333_v25  ;;  %829 = vmatprep.subr.bf16.mxu0 %v1334_v26  ;;  %s1193_s11 = sshll.u32 %s458_s30, 2 }
  0x21   : > { %870 = vmatprep.subr.bf16.mxu1 %v1337_v27  ;;  %s1695_s21 = scalar_lea.vmem %s1742_s10, %s1193_s11 }
  0x23   : > { %830 = vmatpush1.bf16.msra.mxu0 %v1336_v29 }
  0x24   : > { %871 = vmatpush1.bf16.msra.mxu1 %v1339_v30  ;;  %831 = vmatprep.subr.bf16.mxu0 %v1340_v31  ;;  %v565_v30 = vsub.s32 4, %v1619_v40  ;;  %v569_v31 = vsub.s32 5, %v1619_v40 }
  0x25   : > { %872 = vmatprep.subr.bf16.mxu1 %v1343_v32 }
  0x26   : > { %v566_v32 = vrot.slane %v545_v5, %v565_v30 }
  0x27   : > { %832 = vmatpush1.bf16.msra.mxu0 %v1342_v33  ;;  %v570_v33 = vrot.slane %v545_v5, %v569_v31 }
  0x28   : > { %873 = vmatpush1.bf16.msra.mxu1 %v1345_v34  ;;  %899 = vmatprep.subr.bf16.mxu0 %v1348_v35 }
  0xa5   : > { %v465_v36 = vpop.xlane.xlu0 %464 }
  0xa6   : > { %v467_v37 = vmul.f32 0.0078125, %v465_v36 }
  0xa8   : > { %v468_v38 = vadd.f32 1e-06, %v467_v37 }
  0xaa   : > { %1370 = vrsqrt.f32 %v468_v38 }
  0xb4   : > { %v1371_v44 = vpop.eup %1370 }
  0xb5   : > { %v470_v46 = vmul.f32 %v1371_v44, %v1536_v8  ;;  %v550_v8 = vrot.slane %v545_v5, %v1622_v43 }
  0xb7   : > { %v478_v48 = vmul.f32 %v1194_v45, %v470_v46 }
  0xb9   : > { %v487_v50 = vmul.f32 %v485_v47, %v478_v48  ;;  %v951_v48 = vld [vmem:[%s1738_s6] sm:$0x3] }
  0xbb   : > { %v495_v51 = vadd.f32 %v1195_v49, %v487_v50  ;;  %v960_v50 = vrot.slane %v951_v48, %v1683_v6 }
  0xbd   : > { %v496_v53 = vpack.c.bf16 %v495_v51, %v495_v51  ;;  %v956_v51 = vrot.slane %v951_v48, %v1622_v43 }
  0xbf   : > { %850 = vmatmul.mubr.bf16.vlgmr.msra.gmra.mrb[0].mxu0 %v496_v53  ;;  %891 = vmatmul.mubr.bf16.vlgmr.msra.gmra.mrb[0].mxu1 %v496_v53 }
  0xc0   : > { %900 = vmatpush1.bf16.msra.mxu0 %v1346_v52  ;;  %931 = vmatprep.mubr.bf16.mxu0 %v1416_v28 }
  0xc1   : > { %901 = vmatprep.subr.bf16.mxu0 %v1351_v54 }
  0xc4   : > { %902 = vmatpush1.bf16.msra.mxu0 %v1349_v55 }
  0xc5   : > { %903 = vmatprep.subr.bf16.mxu0 %v1354_v56 }
  0xc8   : > { %904 = vmatpush1.bf16.msra.mxu0 %v1352_v57 }
  0xc9   : > { %905 = vmatprep.subr.bf16.mxu0 %v1357_v58 }
  0xcc   : > { %906 = vmatpush1.bf16.msra.mxu0 %v1355_v59 }
  0xcd   : > { %907 = vmatprep.subr.bf16.mxu0 %v1360_v60 }
  0xd0   : > { %908 = vmatpush1.bf16.msra.mxu0 %v1358_v61 }
  0xd1   : > { %909 = vmatprep.subr.bf16.mxu0 %v1363_v62 }
  0xd4   : > { %910 = vmatpush1.bf16.msra.mxu0 %v1361_v63 }
  0xd5   : > { %911 = vmatprep.subr.bf16.mxu0 %v1366_v0  ;;  %v992_v0 = vld [vmem:[%s451_s12 + $0x8] sm:$0xff] }
  0xd8   : > { %912 = vmatpush1.bf16.msra.mxu0 %v1364_v1  ;;  %v989_v1 = vld [vmem:[%s446_s29] sm:$0xff] }
  0xd9   : > { %913 = vmatprep.subr.bf16.mxu0 %v1369_v2  ;;  %v991_v2 = vld [vmem:[%s451_s12] sm:$0xff] }
  0xdc   : > { %914 = vmatpush1.bf16.msra.mxu0 %v1367_v3 }
  0xdf   : > { %932 = vmatmul.mubr.bf16.vlgmr.msra.gmra.mrb[4].mxu0 %v496_v53  ;;  %v975_v53 = vld [vmem:[%s1739_s7] sm:$0x3] }
  0xe0   : > { %v980_v59 = vrot.slane %v975_v53, %v1622_v43  ;;  %v984_v62 = vrot.slane %v975_v53, %v1683_v6  ;;  %v990_v43 = vld [vmem:[%s446_s29 + $0x8] sm:$0xff] }
 0x192   : > { %v851_v12 = vpop.f32.mrb[0].mxu0  ;;  %v892_v13 = vpop.f32.mrb[0].mxu1 }
 0x193   : > { %v852_v14 = vadd.f32 %v851_v12, %v550_v8  ;;  %v893_v15 = vadd.f32 %v892_v13, %v558_v9  ;;  %v853_v16 = vpop.f32.mrb[1].mxu0  ;;  %v894_v17 = vpop.f32.mrb[1].mxu1 }
 0x194   : > { %v854_v18 = vadd.f32 %v853_v16, %v554_v10  ;;  %v895_v19 = vadd.f32 %v894_v17, %v562_v11  ;;  %v855_v20 = vpop.f32.mrb[2].mxu0  ;;  %v896_v21 = vpop.f32.mrb[2].mxu1 }
 0x195   : > { %v940_v22 = vmul.f32 %v852_v14, %v852_v14  ;;  %v856_v23 = vpop.f32.mrb[3].mxu0  ;;  %v897_v24 = vpop.f32.mrb[3].mxu1  ;;  %v965_v25 = vmul.f32 %v893_v15, %v893_v15 }
 0x196   : > { %v941_v26 = vmul.f32 %v854_v18, %v854_v18  ;;  %v966_v27 = vmul.f32 %v895_v19, %v895_v19 }
 0x198   : > { %v967_v28 = vadd.f32 %v966_v27, %v965_v25  ;;  %v942_v29 = vadd.f32 %v941_v26, %v940_v22 }
 0x19a   : > { %968 = vadd.xlane.f32.xlu1 %v967_v28  ;;  %943 = vadd.xlane.f32.xlu0 %v942_v29 }
 0x1b2   : > { %v933_v34 = vpop.f32.mrb[4].mxu0 }
 0x1b3   : > { %v934_v35 = vadd.f32 %v933_v34, %v566_v32  ;;  %v935_v36 = vpop.f32.mrb[5].mxu0 }
 0x1b4   : > { %v936_v37 = vadd.f32 %v935_v36, %v570_v33  ;;  %v937_v38 = vpop.f32.mrb[6].mxu0 }
 0x1b5   : > { %v938_v39 = vpop.f32.mrb[7].mxu0 }
 0x1b6   : > { %v1253_v41 = vpack.c.bf16 %v936_v37, %v934_v35 }
 0x1b8   : > { %1047 = vst [vmem:[%s1695_s21 + $0x10] sm:$0xff] %v1253_v41 }
 0x227   : > { %v969_v42 = vpop.xlane.xlu1 %968  ;;  %v944_v40 = vpop.xlane.xlu0 %943 }
 0x228   : > { %v970_v44 = vmul.f32 0.00390625, %v969_v42  ;;  %v946_v45 = vmul.f32 0.00390625, %v944_v40 }
 0x22a   : > { %v971_v46 = vadd.f32 1e-06, %v970_v44  ;;  %v947_v47 = vadd.f32 1e-06, %v946_v45 }
 0x22c   : > { %1372 = vrsqrt.f32 %v971_v46 }
 0x22d   : > { %1374 = vrsqrt.f32 %v947_v47 }
 0x236   : > { %v1373_v49 = vpop.eup %1372 }
 0x237   : > { %v1375_v52 = vpop.eup %1374  ;;  %v973_v58 = vmul.f32 %v1373_v49, %v893_v15  ;;  %v974_v61 = vmul.f32 %v1373_v49, %v895_v19 }
 0x238   : > { %v950_v54 = vmul.f32 %v1375_v52, %v854_v18  ;;  %v949_v55 = vmul.f32 %v1375_v52, %v852_v14 }
 0x239   : > { %v987_v60 = vmul.f32 %v980_v59, %v973_v58  ;;  %v988_v63 = vmul.f32 %v984_v62, %v974_v61 }
 0x23a   : > { %v964_v56 = vmul.f32 %v960_v50, %v950_v54  ;;  %v963_v57 = vmul.f32 %v956_v51, %v949_v55 }
 0x23b   : > { %v1007_v15 = vmul.f32 %v989_v1, %v987_v60  ;;  %v1008_v16 = vmul.f32 %v990_v43, %v988_v63 }
 0x23c   : > { %1000 = vrot.lane.b32.xlu0 %v964_v56, %s1417_s25  ;;  %996 = vrot.lane.b32.xlu1 %v963_v57, %s1417_s25  ;;  %v994_v5 = vmul.f32 %v990_v43, %v964_v56  ;;  %v993_v7 = vmul.f32 %v989_v1, %v963_v57 }
 0x240   : > { %1010 = vrot.lane.b32.xlu1 %v987_v60, %s1417_s25 }
 0x244   : > { %1014 = vrot.lane.b32.xlu1 %v988_v63, %s1417_s25 }
 0x2ae   : > { %v1001_v3 = vpop.permute.xlu0 %1000  ;;  %v997_v4 = vpop.permute.xlu1 %996 }
 0x2af   : > { %v1004_v6 = vmul.f32 %v1001_v3, %v992_v0  ;;  %v1003_v8 = vmul.f32 %v997_v4, %v991_v2 }
 0x2b1   : > { %v1006_v9 = vadd.f32 %v1004_v6, %v994_v5  ;;  %v1005_v10 = vadd.f32 %v1003_v8, %v993_v7 }
 0x2b2   : > { %v1011_v11 = vpop.permute.xlu1 %1010 }
 0x2b3   : > { %v1251_v12 = vpack.c.bf16 %v1006_v9, %v1005_v10  ;;  %v1017_v13 = vmul.f32 %v1011_v11, %v991_v2 }
 0x2b5   : > { %1045 = vst [vmem:[%s1695_s21] sm:$0xff] %v1251_v12  ;;  %v1019_v18 = vadd.f32 %v1017_v13, %v1007_v15 }
 0x2b6   : > { %v1015_v14 = vpop.permute.xlu1 %1014 }
 0x2b7   : > { %v1018_v17 = vmul.f32 %v1015_v14, %v992_v0 }
 0x2b9   : > { %v1020_v19 = vadd.f32 %v1018_v17, %v1008_v16 }
 0x2bb   : > { %v1252_v20 = vpack.c.bf16 %v1020_v19, %v1019_v18 }
 0x2bd   : > { %1046 = vst [vmem:[%s1695_s21 + $0x8] sm:$0xff] %v1252_v20 }
 0x2be PF: > { %s20_s17 = sadd.s32 1, %s1414_s17   ;;  %s1743_s13 = smov %s1406_s15 }
 0x2bf   : > { %p17_p7 = scmp.ge.s32.totalorder %s20_s17, 6   ;;  %s1744_s14 = smov %s1410_s16 }
 0x2c0   : > { %s1745_s15 = smov %s1748_s18  ;;  %s1746_s16 = smov %s1752_s19 }
 0x2c1   :  { %19 = sbr.rel (!%p17_p7) target bundleno = 3 (0x3), region = 102 }

// kernel: block_forward_pallas.9
= control target key start
LH: loop header
LB: loop body
LE: loop exit
PB: predicated region body
PF: predicated region fallthrough
CT: control target
= control target key end

     0   :  { %s1433_s13 = smov 0   ;;  %s1435_s14 = smov 0   ;;  %s1675_s0 = inlined_call_operand.vmem [shape: f32[2,8,128], index: 0, kind: input, shape index: {}]   ;;  %s1676_s1 = inlined_call_operand.vmem [shape: f32[1,128], index: 1, kind: input, shape index: {}]   ;;  %s1677_s2 = inlined_call_operand.vmem [shape: f32[2,1,128], index: 2, kind: input, shape index: {}]   ;;  %s1678_s3 = inlined_call_operand.vmem [shape: f32[2,1,128], index: 3, kind: input, shape index: {}]   ;;  %s1679_s4 = inlined_call_operand.vmem [shape: bf16[128,768], index: 4, kind: input, shape index: {}]   ;;  %s1680_s5 = inlined_call_operand.vmem [shape: f32[1,768], index: 5, kind: input, shape index: {}]   ;;  %s1681_s6 = inlined_call_operand.vmem [shape: f32[1,256], index: 6, kind: input, shape index: {}]   ;;  %s1682_s7 = inlined_call_operand.vmem [shape: f32[1,256], index: 7, kind: input, shape index: {}]   ;;  %s1683_s8 = inlined_call_operand.vmem [shape: f32[8,256], index: 8, kind: input, shape index: {}]   ;;  %s1684_s9 = inlined_call_operand.vmem [shape: f32[8,256], index: 9, kind: input, shape index: {}]   ;;  %s1685_s10 = inlined_call_operand.vmem [shape: bf16[2,8,768], index: 10, kind: output, shape index: {}]  }
   0x1   :  { %s1437_s15 = smov 0  }
   0x2 LB: > { %s32_s16 = sadd.s32 1, %s1370_s14  ;;  %p1186_p0 = scmp.ge.s32.totalorder %s1374_s15, 1  ;;  %s1374_s15 = sphi %s1437_s15, %s20_s15   ;;  %s1370_s14 = sphi %s1435_s14, %s1687_s14   ;;  %s1366_s13 = sphi %s1433_s13, %s1686_s13  }
   0x3   : > { %p34_p1 = scmp.ge.s32.totalorder %s32_s16, 2  ;;  %p366_p2 = scmp.lt.s32.totalorder %s1374_s15, 3 }
   0x5   : > { %s1689_s16 = smov (%p34_p1, %s32_s16), 0  ;;  %p367_p3 = pnand %p1186_p0, %p366_p2 }
   0x6   : > { %p426_p4 = scmp.lt.s32.totalorder (!%p367_p3), %s1366_s13, 1  ;;  %v1274_v0 = vld [vmem:[%s1679_s4 + $0x4] ss:$24 sps:$4 sm:$0xff] (!%p367_p3)   ;;  %v1276_v1 = vld [vmem:[%s1679_s4] ss:$24 sps:$4 sm:$0xff] (!%p367_p3)   ;;  %v1376_v28 = vmov (!%p367_p3), 0   ;;  %v479_v39 = vlaneseq (!%p367_p3) }
   0x7   : > { %370 = sbr.rel (%p367_p3) target bundleno = 698 (0x2ba), region = 60  ;;  %814 = vmatprep.subr.bf16.mxu0 (!%p367_p3), %v1274_v0  ;;  %v1277_v2 = vld [vmem:[%s1679_s4 + $0xc] ss:$24 sps:$4 sm:$0xff] (!%p367_p3)   ;;  %v1279_v3 = vld [vmem:[%s1679_s4 + $0x8] ss:$24 sps:$4 sm:$0xff] (!%p367_p3)   ;;  %846 = vmatprep.mubr.bf16.mxu0 (!%p367_p3), %v1376_v28  ;;  %s1377_s22 = smov (!%p367_p3), 64  }
   0x8   : > { %815 = vmatpush1.bf16.msra.mxu0 (!%p367_p3), %v1276_v1  ;;  %v1280_v4 = vld [vmem:[%s1679_s4 + $0x34] ss:$24 sps:$4 sm:$0xff] (!%p367_p3)   ;;  %v1282_v5 = vld [vmem:[%s1679_s4 + $0x30] ss:$24 sps:$4 sm:$0xff] (!%p367_p3)   ;;  %855 = vmatprep.subr.bf16.mxu1 (!%p367_p3), %v1277_v2  ;;  %v1286_v10 = vld [vmem:[%s1679_s4 + $0x64] ss:$24 sps:$4 sm:$0xff] (!%p367_p3)  }
   0x9   : > { %v1283_v6 = vld [vmem:[%s1679_s4 + $0x3c] ss:$24 sps:$4 sm:$0xff] (!%p367_p3)   ;;  %856 = vmatpush1.bf16.msra.mxu1 (!%p367_p3), %v1279_v3  ;;  %816 = vmatprep.subr.bf16.mxu0 (!%p367_p3), %v1280_v4  ;;  %v1285_v7 = vld [vmem:[%s1679_s4 + $0x38] ss:$24 sps:$4 sm:$0xff] (!%p367_p3)   ;;  %v1289_v12 = vld [vmem:[%s1679_s4 + $0x6c] ss:$24 sps:$4 sm:$0xff] (!%p367_p3)  }
   0xa   : > { %857 = vmatprep.subr.bf16.mxu1 (!%p367_p3), %v1283_v6  ;;  %v1288_v11 = vld [vmem:[%s1679_s4 + $0x60] ss:$24 sps:$4 sm:$0xff] (!%p367_p3)   ;;  %v1292_v14 = vld [vmem:[%s1679_s4 + $0x94] ss:$24 sps:$4 sm:$0xff] (!%p367_p3)   ;;  %v1294_v15 = vld [vmem:[%s1679_s4 + $0x90] ss:$24 sps:$4 sm:$0xff] (!%p367_p3)   ;;  %887 = vmatprep.mubr.bf16.mxu1 (!%p367_p3), %v1376_v28 }
   0xb   : > { %v1291_v13 = vld [vmem:[%s1679_s4 + $0x68] ss:$24 sps:$4 sm:$0xff] (!%p367_p3)   ;;  %v1295_v16 = vld [vmem:[%s1679_s4 + $0x9c] ss:$24 sps:$4 sm:$0xff] (!%p367_p3)   ;;  %v1297_v17 = vld [vmem:[%s1679_s4 + $0x98] ss:$24 sps:$4 sm:$0xff] (!%p367_p3)  }
   0xc   : > { %817 = vmatpush1.bf16.msra.mxu0 (!%p367_p3), %v1282_v5  ;;  %v1298_v18 = vld [vmem:[%s1679_s4 + $0xc4] ss:$24 sps:$4 sm:$0xff] (!%p367_p3)   ;;  %v1300_v19 = vld [vmem:[%s1679_s4 + $0xc0] ss:$24 sps:$4 sm:$0xff] (!%p367_p3)   ;;  %v1304_v22 = vld [vmem:[%s1679_s4 + $0xf4] ss:$24 sps:$4 sm:$0xff] (!%p367_p3)  }
   0xd   : > { %858 = vmatpush1.bf16.msra.mxu1 (!%p367_p3), %v1285_v7  ;;  %818 = vmatprep.subr.bf16.mxu0 (!%p367_p3), %v1286_v10  ;;  %v1301_v20 = vld [vmem:[%s1679_s4 + $0xcc] ss:$24 sps:$4 sm:$0xff] (!%p367_p3)   ;;  %v1303_v21 = vld [vmem:[%s1679_s4 + $0xc8] ss:$24 sps:$4 sm:$0xff] (!%p367_p3)   ;;  %v1307_v23 = vld [vmem:[%s1679_s4 + $0xfc] ss:$24 sps:$4 sm:$0xff] (!%p367_p3)  }
   0xe   : > { %s1691_s13 = smov (!%p426_p4, %s1366_s13), 1  ;;  %859 = vmatprep.subr.bf16.mxu1 %v1289_v12  ;;  %v1306_v24 = vld [vmem:[%s1679_s4 + $0xf0] ss:$24 sps:$4 sm:$0xff]   ;;  %v1310_v26 = vld [vmem:[%s1679_s4 + $0x124] ss:$24 sps:$4 sm:$0xff]   ;;  %v1564_v40 = vshrl.u32 %v479_v39, 7 }
   0xf   : > { %s1187_s29 = sshll.u32 %s1691_s13, 3  ;;  %v1309_v25 = vld [vmem:[%s1679_s4 + $0xf8] ss:$24 sps:$4 sm:$0xff]   ;;  %v1313_v27 = vld [vmem:[%s1679_s4 + $0x12c] ss:$24 sps:$4 sm:$0xff]   ;;  %s435_s25 = scalar_lea.vmem %s1677_s2, %s1691_s13 }
  0x10   : > { %s432_s18 = scalar_lea.vmem %s1675_s0, %s1187_s29  ;;  %819 = vmatpush1.bf16.msra.mxu0 %v1288_v11  ;;  %v1312_v29 = vld [vmem:[%s1679_s4 + $0x120] ss:$24 sps:$4 sm:$0xff]   ;;  %v1316_v31 = vld [vmem:[%s1679_s4 + $0x154] ss:$24 sps:$4 sm:$0xff]   ;;  %v1318_v33 = vld [vmem:[%s1679_s4 + $0x150] ss:$24 sps:$4 sm:$0xff]   ;;  %s438_s30 = scalar_lea.vmem %s1678_s3, %s1691_s13 }
  0x11   : > { %v1481_v8 = vld [vmem:[%s432_s18] sm:$0xff]  ;;  %860 = vmatpush1.bf16.msra.mxu1 %v1291_v13  ;;  %820 = vmatprep.subr.bf16.mxu0 %v1292_v14  ;;  %v1319_v32 = vld [vmem:[%s1679_s4 + $0x15c] ss:$24 sps:$4 sm:$0xff]   ;;  %v1321_v34 = vld [vmem:[%s1679_s4 + $0x158] ss:$24 sps:$4 sm:$0xff]   ;;  %v1567_v43 = vsub.s32 0, %v1564_v40 }
  0x12   : > { %v460_v9 = vmul.f32 %v1481_v8, %v1481_v8  ;;  %861 = vmatprep.subr.bf16.mxu1 %v1295_v16  ;;  %v1315_v30 = vld [vmem:[%s1679_s4 + $0x128] ss:$24 sps:$4 sm:$0xff]   ;;  %v1324_v35 = vld [vmem:[%s1679_s4 + $0x14] ss:$24 sps:$4 sm:$0xff]   ;;  %v1327_v54 = vld [vmem:[%s1679_s4 + $0x44] ss:$24 sps:$4 sm:$0xff]  }
  0x13   : > { %v476_v41 = vld [vmem:[%s435_s25] sm:$0x1]  ;;  %v1322_v52 = vld [vmem:[%s1679_s4 + $0x10] ss:$24 sps:$4 sm:$0xff]   ;;  %v1330_v56 = vld [vmem:[%s1679_s4 + $0x74] ss:$24 sps:$4 sm:$0xff]  }
  0x14   : > { %461 = vadd.xlane.f32.xlu0 %v460_v9  ;;  %821 = vmatpush1.bf16.msra.mxu0 %v1294_v15  ;;  %v477_v42 = vadd.f32 1.0, %v476_v41  ;;  %v1189_v45 = vld [vmem:[%s1676_s1] ss:$0 sm:$0xff]  ;;  %v1328_v57 = vld [vmem:[%s1679_s4 + $0x70] ss:$24 sps:$4 sm:$0xff]   ;;  %v554_v4 = vsub.s32 2, %v1564_v40 }
  0x15   : > { %862 = vmatpush1.bf16.msra.mxu1 %v1297_v17  ;;  %822 = vmatprep.subr.bf16.mxu0 %v1298_v18  ;;  %v1190_v49 = vld [vmem:[%s438_s30] ss:$0 sm:$0xff]  ;;  %v1333_v58 = vld [vmem:[%s1679_s4 + $0xa4] ss:$24 sps:$4 sm:$0xff]   ;;  %v1336_v60 = vld [vmem:[%s1679_s4 + $0xd4] ss:$24 sps:$4 sm:$0xff]  }
  0x16   : > { %863 = vmatprep.subr.bf16.mxu1 %v1301_v20  ;;  %v482_v47 = vrot.slane %v477_v42, %v1567_v43  ;;  %v1325_v55 = vld [vmem:[%s1679_s4 + $0x40] ss:$24 sps:$4 sm:$0xff]   ;;  %v1334_v61 = vld [vmem:[%s1679_s4 + $0xd0] ss:$24 sps:$4 sm:$0xff]   ;;  %v1339_v62 = vld [vmem:[%s1679_s4 + $0x104] ss:$24 sps:$4 sm:$0xff]  }
  0x17   : > { %v1331_v59 = vld [vmem:[%s1679_s4 + $0xa0] ss:$24 sps:$4 sm:$0xff]   ;;  %v1342_v0 = vld [vmem:[%s1679_s4 + $0x134] ss:$24 sps:$4 sm:$0xff]   ;;  %v1340_v1 = vld [vmem:[%s1679_s4 + $0x130] ss:$24 sps:$4 sm:$0xff]  }
  0x18   : > { %823 = vmatpush1.bf16.msra.mxu0 %v1300_v19  ;;  %v1337_v63 = vld [vmem:[%s1679_s4 + $0x100] ss:$24 sps:$4 sm:$0xff]   ;;  %v1345_v2 = vld [vmem:[%s1679_s4 + $0x164] ss:$24 sps:$4 sm:$0xff]   ;;  %v1628_v6 = vsub.s32 1, %v1564_v40  ;;  %v558_v7 = vsub.s32 3, %v1564_v40 }
  0x19   : > { %864 = vmatpush1.bf16.msra.mxu1 %v1303_v21  ;;  %824 = vmatprep.subr.bf16.mxu0 %v1304_v22  ;;  %v1343_v3 = vld [vmem:[%s1679_s4 + $0x160] ss:$24 sps:$4 sm:$0xff]   ;;  %s1247_s11 = smul.u32 24, %s1691_s13 }
  0x1a   : > { %865 = vmatprep.subr.bf16.mxu1 %v1307_v23  ;;  %v542_v5 = vld [vmem:[%s1680_s5] sm:$0x3f] }
  0x1b   : > { %v555_v9 = vrot.slane %v542_v5, %v554_v4  ;;  %v551_v10 = vrot.slane %v542_v5, %v1628_v6  ;;  %v559_v11 = vrot.slane %v542_v5, %v558_v7  ;;  %s1639_s18 = scalar_lea.vmem %s1685_s10, %s1247_s11 }
  0x1c   : > { %825 = vmatpush1.bf16.msra.mxu0 %v1306_v24 }
  0x1d   : > { %866 = vmatpush1.bf16.msra.mxu1 %v1309_v25  ;;  %826 = vmatprep.subr.bf16.mxu0 %v1310_v26 }
  0x1e   : > { %867 = vmatprep.subr.bf16.mxu1 %v1313_v27 }
  0x20   : > { %827 = vmatpush1.bf16.msra.mxu0 %v1312_v29 }
  0x21   : > { %868 = vmatpush1.bf16.msra.mxu1 %v1315_v30  ;;  %828 = vmatprep.subr.bf16.mxu0 %v1316_v31  ;;  %v562_v30 = vsub.s32 4, %v1564_v40  ;;  %v566_v31 = vsub.s32 5, %v1564_v40 }
  0x22   : > { %869 = vmatprep.subr.bf16.mxu1 %v1319_v32 }
  0x23   : > { %v563_v32 = vrot.slane %v542_v5, %v562_v30 }
  0x24   : > { %829 = vmatpush1.bf16.msra.mxu0 %v1318_v33  ;;  %v567_v33 = vrot.slane %v542_v5, %v566_v31 }
  0x25   : > { %870 = vmatpush1.bf16.msra.mxu1 %v1321_v34  ;;  %896 = vmatprep.subr.bf16.mxu0 %v1324_v35 }
  0xa1   : > { %v462_v36 = vpop.xlane.xlu0 %461 }
  0xa2   : > { %v464_v37 = vmul.f32 0.0078125, %v462_v36 }
  0xa4   : > { %v465_v38 = vadd.f32 1e-06, %v464_v37 }
  0xa6   : > { %1346 = vrsqrt.f32 %v465_v38 }
  0xb0   : > { %v1347_v44 = vpop.eup %1346 }
  0xb1   : > { %v467_v46 = vmul.f32 %v1347_v44, %v1481_v8  ;;  %v547_v8 = vrot.slane %v542_v5, %v1567_v43 }
  0xb3   : > { %v475_v48 = vmul.f32 %v1189_v45, %v467_v46 }
  0xb5   : > { %v484_v50 = vmul.f32 %v482_v47, %v475_v48  ;;  %v948_v48 = vld [vmem:[%s1681_s6] sm:$0x3] }
  0xb7   : > { %v492_v51 = vadd.f32 %v1190_v49, %v484_v50  ;;  %v957_v50 = vrot.slane %v948_v48, %v1628_v6 }
  0xb9   : > { %v493_v53 = vpack.c.bf16 %v492_v51, %v492_v51  ;;  %v953_v51 = vrot.slane %v948_v48, %v1567_v43 }
  0xbb   : > { %847 = vmatmul.mubr.bf16.vlgmr.msra.gmra.mrb[0].mxu0 %v493_v53  ;;  %888 = vmatmul.mubr.bf16.vlgmr.msra.gmra.mrb[0].mxu1 %v493_v53 }
  0xbc   : > { %897 = vmatpush1.bf16.msra.mxu0 %v1322_v52  ;;  %928 = vmatprep.mubr.bf16.mxu0 %v1376_v28 }
  0xbd   : > { %898 = vmatprep.subr.bf16.mxu0 %v1327_v54 }
  0xc0   : > { %899 = vmatpush1.bf16.msra.mxu0 %v1325_v55 }
  0xc1   : > { %900 = vmatprep.subr.bf16.mxu0 %v1330_v56 }
  0xc4   : > { %901 = vmatpush1.bf16.msra.mxu0 %v1328_v57 }
  0xc5   : > { %902 = vmatprep.subr.bf16.mxu0 %v1333_v58 }
  0xc8   : > { %903 = vmatpush1.bf16.msra.mxu0 %v1331_v59 }
  0xc9   : > { %904 = vmatprep.subr.bf16.mxu0 %v1336_v60 }
  0xcc   : > { %905 = vmatpush1.bf16.msra.mxu0 %v1334_v61 }
  0xcd   : > { %906 = vmatprep.subr.bf16.mxu0 %v1339_v62 }
  0xd0   : > { %907 = vmatpush1.bf16.msra.mxu0 %v1337_v63 }
  0xd1   : > { %908 = vmatprep.subr.bf16.mxu0 %v1342_v0  ;;  %v987_v0 = vld [vmem:[%s1683_s8 + $0x8] sm:$0xff] }
  0xd4   : > { %909 = vmatpush1.bf16.msra.mxu0 %v1340_v1  ;;  %v989_v1 = vld [vmem:[%s1684_s9 + $0x8] sm:$0xff] }
  0xd5   : > { %910 = vmatprep.subr.bf16.mxu0 %v1345_v2  ;;  %v988_v2 = vld [vmem:[%s1684_s9] sm:$0xff] }
  0xd8   : > { %911 = vmatpush1.bf16.msra.mxu0 %v1343_v3 }
  0xdb   : > { %929 = vmatmul.mubr.bf16.vlgmr.msra.gmra.mrb[4].mxu0 %v493_v53  ;;  %v972_v53 = vld [vmem:[%s1682_s7] sm:$0x3] }
  0xdc   : > { %v977_v59 = vrot.slane %v972_v53, %v1567_v43  ;;  %v981_v62 = vrot.slane %v972_v53, %v1628_v6  ;;  %v986_v43 = vld [vmem:[%s1683_s8] sm:$0xff] }
 0x18e   : > { %v848_v12 = vpop.f32.mrb[0].mxu0  ;;  %v889_v13 = vpop.f32.mrb[0].mxu1 }
 0x18f   : > { %v849_v14 = vadd.f32 %v848_v12, %v547_v8  ;;  %v890_v15 = vadd.f32 %v889_v13, %v555_v9  ;;  %v850_v16 = vpop.f32.mrb[1].mxu0  ;;  %v891_v17 = vpop.f32.mrb[1].mxu1 }
 0x190   : > { %v851_v18 = vadd.f32 %v850_v16, %v551_v10  ;;  %v892_v19 = vadd.f32 %v891_v17, %v559_v11  ;;  %v852_v20 = vpop.f32.mrb[2].mxu0  ;;  %v893_v21 = vpop.f32.mrb[2].mxu1 }
 0x191   : > { %v937_v22 = vmul.f32 %v849_v14, %v849_v14  ;;  %v853_v23 = vpop.f32.mrb[3].mxu0  ;;  %v894_v24 = vpop.f32.mrb[3].mxu1  ;;  %v962_v25 = vmul.f32 %v890_v15, %v890_v15 }
 0x192   : > { %v938_v26 = vmul.f32 %v851_v18, %v851_v18  ;;  %v963_v27 = vmul.f32 %v892_v19, %v892_v19 }
 0x194   : > { %v964_v28 = vadd.f32 %v963_v27, %v962_v25  ;;  %v939_v29 = vadd.f32 %v938_v26, %v937_v22 }
 0x196   : > { %965 = vadd.xlane.f32.xlu1 %v964_v28  ;;  %940 = vadd.xlane.f32.xlu0 %v939_v29 }
 0x1ae   : > { %v930_v34 = vpop.f32.mrb[4].mxu0 }
 0x1af   : > { %v931_v35 = vadd.f32 %v930_v34, %v563_v32  ;;  %v932_v36 = vpop.f32.mrb[5].mxu0 }
 0x1b0   : > { %v933_v37 = vadd.f32 %v932_v36, %v567_v33  ;;  %v934_v38 = vpop.f32.mrb[6].mxu0 }
 0x1b1   : > { %v935_v39 = vpop.f32.mrb[7].mxu0 }
 0x1b2   : > { %v1246_v41 = vpack.c.bf16 %v933_v37, %v931_v35 }
 0x1b4   : > { %1044 = vst [vmem:[%s1639_s18 + $0x10] sm:$0xff] %v1246_v41 }
 0x223   : > { %v966_v42 = vpop.xlane.xlu1 %965  ;;  %v941_v44 = vpop.xlane.xlu0 %940 }
 0x224   : > { %v967_v40 = vmul.f32 0.00390625, %v966_v42  ;;  %v943_v45 = vmul.f32 0.00390625, %v941_v44 }
 0x226   : > { %v968_v46 = vadd.f32 1e-06, %v967_v40  ;;  %v944_v47 = vadd.f32 1e-06, %v943_v45 }
 0x228   : > { %1348 = vrsqrt.f32 %v968_v46 }
 0x229   : > { %1350 = vrsqrt.f32 %v944_v47 }
 0x232   : > { %v1349_v49 = vpop.eup %1348 }
 0x233   : > { %v1351_v52 = vpop.eup %1350  ;;  %v970_v58 = vmul.f32 %v1349_v49, %v890_v15  ;;  %v971_v61 = vmul.f32 %v1349_v49, %v892_v19 }
 0x234   : > { %v947_v54 = vmul.f32 %v1351_v52, %v851_v18  ;;  %v946_v55 = vmul.f32 %v1351_v52, %v849_v14 }
 0x235   : > { %v984_v60 = vmul.f32 %v977_v59, %v970_v58  ;;  %v985_v63 = vmul.f32 %v981_v62, %v971_v61 }
 0x236   : > { %v961_v56 = vmul.f32 %v957_v50, %v947_v54  ;;  %v960_v57 = vmul.f32 %v953_v51, %v946_v55 }
 0x237   : > { %v1004_v15 = vmul.f32 %v986_v43, %v984_v60  ;;  %v1005_v16 = vmul.f32 %v987_v0, %v985_v63 }
 0x238   : > { %997 = vrot.lane.b32.xlu0 %v961_v56, %s1377_s22  ;;  %993 = vrot.lane.b32.xlu1 %v960_v57, %s1377_s22  ;;  %v991_v5 = vmul.f32 %v987_v0, %v961_v56  ;;  %v990_v7 = vmul.f32 %v986_v43, %v960_v57 }
 0x23c   : > { %1007 = vrot.lane.b32.xlu1 %v984_v60, %s1377_s22 }
 0x240   : > { %1011 = vrot.lane.b32.xlu1 %v985_v63, %s1377_s22 }
 0x2aa   : > { %v998_v3 = vpop.permute.xlu0 %997  ;;  %v994_v4 = vpop.permute.xlu1 %993 }
 0x2ab   : > { %v1001_v6 = vmul.f32 %v998_v3, %v989_v1  ;;  %v1000_v8 = vmul.f32 %v994_v4, %v988_v2 }
 0x2ad   : > { %v1003_v9 = vadd.f32 %v1001_v6, %v991_v5  ;;  %v1002_v10 = vadd.f32 %v1000_v8, %v990_v7 }
 0x2ae   : > { %v1008_v11 = vpop.permute.xlu1 %1007 }
 0x2af   : > { %v1244_v12 = vpack.c.bf16 %v1003_v9, %v1002_v10  ;;  %v1014_v13 = vmul.f32 %v1008_v11, %v988_v2 }
 0x2b1   : > { %1042 = vst [vmem:[%s1639_s18] sm:$0xff] %v1244_v12  ;;  %v1016_v18 = vadd.f32 %v1014_v13, %v1004_v15 }
 0x2b2   : > { %v1012_v14 = vpop.permute.xlu1 %1011 }
 0x2b3   : > { %v1015_v17 = vmul.f32 %v1012_v14, %v989_v1 }
 0x2b5   : > { %v1017_v19 = vadd.f32 %v1015_v17, %v1005_v16 }
 0x2b7   : > { %v1245_v20 = vpack.c.bf16 %v1017_v19, %v1016_v18 }
 0x2b9   : > { %1043 = vst [vmem:[%s1639_s18 + $0x8] sm:$0xff] %v1245_v20 }
 0x2ba PF: > { %s20_s15 = sadd.s32 1, %s1374_s15   ;;  %s1686_s13 = smov %s1370_s14 }
 0x2bb   : > { %p17_p5 = scmp.ge.s32.totalorder %s20_s15, 4   ;;  %s1687_s14 = smov %s1689_s16 }
 0x2bd   :  { %19 = sbr.rel (!%p17_p5) target bundleno = 2 (0x2), region = 102 }

// kernel: block_forward_pallas.13
= control target key start
LH: loop header
LB: loop body
LE: loop exit
PB: predicated region body
PF: predicated region fallthrough
CT: control target
= control target key end

     0   :  { %s747_s18 = smov 0   ;;  %s749_s19 = smov 0   ;;  %s842_s0 = inlined_call_operand.vmem [shape: bf16[2,24,256], index: 0, kind: input, shape index: {}]   ;;  %s843_s1 = inlined_call_operand.vmem [shape: bf16[256,128], index: 1, kind: input, shape index: {}]   ;;  %s844_s2 = inlined_call_operand.vmem [shape: f32[1,128], index: 2, kind: input, shape index: {}]   ;;  %s845_s3 = inlined_call_operand.vmem [shape: f32[2,8,128], index: 3, kind: input, shape index: {}]   ;;  %s846_s4 = inlined_call_operand.vmem [shape: f32[2,1,128], index: 4, kind: input, shape index: {}]   ;;  %s847_s5 = inlined_call_operand.vmem [shape: f32[2,8,128], index: 5, kind: output, shape index: {}]  }
   0x1   :  { %s751_s20 = smov 0  }
   0x2 LB: > { %s27_s21 = sadd.s32 1, %s711_s19  ;;  %p602_p0 = scmp.ge.s32.totalorder %s715_s20, 1  ;;  %s715_s20 = sphi %s751_s20, %s15_s20   ;;  %s711_s19 = sphi %s749_s19, %s849_s19   ;;  %s707_s18 = sphi %s747_s18, %s848_s18  }
   0x3   : > { %p29_p1 = scmp.ge.s32.totalorder %s27_s21, 2  ;;  %p229_p2 = scmp.lt.s32.totalorder %s715_s20, 3 }
   0x5   : > { %s851_s21 = smov (%p29_p1, %s27_s21), 0  ;;  %p230_p3 = pnand %p602_p0, %p229_p2 }
   0x6   : > { %v675_v0 = vld [vmem:[%s843_s1 + $0x40] sm:$0xff] (!%p230_p3)   ;;  %p273_p4 = scmp.lt.s32.totalorder (!%p230_p3), %s707_s18, 1  ;;  %v677_v2 = vld [vmem:[%s843_s1 + $0x48] sm:$0xff] (!%p230_p3)   ;;  %v679_v4 = vld [vmem:[%s843_s1 + $0x50] sm:$0xff] (!%p230_p3)  }
   0x7   : > { %233 = sbr.rel (%p230_p3) target bundleno = 261 (0x105), region = 40  ;;  %v676_v1 = vld [vmem:[%s843_s1] sm:$0xff] (!%p230_p3)   ;;  %628 = vmatprep.subr.bf16.mxu0 (!%p230_p3), %v675_v0  ;;  %v678_v3 = vld [vmem:[%s843_s1 + $0x8] sm:$0xff] (!%p230_p3)   ;;  %v680_v5 = vld [vmem:[%s843_s1 + $0x10] sm:$0xff] (!%p230_p3)  }
   0x8   : > { %629 = vmatpush3.bf16.msra.mxu0 (!%p230_p3), %v676_v1  ;;  %v681_v6 = vld [vmem:[%s843_s1 + $0x58] sm:$0xff] (!%p230_p3)   ;;  %v683_v8 = vld [vmem:[%s843_s1 + $0x60] sm:$0xff] (!%p230_p3)   ;;  %v685_v10 = vld [vmem:[%s843_s1 + $0x68] sm:$0xff] (!%p230_p3)  }
   0x9   : > { %630 = vmatprep.subr.bf16.mxu0 (!%p230_p3), %v677_v2  ;;  %v682_v7 = vld [vmem:[%s843_s1 + $0x18] sm:$0xff] (!%p230_p3)   ;;  %v684_v9 = vld [vmem:[%s843_s1 + $0x20] sm:$0xff] (!%p230_p3)   ;;  %v686_v13 = vld [vmem:[%s843_s1 + $0x28] sm:$0xff] (!%p230_p3)  }
   0xa   : > { %v687_v14 = vld [vmem:[%s843_s1 + $0x70] sm:$0xff] (!%p230_p3)   ;;  %v689_v16 = vld [vmem:[%s843_s1 + $0x78] sm:$0xff] (!%p230_p3)   ;;  %v606_v20 = vld [vmem:[%s844_s2] ss:$0 sm:$0xff] (!%p230_p3) }
   0xb   : > { %v688_v15 = vld [vmem:[%s843_s1 + $0x30] sm:$0xff] (!%p230_p3)   ;;  %v690_v17 = vld [vmem:[%s843_s1 + $0x38] sm:$0xff] (!%p230_p3)  }
   0xc   : > { %631 = vmatpush3.bf16.msra.mxu0 (!%p230_p3), %v678_v3 }
   0xd   : > { %632 = vmatprep.subr.bf16.mxu0 (!%p230_p3), %v679_v4 }
   0xe   : > { %s853_s18 = smov (!%p273_p4, %s707_s18), 1 }
   0xf   : > { %s650_s11 = smul.u32 24, %s853_s18  ;;  %s604_s12 = sshll.u32 %s853_s18, 3 }
  0x10   : > { %633 = vmatpush3.bf16.msra.mxu0 %v680_v5  ;;  %s291_s15 = scalar_lea.vmem %s846_s4, %s853_s18  ;;  %s288_s24 = scalar_lea.vmem %s845_s3, %s604_s12 }
  0x11   : > { %634 = vmatprep.subr.bf16.mxu0 %v681_v6  ;;  %s281_s22 = scalar_lea.vmem %s842_s0, %s650_s11  ;;  %v625_v24 = vld [vmem:[%s291_s15] ss:$0 sm:$0xff]  ;;  %s298_s18 = scalar_lea.vmem %s847_s5, %s604_s12 }
  0x12   : > { %v300_v11 = vld [vmem:[%s281_s22] sm:$0xff] }
  0x13   : > { %v608_v12 = vcombine.high %v300_v11, %v300_v11  ;;  %v607_v18 = vcombine.low %v300_v11, %v300_v11  ;;  %v483_v27 = vld [vmem:[%s288_s24] sm:$0xff] }
  0x14   : > { %635 = vmatpush3.bf16.msra.mxu0 %v682_v7 }
  0x15   : > { %636 = vmatprep.subr.bf16.mxu0 %v683_v8  ;;  %475 = vmatprep.mubr.bf16.mxu0 %v608_v12 }
  0x18   : > { %637 = vmatpush3.bf16.msra.mxu0 %v684_v9 }
  0x19   : > { %638 = vmatprep.subr.bf16.mxu0 %v685_v10 }
  0x1c   : > { %639 = vmatpush3.bf16.msra.mxu0 %v686_v13 }
  0x1d   : > { %640 = vmatprep.subr.bf16.mxu0 %v687_v14 }
  0x20   : > { %641 = vmatpush3.bf16.msra.mxu0 %v688_v15 }
  0x21   : > { %642 = vmatprep.subr.bf16.mxu0 %v689_v16 }
  0x24   : > { %643 = vmatpush3.bf16.msra.mxu0 %v690_v17 }
  0x27   : > { %476 = vmatmul.mubr.bf16.vlgmr.msra.gmra.mrb[0].mxu0 %v607_v18 }
  0xfa   : > { %v644_v19 = vpop.f32.mrb[0].mxu0 }
  0xfb   : > { %v645_v21 = vpop.f32.mrb[1].mxu0 }
  0xfc   : > { %v646_v22 = vadd.f32 %v645_v21, %v644_v19  ;;  %v647_v23 = vpop.f32.mrb[2].mxu0 }
  0xfd   : > { %v648_v25 = vpop.f32.mrb[3].mxu0 }
  0xfe   : > { %v478_v26 = vadd.f32 %v646_v22, %v606_v20 }
 0x100   : > { %v491_v28 = vmul.f32 %v625_v24, %v478_v26 }
 0x102   : > { %v492_v29 = vadd.f32 %v491_v28, %v483_v27 }
 0x104   : > { %493 = vst [vmem:[%s298_s18] sm:$0xff] %v492_v29 }
 0x105 PF: > { %s15_s20 = sadd.s32 1, %s715_s20   ;;  %s848_s18 = smov %s711_s19 }
 0x106   : > { %p12_p5 = scmp.ge.s32.totalorder %s15_s20, 4   ;;  %s849_s19 = smov %s851_s21 }
 0x108   :  { %14 = sbr.rel (!%p12_p5) target bundleno = 2 (0x2), region = 76 }

// kernel: block_forward_pallas.12
= control target key start
LH: loop header
LB: loop body
LE: loop exit
PB: predicated region body
PF: predicated region fallthrough
CT: control target
= control target key end

     0   :  { %s806_s18 = smov 0   ;;  %s808_s19 = smov 0   ;;  %s924_s0 = inlined_call_operand.vmem [shape: bf16[2,24,256], index: 0, kind: input, shape index: {}]   ;;  %s925_s1 = inlined_call_operand.vmem [shape: bf16[256,128], index: 1, kind: input, shape index: {}]   ;;  %s926_s2 = inlined_call_operand.vmem [shape: f32[1,128], index: 2, kind: input, shape index: {}]   ;;  %s927_s3 = inlined_call_operand.vmem [shape: f32[2,16,128], index: 3, kind: input, shape index: {}]   ;;  %s928_s4 = inlined_call_operand.vmem [shape: f32[2,1,128], index: 4, kind: input, shape index: {}]   ;;  %s929_s5 = inlined_call_operand.vmem [shape: f32[2,16,128], index: 5, kind: output, shape index: {}]  }
   0x1   :  { %s810_s20 = smov 0   ;;  %s812_s21 = smov 0  }
   0x2   :  { %s814_s22 = smov 0  }
   0x3 LB: > { %s24_s23 = sadd.s32 1, %s766_s20  ;;  %s27_s24 = sadd.s32 1, %s770_s21  ;;  %s774_s22 = sphi %s814_s22, %s15_s22   ;;  %s770_s21 = sphi %s812_s21, %s933_s21   ;;  %s766_s20 = sphi %s810_s20, %s932_s20   ;;  %s762_s19 = sphi %s808_s19, %s931_s19   ;;  %s758_s18 = sphi %s806_s18, %s930_s18  }
   0x4   : > { %p25_p0 = scmp.ge.s32.totalorder %s24_s23, 2  ;;  %p626_p1 = scmp.ge.s32.totalorder %s774_s22, 1 }
   0x5   : > { %p234_p2 = scmp.lt.s32.totalorder %s774_s22, 5 }
   0x6   : > { %s935_s23 = smov (%p25_p0, %s24_s23), 0  ;;  %s937_s24 = smov (!%p25_p0, %s27_s24), %s770_s21 }
   0x7   : > { %p235_p3 = pnand %p626_p1, %p234_p2  ;;  %p29_p4 = scmp.ge.s32.totalorder %s937_s24, 2 }
   0x8   : > { %v718_v0 = vld [vmem:[%s925_s1 + $0x40] sm:$0xff] (!%p235_p3)   ;;  %s281_s27 = sadd.s32 (!%p235_p3), 1, %s758_s18  ;;  %p282_p5 = scmp.lt.s32.totalorder (!%p235_p3), %s762_s19, 1  ;;  %v720_v2 = vld [vmem:[%s925_s1 + $0x48] sm:$0xff] (!%p235_p3)   ;;  %v722_v4 = vld [vmem:[%s925_s1 + $0x50] sm:$0xff] (!%p235_p3)  }
   0x9   : > { %s939_s24 = smov (%p29_p4, %s937_s24), 0  ;;  %238 = sbr.rel (%p235_p3) target bundleno = 264 (0x108), region = 40 }
   0xa   : > { %v719_v1 = vld [vmem:[%s925_s1] sm:$0xff] (!%p235_p3)   ;;  %655 = vmatprep.subr.bf16.mxu0 (!%p235_p3), %v718_v0  ;;  %p284_p6 = scmp.lt.s32.totalorder (!%p235_p3), %s281_s27, 2  ;;  %v721_v3 = vld [vmem:[%s925_s1 + $0x8] sm:$0xff] (!%p235_p3)   ;;  %v723_v5 = vld [vmem:[%s925_s1 + $0x10] sm:$0xff] (!%p235_p3)   ;;  %p294_p7 = scmp.lt.s32.totalorder (!%p235_p3), %s758_s18, 1 }
   0xb   : > { %656 = vmatpush3.bf16.msra.mxu0 (!%p235_p3), %v719_v1  ;;  %v724_v6 = vld [vmem:[%s925_s1 + $0x58] sm:$0xff] (!%p235_p3)   ;;  %v726_v8 = vld [vmem:[%s925_s1 + $0x60] sm:$0xff] (!%p235_p3)   ;;  %v728_v10 = vld [vmem:[%s925_s1 + $0x68] sm:$0xff] (!%p235_p3)  }
   0xc   : > { %657 = vmatprep.subr.bf16.mxu0 (!%p235_p3), %v720_v2  ;;  %v725_v7 = vld [vmem:[%s925_s1 + $0x18] sm:$0xff] (!%p235_p3)   ;;  %v727_v9 = vld [vmem:[%s925_s1 + $0x20] sm:$0xff] (!%p235_p3)   ;;  %v729_v13 = vld [vmem:[%s925_s1 + $0x28] sm:$0xff] (!%p235_p3)  }
   0xd   : > { %v730_v14 = vld [vmem:[%s925_s1 + $0x70] sm:$0xff] (!%p235_p3)   ;;  %v732_v16 = vld [vmem:[%s925_s1 + $0x78] sm:$0xff] (!%p235_p3)   ;;  %v633_v20 = vld [vmem:[%s926_s2] ss:$0 sm:$0xff] (!%p235_p3) }
   0xe   : > { %v731_v15 = vld [vmem:[%s925_s1 + $0x30] sm:$0xff] (!%p235_p3)   ;;  %v733_v17 = vld [vmem:[%s925_s1 + $0x38] sm:$0xff] (!%p235_p3)  }
   0xf   : > { %658 = vmatpush3.bf16.msra.mxu0 (!%p235_p3), %v721_v3 }
  0x10   : > { %s941_s19 = smov (!%p282_p5, %s762_s19), 1  ;;  %s943_s27 = smov (!%p284_p6, %s281_s27), 2  ;;  %659 = vmatprep.subr.bf16.mxu0 %v722_v4 }
  0x11   : > { %s677_s11 = smul.u32 6, %s941_s19  ;;  %s627_s12 = sshll.u32 %s943_s27, 1 }
  0x12   : > { %s945_s18 = smov (!%p294_p7, %s758_s18), 1  ;;  %s629_s27 = sshll.u32 %s941_s19, 1 }
  0x13   : > { %s288_s15 = sadd.s32 %s677_s11, %s627_s12  ;;  %660 = vmatpush3.bf16.msra.mxu0 %v723_v5  ;;  %s297_s30 = sadd.s32 %s629_s27, %s945_s18 }
  0x14   : > { %s628_s25 = sshll.u32 %s288_s15, 2  ;;  %661 = vmatprep.subr.bf16.mxu0 %v724_v6  ;;  %s630_s6 = sshll.u32 %s297_s30, 3 }
  0x15   : > { %s290_s7 = scalar_lea.vmem %s924_s0, %s628_s25  ;;  %s302_s9 = scalar_lea.vmem %s928_s4, %s941_s19 }
  0x16   : > { %v312_v11 = vld [vmem:[%s290_s7] sm:$0xff]  ;;  %s299_s14 = scalar_lea.vmem %s927_s3, %s630_s6  ;;  %s310_s19 = scalar_lea.vmem %s929_s5, %s630_s6 }
  0x17   : > { %662 = vmatpush3.bf16.msra.mxu0 %v725_v7  ;;  %v635_v12 = vcombine.high %v312_v11, %v312_v11  ;;  %v634_v18 = vcombine.low %v312_v11, %v312_v11  ;;  %v652_v24 = vld [vmem:[%s302_s9] ss:$0 sm:$0xff] }
  0x18   : > { %663 = vmatprep.subr.bf16.mxu0 %v726_v8  ;;  %v495_v27 = vld [vmem:[%s299_s14] sm:$0xff] }
  0x19   : > { %487 = vmatprep.mubr.bf16.mxu0 %v635_v12 }
  0x1b   : > { %664 = vmatpush3.bf16.msra.mxu0 %v727_v9 }
  0x1c   : > { %665 = vmatprep.subr.bf16.mxu0 %v728_v10 }
  0x1f   : > { %666 = vmatpush3.bf16.msra.mxu0 %v729_v13 }
  0x20   : > { %667 = vmatprep.subr.bf16.mxu0 %v730_v14 }
  0x23   : > { %668 = vmatpush3.bf16.msra.mxu0 %v731_v15 }
  0x24   : > { %669 = vmatprep.subr.bf16.mxu0 %v732_v16 }
  0x27   : > { %670 = vmatpush3.bf16.msra.mxu0 %v733_v17 }
  0x2a   : > { %488 = vmatmul.mubr.bf16.vlgmr.msra.gmra.mrb[0].mxu0 %v634_v18 }
  0xfd   : > { %v671_v19 = vpop.f32.mrb[0].mxu0 }
  0xfe   : > { %v672_v21 = vpop.f32.mrb[1].mxu0 }
  0xff   : > { %v673_v22 = vadd.f32 %v672_v21, %v671_v19  ;;  %v674_v23 = vpop.f32.mrb[2].mxu0 }
 0x100   : > { %v675_v25 = vpop.f32.mrb[3].mxu0 }
 0x101   : > { %v490_v26 = vadd.f32 %v673_v22, %v633_v20 }
 0x103   : > { %v503_v28 = vmul.f32 %v652_v24, %v490_v26 }
 0x105   : > { %v504_v29 = vadd.f32 %v503_v28, %v495_v27 }
 0x107   : > { %505 = vst [vmem:[%s310_s19] sm:$0xff] %v504_v29 }
 0x108 PF: > { %s15_s22 = sadd.s32 1, %s774_s22   ;;  %s930_s18 = smov %s766_s20 }
 0x109   : > { %p12_p8 = scmp.ge.s32.totalorder %s15_s22, 6   ;;  %s931_s19 = smov %s770_s21 }
 0x10a   : > { %s932_s20 = smov %s935_s23  ;;  %s933_s21 = smov %s939_s24 }
 0x10b   :  { %14 = sbr.rel (!%p12_p8) target bundleno = 3 (0x3), region = 76 }

// kernel: block_forward_pallas.14
= control target key start
LH: loop header
LB: loop body
LE: loop exit
PB: predicated region body
PF: predicated region fallthrough
CT: control target
= control target key end

     0   :  { %s1854_s0 = inlined_call_operand.vmem [shape: f32[2,16,128], index: 0, kind: input, shape index: {}]   ;;  %s1855_s1 = inlined_call_operand.vmem [shape: f32[1,128], index: 1, kind: input, shape index: {}]   ;;  %s1856_s2 = inlined_call_operand.vmem [shape: f32[2,1,128], index: 2, kind: input, shape index: {}]   ;;  %s1857_s3 = inlined_call_operand.vmem [shape: f32[2,1,128], index: 3, kind: input, shape index: {}]   ;;  %s1858_s4 = inlined_call_operand.vmem [shape: bf16[128,512], index: 4, kind: input, shape index: {}]   ;;  %s1859_s5 = inlined_call_operand.vmem [shape: f32[1,512], index: 5, kind: input, shape index: {}]   ;;  %s1860_s6 = inlined_call_operand.vmem [shape: bf16[512,128], index: 6, kind: input, shape index: {}]   ;;  %s1861_s7 = inlined_call_operand.vmem [shape: f32[1,128], index: 7, kind: input, shape index: {}]   ;;  %s1862_s8 = inlined_call_operand.vmem [shape: f32[2,1,128], index: 8, kind: input, shape index: {}]   ;;  %s1863_s9 = inlined_call_operand.hbm [shape: f32[2,16,128], index: 9, kind: output, shape index: {}]  }
   0x1   :  { %1876 = sst [smem:[#allocation20_spill]] %s1855_s1 }
   0x2   :  { %1877 = sst [smem:[#allocation21_spill]] %s1858_s4 }
   0x3   :  { %1878 = sst [smem:[#allocation22_spill]] %s1861_s7 }
   0x4   :  { %1879 = sst [smem:[#allocation23_spill]] %s1863_s9 }
   0x5   :  { %14 = vsyncpa [#allocation6], 0 }
   0x6   :  { %16 = vsyncpa [#allocation6 + $0x1], 0  ;;  %s1548_s30 = smov 0   ;;  %s1550_s10 = smov 0  }
   0x7   :  { %s1552_s11 = smov 0   ;;  %s1554_s12 = smov 0  }
   0x8   :  { %s1556_s13 = smov 0   ;;  %s1558_s14 = smov 0  }
   0x9   :  { %s1560_s15 = smov 0   ;;  %s1562_s16 = smov 0  }
   0xa   :  { %s1564_s17 = smov 0   ;;  %s1566_s18 = smov 0  }
   0xb   :  { %s1568_s19 = smov 0   ;;  %s1570_s20 = smov 0  }
   0xc LB: > { %1880 = sst [smem:[#allocation8_spill]] %s1449_s30  ;;  %s1135_s21 = sadd.s32 4294967295, %s1493_s20   ;;  %s1493_s20 = sphi %s1570_s20, %s22_s20   ;;  %s1489_s19 = sphi %s1568_s19, %s1912_s19   ;;  %s1485_s18 = sphi %s1566_s18, %s1911_s18   ;;  %s1481_s17 = sphi %s1564_s17, %s1910_s17   ;;  %s1477_s16 = sphi %s1562_s16, %s1909_s16   ;;  %s1473_s15 = sphi %s1560_s15, %s1908_s15   ;;  %s1469_s14 = sphi %s1558_s14, %s1907_s14   ;;  %s1465_s13 = sphi %s1556_s13, %s1906_s13   ;;  %s1461_s12 = sphi %s1554_s12, %s1905_s12   ;;  %s1457_s11 = sphi %s1552_s11, %s1904_s11   ;;  %s1453_s10 = sphi %s1550_s10, %s1914_s10   ;;  %s1449_s30 = sphi %s1548_s30, %s1913_s30  }
   0xd   : > { %1881 = sst [smem:[#allocation9_spill]] %s1457_s11  ;;  %s1136_s22 = sadd.s32 4294967294, %s1493_s20  }
   0xe   : > { %1882 = sst [smem:[#allocation10_spill]] %s1465_s13  ;;  %s34_s23 = sadd.s32 1, %s1481_s17 }
   0xf   : > { %1883 = sst [smem:[#allocation11_spill]] %s1481_s17  ;;  %p35_p0 = scmp.ge.s32.totalorder %s34_s23, 2 }
  0x10   : > { %1884 = sst [smem:[#allocation12_spill]] %s1485_s18  ;;  %s37_s24 = sadd.s32 1, %s1485_s18 }
  0x11   : > { %1885 = sst [smem:[#allocation13_spill]] %s1489_s19  ;;  %s41_s25 = sadd.s32 1, %s1489_s19 }
  0x12   : > { %p156_p1 = scmp.ne.s32.totalorder %s1465_s13, %s1461_s12  ;;  %s1916_s23 = smov (%p35_p0, %s34_s23), 0 }
  0x13   : > { %1886 = sst [smem:[#allocation14_spill]] %s1916_s23  ;;  %s1918_s24 = smov (!%p35_p0, %s37_s24), %s1485_s18 }
  0x14   : > { %s146_s26 = ssub.s32 %s1481_s17, %s1916_s23  ;;  %p157_p2 = scmp.eq.s32.totalorder %s1493_s20, 0 }
  0x15   : > { %p39_p3 = scmp.ge.s32.totalorder %s1918_s24, 2  ;;  %p147_p4 = scmp.eq.s32.totalorder %s146_s26, 0 }
  0x16   : > { %s149_s27 = sadd.s32 1, %s1465_s13  ;;  %p1622_p5 = por %p157_p2, %p156_p1 }
  0x17   : > { %s1920_s24 = smov (%p39_p3, %s1918_s24), 0  ;;  %s1922_s25 = smov (!%p39_p3, %s41_s25), %s1489_s19 }
  0x18   : > { %1888 = sst [smem:[#allocation15_spill]] %s1920_s24  ;;  %p43_p6 = scmp.ge.s32.totalorder %s1922_s25, 2 }
  0x19   : > { %s1630_s29 = scalar_select %p147_p4, %s1465_s13, %s149_s27  }
  0x1a   : > { %s272_s9 = ssub.s32 %s1485_s18, %s1920_s24  ;;  %p286_p7 = scmp.ne.s32.totalorder %s1457_s11, %s1453_s10 }
  0x1b   : > { %1889 = sst [smem:[#allocation16_spill]] %s1630_s29  ;;  %p287_p8 = scmp.eq.s32.totalorder %s1135_s21, 7 }
  0x1c   : > { %s1924_s25 = smov (%p43_p6, %s1922_s25), 0  ;;  %p292_p10 = scmp.ne.s32.totalorder %s1453_s10, %s1449_s30 }
  0x1d   : > { %1890 = sst [smem:[#allocation17_spill]] %s1924_s25  ;;  %p1638_p9 = por %p287_p8, %p286_p7 }
  0x1e   : > { %s271_s23 = ssub.s32 %s1489_s19, %s1924_s25  ;;  %p293_p11 = scmp.eq.s32.totalorder %s1136_s22, 7 }
  0x1f   : > { %s273_s7 = sor.u32 %s272_s9, %s271_s23  ;;  %s276_s1 = sadd.s32 1, %s1457_s11 }
  0x20   : > { %p274_p12 = scmp.eq.s32.totalorder %s273_s7, 0  ;;  %p1647_p13 = por %p293_p11, %p292_p10 }
  0x21   : > { %p1138_p0 = scmp.ge.s32.totalorder %s1493_s20, 8 }
  0x22   : > { %s1892_s27 = scalar_select %p1647_p13, 1, 0 }
  0x23   : > { %s1652_s24 = scalar_select %p274_p12, %s1457_s11, %s276_s1  }
  0x24   : > { %1893 = sst [smem:[#allocation18_spill]] %s1892_s27  ;;  %315 = sbr.rel (%p1138_p0) target bundleno = 61 (0x3d), region = 24 }
  0x25   : > { %1894 = sst [smem:[#allocation19_spill]] %s1652_s24 }
  0x2b   : > { %341 = sbr.rel (!%p1622_p5) target bundleno = 61 (0x3d), region = 40  ;;  %s343_s21 = sand.u32 (%p1622_p5), 1, %s1465_s13  }
  0x2c   : > { %s1193_s25 = sshll.u32 (%p1622_p5), %s1481_s17, 3  ;;  %s1139_s22 = sshll.u32 (%p1622_p5), %s343_s21, 7 }
  0x2d   : > { %s1895_s4 = sld [smem:[#allocation21_spill]] (%p1622_p5)  ;;  %s345_s1 = scalar_lea.vmem (%p1622_p5), [#allocation4], %s1139_s22 }
  0x33   : > { %s1662_s7 = scalar_lea.vmem %s1895_s4, %s1193_s25 }
  0x34   : > { %v406_v0 = vld [vmem:[%s1662_s7] sm:$0xff]  ;;  %v408_v1 = vld [vmem:[%s1662_s7 + $0x10] sm:$0xff] }
  0x35   : > { %v410_v2 = vld [vmem:[%s1662_s7 + $0x20] sm:$0xff]  ;;  %407 = vst [vmem:[%s345_s1] sm:$0xff] %v406_v0  ;;  %409 = vst [vmem:[%s345_s1 + $0x8] sm:$0xff] %v408_v1  ;;  %v412_v3 = vld [vmem:[%s1662_s7 + $0x30] sm:$0xff] }
  0x36   : > { %411 = vst [vmem:[%s345_s1 + $0x10] sm:$0xff] %v410_v2  ;;  %v414_v4 = vld [vmem:[%s1662_s7 + $0x40] sm:$0xff]  ;;  %v416_v5 = vld [vmem:[%s1662_s7 + $0x50] sm:$0xff]  ;;  %413 = vst [vmem:[%s345_s1 + $0x18] sm:$0xff] %v412_v3 }
  0x37   : > { %415 = vst [vmem:[%s345_s1 + $0x20] sm:$0xff] %v414_v4  ;;  %417 = vst [vmem:[%s345_s1 + $0x28] sm:$0xff] %v416_v5  ;;  %v418_v6 = vld [vmem:[%s1662_s7 + $0x60] sm:$0xff]  ;;  %v420_v7 = vld [vmem:[%s1662_s7 + $0x70] sm:$0xff] }
  0x38   : > { %v422_v8 = vld [vmem:[%s1662_s7 + $0x80] sm:$0xff]  ;;  %419 = vst [vmem:[%s345_s1 + $0x30] sm:$0xff] %v418_v6  ;;  %421 = vst [vmem:[%s345_s1 + $0x38] sm:$0xff] %v420_v7  ;;  %v424_v9 = vld [vmem:[%s1662_s7 + $0x90] sm:$0xff] }
  0x39   : > { %423 = vst [vmem:[%s345_s1 + $0x40] sm:$0xff] %v422_v8  ;;  %v426_v10 = vld [vmem:[%s1662_s7 + $0xa0] sm:$0xff]  ;;  %v428_v11 = vld [vmem:[%s1662_s7 + $0xb0] sm:$0xff]  ;;  %425 = vst [vmem:[%s345_s1 + $0x48] sm:$0xff] %v424_v9 }
  0x3a   : > { %427 = vst [vmem:[%s345_s1 + $0x50] sm:$0xff] %v426_v10  ;;  %429 = vst [vmem:[%s345_s1 + $0x58] sm:$0xff] %v428_v11  ;;  %v430_v12 = vld [vmem:[%s1662_s7 + $0xc0] sm:$0xff]  ;;  %v432_v13 = vld [vmem:[%s1662_s7 + $0xd0] sm:$0xff] }
  0x3b   : > { %v434_v14 = vld [vmem:[%s1662_s7 + $0xe0] sm:$0xff]  ;;  %431 = vst [vmem:[%s345_s1 + $0x60] sm:$0xff] %v430_v12  ;;  %433 = vst [vmem:[%s345_s1 + $0x68] sm:$0xff] %v432_v13  ;;  %v436_v15 = vld [vmem:[%s1662_s7 + $0xf0] sm:$0xff] }
  0x3c   : > { %435 = vst [vmem:[%s345_s1 + $0x70] sm:$0xff] %v434_v14  ;;  %437 = vst [vmem:[%s345_s1 + $0x78] sm:$0xff] %v436_v15 }
  0x3d PF: > { %p1142_p1 = scmp.ge.s32.totalorder %s1493_s20, 1  ;;  %p465_p2 = scmp.lt.s32.totalorder %s1493_s20, 9 }
  0x3f   : > { %p466_p3 = pnand %p1142_p1, %p465_p2 }
  0x40   : > { %s472_s25 = sand.u32 (!%p466_p3), 1, %s1461_s12   ;;  %s1870_s28 = sand.u32 (!%p466_p3), 1, %s1453_s10  }
  0x41   : > { %469 = sbr.rel (%p466_p3) target bundleno = 784 (0x310), region = 90  ;;  %s1143_s21 = sshll.u32 (!%p466_p3), %s472_s25, 7 }
  0x42   : > { %s1686_s22 = sshll.u32 (!%p466_p3), %s1870_s28, 3  ;;  %p533_p4 = scmp.lt.s32.totalorder (!%p466_p3), %s1477_s16, 1 }
  0x43   : > { %p535_p5 = scmp.lt.s32.totalorder (!%p466_p3), %s1473_s15, 1  ;;  %s1147_s9 = sshll.u32 (!%p466_p3), %s1469_s14, 1 }
  0x44   : > { %s1148_s23 = sshll.u32 (!%p466_p3), %s1469_s14, 5  ;;  %p549_p6 = scmp.lt.s32.totalorder (!%p466_p3), %s1147_s9, 3 }
  0x45   : > { %p554_p7 = scmp.lt.s32.totalorder (!%p466_p3), %s1148_s23, 63  ;;  %s532_s24 = scalar_lea.vmem (!%p466_p3), [#allocation5], %s1686_s22 }
  0x46   : > { %p1150_p8 = scmp.ne.s32.totalorder (!%p466_p3), %s1469_s14, 0 }
  0x48   : > { %s1693_s7 = scalar_select %p533_p4, %s1477_s16, 1 }
  0x49   : > { %s536_s1 = scalar_select %p535_p5, %s1473_s15, 1 }
  0x4a   : > { %s1145_s4 = sshll.u32 %s1693_s7, 1  ;;  %s543_s25 = scalar_lea.vmem %s1856_s2, %s1693_s7  ;;  %v1495_v18 = vmov (!%p1150_p8), 0.0   ;;  %v587_v22 = vlaneseq (!%p1150_p8) }
  0x4b   : > { %s538_s18 = sadd.s32 %s1145_s4, %s536_s1  ;;  %s1926_s9 = smov (!%p549_p6, %s1147_s9), 3  ;;  %603 = vst [vmem:[#allocation3] sm:$0xff] (!%p1150_p8), %v1495_v18  ;;  %v584_v24 = vld [vmem:[%s543_s25] sm:$0x1] (!%p1150_p8) }
  0x4c   : > { %s1146_s13 = sshll.u32 %s538_s18, 3  ;;  %s1928_s23 = smov (!%p554_p7, %s1148_s23), 63  ;;  %v588_v23 = vshrl.u32 (!%p1150_p8), %v587_v22, 7  ;;  %v585_v25 = vadd.f32 (!%p1150_p8), 1.0, %v584_v24 }
  0x4d   : > { %s1708_s27 = scalar_lea.vmem %s1854_s0, %s1146_s13  ;;  %s551_s4 = scalar_lea.vmem %s1859_s5, %s1926_s9 }
  0x4e   : > { %s561_s17 = scalar_lea.vmem %s1862_s8, %s1693_s7  ;;  %s1149_s18 = sshll.u32 %s1928_s23, 2  ;;  %v567_v16 = vld [vmem:[%s1708_s27] sm:$0xff] (!%p1150_p8)  ;;  %v589_v26 = vsub.s32 (!%p1150_p8), 0, %v588_v23 }
  0x4f   : > { %s1723_s11 = scalar_lea.vmem %s1860_s6, %s1149_s18  ;;  %s1725_s13 = scalar_lea.vmem [#allocation4], %s1143_s21  ;;  %v568_v17 = vmul.f32 (!%p1150_p8), %v567_v16, %v567_v16 }
  0x50   : > { %566 = sbr.rel (%p1150_p8) target bundleno = 249 (0xf9), region = 98  ;;  %s1896_s21 = sld [smem:[#allocation20_spill]] (!%p1150_p8)  ;;  %v590_v30 = vrot.slane (!%p1150_p8), %v585_v25, %v589_v26 }
  0x51   : > { %569 = vadd.xlane.f32.xlu0 (!%p1150_p8), %v568_v17  ;;  %s1897_s1 = scalar_lea.vmem (!%p1150_p8), %s1857_s3, %s1693_s7 }
  0x52   : > { %v1152_v32 = vld [vmem:[%s1897_s1] ss:$0 sm:$0xff] (!%p1150_p8) }
  0x56   : > { %v1151_v28 = vld [vmem:[%s1896_s21] ss:$0 sm:$0xff] (!%p1150_p8) }
  0xde   : > { %v570_v19 = vpop.xlane.xlu0 %569 }
  0xdf   : > { %v572_v20 = vmul.f32 0.0078125, %v570_v19 }
  0xe1   : > { %v573_v21 = vadd.f32 1e-06, %v572_v20 }
  0xe3   : > { %1321 = vrsqrt.f32 %v573_v21 }
  0xed   : > { %v1322_v27 = vpop.eup %1321 }
  0xee   : > { %v575_v29 = vmul.f32 %v1322_v27, %v567_v16 }
  0xf0   : > { %v583_v31 = vmul.f32 %v1151_v28, %v575_v29 }
  0xf2   : > { %v592_v33 = vmul.f32 %v590_v30, %v583_v31 }
  0xf4   : > { %v600_v34 = vadd.f32 %v1152_v32, %v592_v33 }
  0xf6   : > { %v601_v35 = vpack.c.bf16 %v600_v34, %v600_v34 }
  0xf8   : > { %602 = vst [vmem:[#allocation2] sm:$0xf] %v601_v35 }
  0xf9 PF: > { %v1323_v36 = vld [vmem:[%s1725_s13 + $0x4] ss:$8 sps:$4 sm:$0xff]   ;;  %v1325_v37 = vld [vmem:[%s1725_s13] ss:$8 sps:$4 sm:$0xff]   ;;  %v1496_v38 = vmov 0   ;;  %v1347_v54 = vld [vmem:[%s1723_s11 + $0x40] sm:$0xff]   ;;  %v623_v6 = vlaneseq }
  0xfa   : > { %745 = vmatprep.mubr.bf16.mxu0 %v1496_v38  ;;  %713 = vmatprep.subr.bf16.mxu0 %v1323_v36  ;;  %v1326_v39 = vld [vmem:[%s1725_s13 + $0x14] ss:$8 sps:$4 sm:$0xff]   ;;  %v1328_v40 = vld [vmem:[%s1725_s13 + $0x10] ss:$8 sps:$4 sm:$0xff]   ;;  %v1329_v41 = vld [vmem:[%s1725_s13 + $0x24] ss:$8 sps:$4 sm:$0xff]  }
  0xfb   : > { %714 = vmatpush1.bf16.msra.mxu0 %v1325_v37  ;;  %v1331_v42 = vld [vmem:[%s1725_s13 + $0x20] ss:$8 sps:$4 sm:$0xff]   ;;  %v1332_v43 = vld [vmem:[%s1725_s13 + $0x34] ss:$8 sps:$4 sm:$0xff]   ;;  %v1334_v44 = vld [vmem:[%s1725_s13 + $0x30] ss:$8 sps:$4 sm:$0xff]   ;;  %1194 = vmatprep.subr.bf16.mxu1 %v1347_v54 }
  0xfc   : > { %715 = vmatprep.subr.bf16.mxu0 %v1326_v39  ;;  %v1335_v45 = vld [vmem:[%s1725_s13 + $0x44] ss:$8 sps:$4 sm:$0xff]   ;;  %v1337_v46 = vld [vmem:[%s1725_s13 + $0x40] ss:$8 sps:$4 sm:$0xff]   ;;  %v1338_v47 = vld [vmem:[%s1725_s13 + $0x54] ss:$8 sps:$4 sm:$0xff]  }
  0xfd   : > { %v1340_v48 = vld [vmem:[%s1725_s13 + $0x50] ss:$8 sps:$4 sm:$0xff]   ;;  %v1341_v49 = vld [vmem:[%s1725_s13 + $0x64] ss:$8 sps:$4 sm:$0xff]   ;;  %v1343_v50 = vld [vmem:[%s1725_s13 + $0x60] ss:$8 sps:$4 sm:$0xff]  }
  0xfe   : > { %v1344_v51 = vld [vmem:[%s1725_s13 + $0x74] ss:$8 sps:$4 sm:$0xff]   ;;  %v1346_v52 = vld [vmem:[%s1725_s13 + $0x70] ss:$8 sps:$4 sm:$0xff]   ;;  %v1351_v58 = vld [vmem:[%s1723_s11 + $0x50] sm:$0xff]   ;;  %v624_v7 = vshrl.u32 %v623_v6, 7 }
  0xff   : > { %716 = vmatpush1.bf16.msra.mxu0 %v1328_v40  ;;  %v604_v53 = vld [vmem:[#allocation2] sm:$0xf]  ;;  %v1349_v56 = vld [vmem:[%s1723_s11 + $0x48] sm:$0xff]   ;;  %v1352_v59 = vld [vmem:[%s1723_s11 + $0x10] sm:$0xff]   ;;  %p1185_p10 = scmp.ne.s32.totalorder %s1469_s14, 1 }
 0x100   : > { %717 = vmatprep.subr.bf16.mxu0 %v1329_v41  ;;  %v1348_v55 = vld [vmem:[%s1723_s11] sm:$0xff]   ;;  %v1350_v57 = vld [vmem:[%s1723_s11 + $0x8] sm:$0xff]   ;;  %v1353_v60 = vld [vmem:[%s1723_s11 + $0x58] sm:$0xff]   ;;  %v625_v8 = vsub.s32 0, %v624_v7  ;;  %v629_v10 = vsub.s32 1, %v624_v7  ;;  %s1898_s18 = sld [smem:[#allocation22_spill]] (!%p1185_p10) }
 0x101   : > { %1195 = vmatpush3.bf16.msra.mxu1 %v1348_v55  ;;  %v1354_v61 = vld [vmem:[%s1723_s11 + $0x18] sm:$0xff]   ;;  %v1355_v62 = vld [vmem:[%s1723_s11 + $0x60] sm:$0xff]   ;;  %v1357_v0 = vld [vmem:[%s1723_s11 + $0x68] sm:$0xff]  }
 0x102   : > { %1196 = vmatprep.subr.bf16.mxu1 %v1349_v56  ;;  %v1356_v63 = vld [vmem:[%s1723_s11 + $0x20] sm:$0xff]   ;;  %v1358_v1 = vld [vmem:[%s1723_s11 + $0x28] sm:$0xff]   ;;  %v1359_v2 = vld [vmem:[%s1723_s11 + $0x70] sm:$0xff]  }
 0x103   : > { %718 = vmatpush1.bf16.msra.mxu0 %v1331_v42  ;;  %v1360_v3 = vld [vmem:[%s1723_s11 + $0x30] sm:$0xff]   ;;  %v1361_v4 = vld [vmem:[%s1723_s11 + $0x78] sm:$0xff]   ;;  %v621_v9 = vld [vmem:[%s551_s4] sm:$0x3] }
 0x104   : > { %719 = vmatprep.subr.bf16.mxu0 %v1332_v43  ;;  %v1362_v5 = vld [vmem:[%s1723_s11 + $0x38] sm:$0xff]   ;;  %v626_v11 = vrot.slane %v621_v9, %v625_v8  ;;  %v630_v12 = vrot.slane %v621_v9, %v629_v10  ;;  %v772_v40 = vld [vmem:[#allocation3] sm:$0xff] }
 0x105   : > { %1197 = vmatpush3.bf16.msra.mxu1 %v1350_v57 }
 0x106   : > { %1198 = vmatprep.subr.bf16.mxu1 %v1351_v58 }
 0x107   : > { %720 = vmatpush1.bf16.msra.mxu0 %v1334_v44 }
 0x108   : > { %721 = vmatprep.subr.bf16.mxu0 %v1335_v45 }
 0x109   : > { %1199 = vmatpush3.bf16.msra.mxu1 %v1352_v59 }
 0x10a   : > { %1200 = vmatprep.subr.bf16.mxu1 %v1353_v60 }
 0x10b   : > { %722 = vmatpush1.bf16.msra.mxu0 %v1337_v46 }
 0x10c   : > { %723 = vmatprep.subr.bf16.mxu0 %v1338_v47  ;;  %v1186_v47 = vld [vmem:[%s1898_s18] ss:$0 sm:$0xff] (!%p1185_p10) }
 0x10d   : > { %1201 = vmatpush3.bf16.msra.mxu1 %v1354_v61 }
 0x10e   : > { %1202 = vmatprep.subr.bf16.mxu1 %v1355_v62 }
 0x10f   : > { %724 = vmatpush1.bf16.msra.mxu0 %v1340_v48 }
 0x110   : > { %725 = vmatprep.subr.bf16.mxu0 %v1341_v49  ;;  %v1187_v49 = vld [vmem:[%s561_s17] ss:$0 sm:$0xff] (!%p1185_p10) }
 0x111   : > { %1203 = vmatpush3.bf16.msra.mxu1 %v1356_v63 }
 0x112   : > { %1204 = vmatprep.subr.bf16.mxu1 %v1357_v0 }
 0x113   : > { %726 = vmatpush1.bf16.msra.mxu0 %v1343_v50  ;;  %v958_v50 = vld [vmem:[%s1708_s27] sm:$0xff] (!%p1185_p10) }
 0x114   : > { %727 = vmatprep.subr.bf16.mxu0 %v1344_v51 }
 0x115   : > { %1205 = vmatpush3.bf16.msra.mxu1 %v1358_v1 }
 0x116   : > { %1206 = vmatprep.subr.bf16.mxu1 %v1359_v2 }
 0x117   : > { %728 = vmatpush1.bf16.msra.mxu0 %v1346_v52 }
 0x119   : > { %1207 = vmatpush3.bf16.msra.mxu1 %v1360_v3 }
 0x11a   : > { %746 = vmatmul.mubr.bf16.vlgmr.msra.gmra.mrb[0].mxu0 %v604_v53  ;;  %1208 = vmatprep.subr.bf16.mxu1 %v1361_v4 }
 0x11d   : > { %1209 = vmatpush3.bf16.msra.mxu1 %v1362_v5 }
 0x1ed   : > { %v747_v13 = vpop.f32.mrb[0].mxu0 }
 0x1ee   : > { %v748_v14 = vadd.f32 %v747_v13, %v626_v11  ;;  %v749_v15 = vpop.f32.mrb[1].mxu0 }
 0x1ef   : > { %v750_v16 = vadd.f32 %v749_v15, %v630_v12  ;;  %v751_v17 = vpop.f32.mrb[2].mxu0 }
 0x1f0   : > { %v756_v18 = vmul.f32 0.044715, %v748_v14  ;;  %v752_v19 = vpop.f32.mrb[3].mxu0  ;;  %v754_v31 = vmul.f32 0.5, %v748_v14 }
 0x1f1   : > { %v757_v20 = vmul.f32 0.044715, %v750_v16  ;;  %v755_v33 = vmul.f32 0.5, %v750_v16 }
 0x1f2   : > { %v758_v21 = vmul.f32 %v756_v18, %v748_v14 }
 0x1f3   : > { %v759_v22 = vmul.f32 %v757_v20, %v750_v16 }
 0x1f4   : > { %v760_v23 = vmul.f32 %v758_v21, %v748_v14 }
 0x1f5   : > { %v761_v24 = vmul.f32 %v759_v22, %v750_v16 }
 0x1f6   : > { %v762_v25 = vadd.f32 %v760_v23, %v748_v14 }
 0x1f7   : > { %v763_v26 = vadd.f32 %v761_v24, %v750_v16 }
 0x1f8   : > { %v764_v27 = vmul.f32 0.7978846, %v762_v25 }
 0x1f9   : > { %v765_v28 = vmul.f32 0.7978846, %v763_v26 }
 0x1fa   : > { %1363 = vtanh.f32 %v764_v27 }
 0x1fb   : > { %1365 = vtanh.f32 %v765_v28 }
 0x204   : > { %v1364_v29 = vpop.eup %1363 }
 0x205   : > { %v1366_v30 = vpop.eup %1365  ;;  %v768_v32 = vadd.f32 1.0, %v1364_v29 }
 0x206   : > { %v769_v34 = vadd.f32 1.0, %v1366_v30 }
 0x207   : > { %v770_v35 = vmul.f32 %v768_v32, %v754_v31 }
 0x208   : > { %v771_v36 = vmul.f32 %v769_v34, %v755_v33 }
 0x209   : > { %v773_v38 = vpack.c.bf16 %v770_v35, %v770_v35 }
 0x20a   : > { %v774_v37 = vpack.c.bf16 %v771_v36, %v771_v36 }
 0x20c   : > { %935 = vmatprep.mubr.bf16.mxu1 %v774_v37 }
 0x20d   : > { %936 = vmatmul.mubr.bf16.vlgmr.msra.gmra.mrb[0].mxu1 %v773_v38 }
 0x2e0   : > { %v1210_v39 = vpop.f32.mrb[0].mxu1  ;;  %948 = sbr.rel (%p1185_p10) target bundleno = 757 (0x2f5), region = 102 }
 0x2e1   : > { %v1211_v41 = vpop.f32.mrb[1].mxu1 }
 0x2e2   : > { %v1212_v42 = vadd.f32 %v1211_v41, %v1210_v39  ;;  %v1213_v43 = vpop.f32.mrb[2].mxu1 }
 0x2e3   : > { %v1214_v44 = vpop.f32.mrb[3].mxu1 }
 0x2e4   : > { %v943_v45 = vadd.f32 %v1212_v42, %v772_v40 }
 0x2e6   : > { %944 = vst [vmem:[#allocation3] sm:$0xff] %v943_v45 }
 0x2ed   : > { %v949_v46 = vld [vmem:[#allocation3] sm:$0xff] }
 0x2ee   : > { %v957_v48 = vadd.f32 %v1186_v47, %v949_v46 }
 0x2f0   : > { %v966_v51 = vmul.f32 %v1187_v49, %v957_v48 }
 0x2f2   : > { %v967_v52 = vadd.f32 %v966_v51, %v958_v50 }
 0x2f4   : > { %968 = vst [vmem:[%s532_s24] sm:$0xff] %v967_v52 }
 0x2f5 PF: > { %s1189_s14 = sshll.u32 %s1477_s16, 1  ;;  %s985_s30 = sshll.u32 %s532_s24, 4  ;;  %s1791_s30 = int_to_ptr.vmem [resolvable:$true] %s985_s30 }
 0x2f6   : > { %s981_s13 = sadd.s32 %s1473_s15, %s1189_s14  ;;  %s1899_s27 = sld [smem:[#allocation23_spill]] }
 0x2f7   : > { %s1190_s29 = sshll.u32 %s981_s13, 7  ;;  %s1900_s23 = sand.u32 1, %s1453_s10  }
 0x2f8   : > { %s970_s19 = scalar_lea.sflag [#allocation6], %s1900_s23  ;;  %s1367_s1 = scalar_lea.vmem %s1791_s30, 128 }
 0x2f9   : > { %p1368_p11 = scmp.ne.s32.totalorder %s1791_s30, %s1367_s1  ;;  %s1497_s15 = smov [#allocation5]  }
 0x2fa   : > { %s1371_s16 = sshll.u32 %s1497_s15, 4  ;;  %s1372_s16 = int_to_ptr.vmem [resolvable:$false] %s1371_s16 }
 0x2fb   : > { %p1369_p12 = pnand %p1368_p11, %p1638_p9  ;;  %s1373_s22 = scalar_lea.vmem %s1372_s16, 256 }
 0x2fc   : > { %s983_s21 = scalar_lea.hbm %s1899_s27, %s1190_s29  ;;  %p1374_p1 = scmp.lt.s32.totalorder %s1791_s30, %s1372_s16 }
 0x2fd   : > { %p1370_p0 = pneg %p1369_p12  ;;  %p1375_p2 = scmp.lt.s32.totalorder %s1373_s22, %s1367_s1 }
 0x2ff   : > { %p1376_p3 = por %p1375_p2, %p1374_p1 }
 0x301   : > { %p1377_p4 = pnand %p1376_p3, %p1370_p0 }
 0x303   : > { %1380 = shalt.err (!%p1377_p4)
}
 0x304   : > { %s1381_s24 = scalar_lea.hbm %s983_s21, 128  ;;  %s1385_s9 = scalar_lea.hbm %s1899_s27, 512 }
 0x305   : > { %p1382_p5 = scmp.ne.s32.totalorder %s983_s21, %s1381_s24  ;;  %p1386_p8 = scmp.lt.u32.totalorder %s983_s21, %s1899_s27 }
 0x306   : > { %p1387_p10 = scmp.lt.u32.totalorder %s1385_s9, %s1381_s24  ;;  %p1389_p12 = scmp.lt.u32.totalorder %s1381_s24, %s983_s21 }
 0x307   : > { %p1383_p6 = pnand %p1382_p5, %p1638_p9 }
 0x308   : > { %p1388_p11 = por %p1387_p10, %p1386_p8 }
 0x309   : > { %p1384_p7 = pneg %p1383_p6 }
 0x30a   : > { %p1390_p1 = por %p1389_p12, %p1388_p11 }
 0x30c   : > { %p1391_p0 = pnand %p1390_p1, %p1384_p7 }
 0x30e   : > { %1394 = shalt.err (!%p1391_p0)
}
 0x30f   : > { %1216 = dma.vmem_to_hbm [thread:$0]  (%p1638_p9), %s1791_s30, 128, %s983_s21, %s970_s19  }
 0x310 PF: > { %s1901_s28 = sld [smem:[#allocation8_spill]]  ;;  %p1222_p2 = scmp.ge.s32.totalorder %s1493_s20, 2 }
 0x312   : > { %p1219_p3 = pnand %p1222_p2, %p1647_p13 }
 0x316   : > { %s997_s14 = sand.u32 1, %s1901_s28  }
 0x317   : > { %s998_s13 = scalar_lea.sflag [#allocation6], %s997_s14 }
 0x318   : > { %1444 = dma.done.wait (!%p1219_p3), %s998_s13, 128  }
 0x319   : > { %1446 = vsyncadd (!%p1219_p3), %s998_s13, 4294967168  ;;  %s22_s20 = sadd.s32 1, %s1493_s20   ;;  %s1903_s29 = sld [smem:[#allocation9_spill]] }
 0x31a   : > { %p19_p4 = scmp.ge.s32.totalorder %s22_s20, 10   ;;  %s1904_s11 = sld [smem:[#allocation19_spill]] }
 0x31b   : > { %s1905_s12 = sld [smem:[#allocation10_spill]]  ;;  %s1906_s13 = sld [smem:[#allocation16_spill]] }
 0x31c   : > { %s1907_s14 = sld [smem:[#allocation11_spill]]  ;;  %s1908_s15 = sld [smem:[#allocation12_spill]] }
 0x31d   : > { %s1909_s16 = sld [smem:[#allocation13_spill]]  ;;  %s1910_s17 = sld [smem:[#allocation14_spill]] }
 0x31e   : > { %s1911_s18 = sld [smem:[#allocation15_spill]]  ;;  %s1912_s19 = sld [smem:[#allocation17_spill]] }
 0x31f   : > { %s1913_s30 = smov %s1453_s10  ;;  %s1914_s10 = smov %s1903_s29 }
 0x320   :  { %21 = sbr.rel (!%p19_p4) target bundleno = 12 (0xc), region = 160 }
 0x327   :  { %1003 = vsyncpa [#allocation6], 1 }
 0x328   :  { %1005 = vsyncpa [#allocation6 + $0x1], 1 }

// kernel: block_forward_pallas.15
= control target key start
LH: loop header
LB: loop body
LE: loop exit
PB: predicated region body
PF: predicated region fallthrough
CT: control target
= control target key end

     0   :  { %s1780_s0 = inlined_call_operand.vmem [shape: f32[2,8,128], index: 0, kind: input, shape index: {}]   ;;  %s1781_s1 = inlined_call_operand.vmem [shape: f32[1,128], index: 1, kind: input, shape index: {}]   ;;  %s1782_s2 = inlined_call_operand.vmem [shape: f32[2,1,128], index: 2, kind: input, shape index: {}]   ;;  %s1783_s3 = inlined_call_operand.vmem [shape: f32[2,1,128], index: 3, kind: input, shape index: {}]   ;;  %s1784_s4 = inlined_call_operand.vmem [shape: bf16[128,512], index: 4, kind: input, shape index: {}]   ;;  %s1785_s5 = inlined_call_operand.vmem [shape: f32[1,512], index: 5, kind: input, shape index: {}]   ;;  %s1786_s6 = inlined_call_operand.vmem [shape: bf16[512,128], index: 6, kind: input, shape index: {}]   ;;  %s1787_s7 = inlined_call_operand.vmem [shape: f32[1,128], index: 7, kind: input, shape index: {}]   ;;  %s1788_s8 = inlined_call_operand.vmem [shape: f32[2,1,128], index: 8, kind: input, shape index: {}]   ;;  %s1789_s9 = inlined_call_operand.hbm [shape: f32[2,8,128], index: 9, kind: output, shape index: {}]  }
   0x1   :  { %1805 = sst [smem:[#allocation21_spill]] %s1782_s2 }
   0x2   :  { %1806 = sst [smem:[#allocation22_spill]] %s1784_s4 }
   0x3   :  { %1807 = sst [smem:[#allocation23_spill]] %s1789_s9 }
   0x4   :  { %14 = vsyncpa [#allocation6], 0 }
   0x5   :  { %16 = vsyncpa [#allocation6 + $0x1], 0  ;;  %s1503_s30 = smov 0   ;;  %s1505_s10 = smov 0  }
   0x6   :  { %s1507_s11 = smov 0   ;;  %s1509_s12 = smov 0  }
   0x7   :  { %s1511_s13 = smov 0   ;;  %s1513_s14 = smov 0  }
   0x8   :  { %s1515_s15 = smov 0   ;;  %s1517_s16 = smov 0  }
   0x9   :  { %s1519_s17 = smov 0   ;;  %s1521_s18 = smov 0  }
   0xa LB: > { %1808 = sst [smem:[#allocation8_spill]] %s1412_s30  ;;  %s1124_s19 = sadd.s32 4294967295, %s1448_s18   ;;  %s1448_s18 = sphi %s1521_s18, %s22_s18   ;;  %s1444_s17 = sphi %s1519_s17, %s1842_s17   ;;  %s1440_s16 = sphi %s1517_s16, %s1841_s16   ;;  %s1436_s15 = sphi %s1515_s15, %s1840_s15   ;;  %s1432_s14 = sphi %s1513_s14, %s1839_s14   ;;  %s1428_s13 = sphi %s1511_s13, %s1838_s13   ;;  %s1424_s12 = sphi %s1509_s12, %s1837_s12   ;;  %s1420_s11 = sphi %s1507_s11, %s1836_s11   ;;  %s1416_s10 = sphi %s1505_s10, %s1835_s10   ;;  %s1412_s30 = sphi %s1503_s30, %s1834_s30  }
   0xb   : > { %1809 = sst [smem:[#allocation9_spill]] %s1416_s10  ;;  %s1125_s20 = sadd.s32 4294967294, %s1448_s18  }
   0xc   : > { %1810 = sst [smem:[#allocation10_spill]] %s1420_s11  ;;  %s34_s21 = sadd.s32 1, %s1440_s16 }
   0xd   : > { %1811 = sst [smem:[#allocation11_spill]] %s1428_s13  ;;  %s41_s22 = sadd.s32 1, %s1444_s17 }
   0xe   : > { %1812 = sst [smem:[#allocation12_spill]] %s1440_s16  ;;  %p35_p0 = scmp.ge.s32.totalorder %s34_s21, 2 }
   0xf   : > { %1813 = sst [smem:[#allocation13_spill]] %s1444_s17  ;;  %s149_s23 = sadd.s32 1, %s1428_s13 }
  0x10   : > { %1814 = sst [smem:[#allocation14_spill]] %s1448_s18  ;;  %p156_p1 = scmp.ne.s32.totalorder %s1428_s13, %s1424_s12 }
  0x11   : > { %p157_p2 = scmp.eq.s32.totalorder %s1448_s18, 0  ;;  %s1844_s21 = smov (%p35_p0, %s34_s21), 0 }
  0x12   : > { %1815 = sst [smem:[#allocation15_spill]] %s1844_s21  ;;  %s1846_s22 = smov (!%p35_p0, %s41_s22), %s1444_s17 }
  0x13   : > { %s146_s24 = ssub.s32 %s1440_s16, %s1844_s21  ;;  %p1566_p3 = por %p157_p2, %p156_p1 }
  0x14   : > { %p43_p4 = scmp.ge.s32.totalorder %s1846_s22, 2  ;;  %p147_p5 = scmp.eq.s32.totalorder %s146_s24, 0 }
  0x15   : > { %s276_s26 = sadd.s32 1, %s1420_s11  ;;  %p286_p6 = scmp.ne.s32.totalorder %s1420_s11, %s1416_s10 }
  0x16   : > { %s1848_s22 = smov (%p43_p4, %s1846_s22), 0  ;;  %p287_p7 = scmp.eq.s32.totalorder %s1124_s19, 3 }
  0x17   : > { %1817 = sst [smem:[#allocation16_spill]] %s1848_s22  ;;  %s271_s28 = ssub.s32 %s1444_s17, %s1848_s22 }
  0x18   : > { %s1576_s27 = scalar_select %p147_p5, %s1428_s13, %s149_s23  }
  0x19   : > { %p274_p8 = scmp.eq.s32.totalorder %s271_s28, 0  ;;  %p292_p9 = scmp.ne.s32.totalorder %s1416_s10, %s1412_s30 }
  0x1a   : > { %1818 = sst [smem:[#allocation17_spill]] %s1576_s27  ;;  %p1582_p10 = por %p287_p7, %p286_p6 }
  0x1b   : > { %p293_p11 = scmp.eq.s32.totalorder %s1125_s20, 3  ;;  %p1127_p13 = scmp.ge.s32.totalorder %s1448_s18, 4 }
  0x1c   : > { %s1819_s29 = scalar_select %p1582_p10, 1, 0 }
  0x1d   : > { %s1587_s21 = scalar_select %p274_p8, %s1420_s11, %s276_s26  }
  0x1e   : > { %1820 = sst [smem:[#allocation18_spill]] %s1819_s29  ;;  %p1589_p12 = por %p293_p11, %p292_p9 }
  0x1f   : > { %1821 = sst [smem:[#allocation19_spill]] %s1587_s21  ;;  %315 = sbr.rel (%p1127_p13) target bundleno = 56 (0x38), region = 24 }
  0x20   : > { %s1822_s24 = scalar_select %p1589_p12, 1, 0 }
  0x22   : > { %1823 = sst [smem:[#allocation20_spill]] %s1822_s24 }
  0x26   : > { %340 = sbr.rel (!%p1566_p3) target bundleno = 56 (0x38), region = 40  ;;  %s342_s19 = sand.u32 (%p1566_p3), 1, %s1428_s13  }
  0x27   : > { %s1180_s23 = sshll.u32 (%p1566_p3), %s1440_s16, 3  ;;  %s1128_s28 = sshll.u32 (%p1566_p3), %s342_s19, 7 }
  0x28   : > { %s1824_s4 = sld [smem:[#allocation22_spill]] (%p1566_p3)  ;;  %s344_s25 = scalar_lea.vmem (%p1566_p3), [#allocation4], %s1128_s28 }
  0x2e   : > { %s1601_s20 = scalar_lea.vmem %s1824_s4, %s1180_s23 }
  0x2f   : > { %v405_v0 = vld [vmem:[%s1601_s20] sm:$0xff]  ;;  %v407_v1 = vld [vmem:[%s1601_s20 + $0x10] sm:$0xff] }
  0x30   : > { %v409_v2 = vld [vmem:[%s1601_s20 + $0x20] sm:$0xff]  ;;  %406 = vst [vmem:[%s344_s25] sm:$0xff] %v405_v0  ;;  %408 = vst [vmem:[%s344_s25 + $0x8] sm:$0xff] %v407_v1  ;;  %v411_v3 = vld [vmem:[%s1601_s20 + $0x30] sm:$0xff] }
  0x31   : > { %410 = vst [vmem:[%s344_s25 + $0x10] sm:$0xff] %v409_v2  ;;  %v413_v4 = vld [vmem:[%s1601_s20 + $0x40] sm:$0xff]  ;;  %v415_v5 = vld [vmem:[%s1601_s20 + $0x50] sm:$0xff]  ;;  %412 = vst [vmem:[%s344_s25 + $0x18] sm:$0xff] %v411_v3 }
  0x32   : > { %414 = vst [vmem:[%s344_s25 + $0x20] sm:$0xff] %v413_v4  ;;  %416 = vst [vmem:[%s344_s25 + $0x28] sm:$0xff] %v415_v5  ;;  %v417_v6 = vld [vmem:[%s1601_s20 + $0x60] sm:$0xff]  ;;  %v419_v7 = vld [vmem:[%s1601_s20 + $0x70] sm:$0xff] }
  0x33   : > { %v421_v8 = vld [vmem:[%s1601_s20 + $0x80] sm:$0xff]  ;;  %418 = vst [vmem:[%s344_s25 + $0x30] sm:$0xff] %v417_v6  ;;  %420 = vst [vmem:[%s344_s25 + $0x38] sm:$0xff] %v419_v7  ;;  %v423_v9 = vld [vmem:[%s1601_s20 + $0x90] sm:$0xff] }
  0x34   : > { %422 = vst [vmem:[%s344_s25 + $0x40] sm:$0xff] %v421_v8  ;;  %v425_v10 = vld [vmem:[%s1601_s20 + $0xa0] sm:$0xff]  ;;  %v427_v11 = vld [vmem:[%s1601_s20 + $0xb0] sm:$0xff]  ;;  %424 = vst [vmem:[%s344_s25 + $0x48] sm:$0xff] %v423_v9 }
  0x35   : > { %426 = vst [vmem:[%s344_s25 + $0x50] sm:$0xff] %v425_v10  ;;  %428 = vst [vmem:[%s344_s25 + $0x58] sm:$0xff] %v427_v11  ;;  %v429_v12 = vld [vmem:[%s1601_s20 + $0xc0] sm:$0xff]  ;;  %v431_v13 = vld [vmem:[%s1601_s20 + $0xd0] sm:$0xff] }
  0x36   : > { %v433_v14 = vld [vmem:[%s1601_s20 + $0xe0] sm:$0xff]  ;;  %430 = vst [vmem:[%s344_s25 + $0x60] sm:$0xff] %v429_v12  ;;  %432 = vst [vmem:[%s344_s25 + $0x68] sm:$0xff] %v431_v13  ;;  %v435_v15 = vld [vmem:[%s1601_s20 + $0xf0] sm:$0xff] }
  0x37   : > { %434 = vst [vmem:[%s344_s25 + $0x70] sm:$0xff] %v433_v14  ;;  %436 = vst [vmem:[%s344_s25 + $0x78] sm:$0xff] %v435_v15 }
  0x38 PF: > { %p1131_p0 = scmp.ge.s32.totalorder %s1448_s18, 1  ;;  %p464_p1 = scmp.lt.s32.totalorder %s1448_s18, 5 }
  0x3a   : > { %p465_p2 = pnand %p1131_p0, %p464_p1 }
  0x3b   : > { %s471_s17 = sand.u32 (!%p465_p2), 1, %s1424_s12   ;;  %s1793_s22 = sand.u32 (!%p465_p2), 1, %s1416_s10  }
  0x3c   : > { %468 = sbr.rel (%p465_p2) target bundleno = 776 (0x308), region = 90  ;;  %s1132_s26 = sshll.u32 (!%p465_p2), %s471_s17, 7 }
  0x3d   : > { %s1625_s19 = sshll.u32 (!%p465_p2), %s1793_s22, 3  ;;  %p531_p3 = scmp.lt.s32.totalorder (!%p465_p2), %s1436_s15, 1 }
  0x3e   : > { %s1135_s23 = sshll.u32 (!%p465_p2), %s1432_s14, 1  ;;  %s1136_s28 = sshll.u32 (!%p465_p2), %s1432_s14, 5 }
  0x3f   : > { %p546_p4 = scmp.lt.s32.totalorder (!%p465_p2), %s1135_s23, 3  ;;  %s1825_s2 = sld [smem:[#allocation21_spill]] (!%p465_p2) }
  0x40   : > { %p551_p5 = scmp.lt.s32.totalorder (!%p465_p2), %s1136_s28, 63  ;;  %s1662_s16 = scalar_lea.vmem (!%p465_p2), [#allocation4], %s1132_s26 }
  0x41   : > { %s530_s13 = scalar_lea.vmem (!%p465_p2), [#allocation5], %s1625_s19  ;;  %p1138_p6 = scmp.ne.s32.totalorder (!%p465_p2), %s1432_s14, 0 }
  0x43   : > { %s1631_s20 = scalar_select %p531_p3, %s1436_s15, 1 }
  0x44   : > { %s1850_s23 = smov (!%p546_p4, %s1135_s23), 3  ;;  %s1852_s28 = smov (!%p551_p5, %s1136_s28), 63 }
  0x45   : > { %s1134_s12 = sshll.u32 %s1631_s20, 3  ;;  %s540_s22 = scalar_lea.vmem %s1825_s2, %s1631_s20  ;;  %v1450_v18 = vmov (!%p1138_p6), 0.0   ;;  %v584_v22 = vlaneseq (!%p1138_p6)  ;;  %v1139_v28 = vld [vmem:[%s1781_s1] ss:$0 sm:$0xff] (!%p1138_p6) }
  0x46   : > { %s1643_s27 = scalar_lea.vmem %s1780_s0, %s1134_s12  ;;  %s543_s11 = scalar_lea.vmem %s1783_s3, %s1631_s20  ;;  %600 = vst [vmem:[#allocation3] sm:$0xff] (!%p1138_p6), %v1450_v18  ;;  %v581_v24 = vld [vmem:[%s540_s22] sm:$0x1] (!%p1138_p6) }
  0x47   : > { %s548_s18 = scalar_lea.vmem %s1785_s5, %s1850_s23  ;;  %s558_s10 = scalar_lea.vmem %s1788_s8, %s1631_s20  ;;  %v564_v16 = vld [vmem:[%s1643_s27] sm:$0xff] (!%p1138_p6)  ;;  %v585_v23 = vshrl.u32 (!%p1138_p6), %v584_v22, 7  ;;  %v582_v25 = vadd.f32 (!%p1138_p6), 1.0, %v581_v24 }
  0x48   : > { %s1137_s25 = sshll.u32 %s1852_s28, 2  ;;  %563 = sbr.rel (%p1138_p6) target bundleno = 242 (0xf2), region = 98  ;;  %v565_v17 = vmul.f32 (!%p1138_p6), %v564_v16, %v564_v16  ;;  %v1140_v32 = vld [vmem:[%s543_s11] ss:$0 sm:$0xff] (!%p1138_p6) }
  0x49   : > { %s1660_s4 = scalar_lea.vmem %s1786_s6, %s1137_s25  ;;  %v586_v26 = vsub.s32 (!%p1138_p6), 0, %v585_v23 }
  0x4a   : > { %566 = vadd.xlane.f32.xlu0 (!%p1138_p6), %v565_v17 }
  0x4b   : > { %v587_v30 = vrot.slane (!%p1138_p6), %v582_v25, %v586_v26 }
  0xd7   : > { %v567_v19 = vpop.xlane.xlu0 %566 }
  0xd8   : > { %v569_v20 = vmul.f32 0.0078125, %v567_v19 }
  0xda   : > { %v570_v21 = vadd.f32 1e-06, %v569_v20 }
  0xdc   : > { %1292 = vrsqrt.f32 %v570_v21 }
  0xe6   : > { %v1293_v27 = vpop.eup %1292 }
  0xe7   : > { %v572_v29 = vmul.f32 %v1293_v27, %v564_v16 }
  0xe9   : > { %v580_v31 = vmul.f32 %v1139_v28, %v572_v29 }
  0xeb   : > { %v589_v33 = vmul.f32 %v587_v30, %v580_v31 }
  0xed   : > { %v597_v34 = vadd.f32 %v1140_v32, %v589_v33 }
  0xef   : > { %v598_v35 = vpack.c.bf16 %v597_v34, %v597_v34 }
  0xf1   : > { %599 = vst [vmem:[#allocation2] sm:$0xf] %v598_v35 }
  0xf2 PF: > { %v1294_v36 = vld [vmem:[%s1662_s16 + $0x4] ss:$8 sps:$4 sm:$0xff]   ;;  %v1296_v37 = vld [vmem:[%s1662_s16] ss:$8 sps:$4 sm:$0xff]   ;;  %v1451_v38 = vmov 0   ;;  %v1318_v54 = vld [vmem:[%s1660_s4 + $0x40] sm:$0xff]   ;;  %v620_v6 = vlaneseq }
  0xf3   : > { %742 = vmatprep.mubr.bf16.mxu0 %v1451_v38  ;;  %710 = vmatprep.subr.bf16.mxu0 %v1294_v36  ;;  %v1297_v39 = vld [vmem:[%s1662_s16 + $0x14] ss:$8 sps:$4 sm:$0xff]   ;;  %v1299_v40 = vld [vmem:[%s1662_s16 + $0x10] ss:$8 sps:$4 sm:$0xff]   ;;  %v1300_v41 = vld [vmem:[%s1662_s16 + $0x24] ss:$8 sps:$4 sm:$0xff]  }
  0xf4   : > { %711 = vmatpush1.bf16.msra.mxu0 %v1296_v37  ;;  %v1302_v42 = vld [vmem:[%s1662_s16 + $0x20] ss:$8 sps:$4 sm:$0xff]   ;;  %v1303_v43 = vld [vmem:[%s1662_s16 + $0x34] ss:$8 sps:$4 sm:$0xff]   ;;  %v1305_v44 = vld [vmem:[%s1662_s16 + $0x30] ss:$8 sps:$4 sm:$0xff]   ;;  %1181 = vmatprep.subr.bf16.mxu1 %v1318_v54 }
  0xf5   : > { %712 = vmatprep.subr.bf16.mxu0 %v1297_v39  ;;  %v1306_v45 = vld [vmem:[%s1662_s16 + $0x44] ss:$8 sps:$4 sm:$0xff]   ;;  %v1308_v46 = vld [vmem:[%s1662_s16 + $0x40] ss:$8 sps:$4 sm:$0xff]   ;;  %v1309_v47 = vld [vmem:[%s1662_s16 + $0x54] ss:$8 sps:$4 sm:$0xff]  }
  0xf6   : > { %v1311_v48 = vld [vmem:[%s1662_s16 + $0x50] ss:$8 sps:$4 sm:$0xff]   ;;  %v1312_v49 = vld [vmem:[%s1662_s16 + $0x64] ss:$8 sps:$4 sm:$0xff]   ;;  %v1314_v50 = vld [vmem:[%s1662_s16 + $0x60] ss:$8 sps:$4 sm:$0xff]  }
  0xf7   : > { %v1315_v51 = vld [vmem:[%s1662_s16 + $0x74] ss:$8 sps:$4 sm:$0xff]   ;;  %v1317_v52 = vld [vmem:[%s1662_s16 + $0x70] ss:$8 sps:$4 sm:$0xff]   ;;  %v1322_v58 = vld [vmem:[%s1660_s4 + $0x50] sm:$0xff]   ;;  %v621_v7 = vshrl.u32 %v620_v6, 7 }
  0xf8   : > { %713 = vmatpush1.bf16.msra.mxu0 %v1299_v40  ;;  %v601_v53 = vld [vmem:[#allocation2] sm:$0xf]  ;;  %v1320_v56 = vld [vmem:[%s1660_s4 + $0x48] sm:$0xff]   ;;  %v1323_v59 = vld [vmem:[%s1660_s4 + $0x10] sm:$0xff]   ;;  %p1173_p7 = scmp.ne.s32.totalorder %s1432_s14, 1 }
  0xf9   : > { %714 = vmatprep.subr.bf16.mxu0 %v1300_v41  ;;  %v1319_v55 = vld [vmem:[%s1660_s4] sm:$0xff]   ;;  %v1321_v57 = vld [vmem:[%s1660_s4 + $0x8] sm:$0xff]   ;;  %v1324_v60 = vld [vmem:[%s1660_s4 + $0x58] sm:$0xff]   ;;  %v622_v8 = vsub.s32 0, %v621_v7  ;;  %v626_v10 = vsub.s32 1, %v621_v7 }
  0xfa   : > { %1182 = vmatpush3.bf16.msra.mxu1 %v1319_v55  ;;  %v1325_v61 = vld [vmem:[%s1660_s4 + $0x18] sm:$0xff]   ;;  %v1326_v62 = vld [vmem:[%s1660_s4 + $0x60] sm:$0xff]   ;;  %v1328_v0 = vld [vmem:[%s1660_s4 + $0x68] sm:$0xff]  }
  0xfb   : > { %1183 = vmatprep.subr.bf16.mxu1 %v1320_v56  ;;  %v1327_v63 = vld [vmem:[%s1660_s4 + $0x20] sm:$0xff]   ;;  %v1329_v1 = vld [vmem:[%s1660_s4 + $0x28] sm:$0xff]   ;;  %v1330_v2 = vld [vmem:[%s1660_s4 + $0x70] sm:$0xff]  }
  0xfc   : > { %715 = vmatpush1.bf16.msra.mxu0 %v1302_v42  ;;  %v1331_v3 = vld [vmem:[%s1660_s4 + $0x30] sm:$0xff]   ;;  %v1332_v4 = vld [vmem:[%s1660_s4 + $0x78] sm:$0xff]   ;;  %v618_v9 = vld [vmem:[%s548_s18] sm:$0x3] }
  0xfd   : > { %716 = vmatprep.subr.bf16.mxu0 %v1303_v43  ;;  %v1333_v5 = vld [vmem:[%s1660_s4 + $0x38] sm:$0xff]   ;;  %v623_v11 = vrot.slane %v618_v9, %v622_v8  ;;  %v627_v12 = vrot.slane %v618_v9, %v626_v10  ;;  %v769_v40 = vld [vmem:[#allocation3] sm:$0xff] }
  0xfe   : > { %1184 = vmatpush3.bf16.msra.mxu1 %v1321_v57 }
  0xff   : > { %1185 = vmatprep.subr.bf16.mxu1 %v1322_v58 }
 0x100   : > { %717 = vmatpush1.bf16.msra.mxu0 %v1305_v44 }
 0x101   : > { %718 = vmatprep.subr.bf16.mxu0 %v1306_v45 }
 0x102   : > { %1186 = vmatpush3.bf16.msra.mxu1 %v1323_v59 }
 0x103   : > { %1187 = vmatprep.subr.bf16.mxu1 %v1324_v60 }
 0x104   : > { %719 = vmatpush1.bf16.msra.mxu0 %v1308_v46 }
 0x105   : > { %720 = vmatprep.subr.bf16.mxu0 %v1309_v47  ;;  %v1174_v47 = vld [vmem:[%s1787_s7] ss:$0 sm:$0xff] (!%p1173_p7) }
 0x106   : > { %1188 = vmatpush3.bf16.msra.mxu1 %v1325_v61 }
 0x107   : > { %1189 = vmatprep.subr.bf16.mxu1 %v1326_v62 }
 0x108   : > { %721 = vmatpush1.bf16.msra.mxu0 %v1311_v48 }
 0x109   : > { %722 = vmatprep.subr.bf16.mxu0 %v1312_v49  ;;  %v1175_v49 = vld [vmem:[%s558_s10] ss:$0 sm:$0xff] (!%p1173_p7) }
 0x10a   : > { %1190 = vmatpush3.bf16.msra.mxu1 %v1327_v63 }
 0x10b   : > { %1191 = vmatprep.subr.bf16.mxu1 %v1328_v0 }
 0x10c   : > { %723 = vmatpush1.bf16.msra.mxu0 %v1314_v50  ;;  %v955_v50 = vld [vmem:[%s1643_s27] sm:$0xff] (!%p1173_p7) }
 0x10d   : > { %724 = vmatprep.subr.bf16.mxu0 %v1315_v51 }
 0x10e   : > { %1192 = vmatpush3.bf16.msra.mxu1 %v1329_v1 }
 0x10f   : > { %1193 = vmatprep.subr.bf16.mxu1 %v1330_v2 }
 0x110   : > { %725 = vmatpush1.bf16.msra.mxu0 %v1317_v52 }
 0x112   : > { %1194 = vmatpush3.bf16.msra.mxu1 %v1331_v3 }
 0x113   : > { %743 = vmatmul.mubr.bf16.vlgmr.msra.gmra.mrb[0].mxu0 %v601_v53  ;;  %1195 = vmatprep.subr.bf16.mxu1 %v1332_v4 }
 0x116   : > { %1196 = vmatpush3.bf16.msra.mxu1 %v1333_v5 }
 0x1e6   : > { %v744_v13 = vpop.f32.mrb[0].mxu0 }
 0x1e7   : > { %v745_v14 = vadd.f32 %v744_v13, %v623_v11  ;;  %v746_v15 = vpop.f32.mrb[1].mxu0 }
 0x1e8   : > { %v747_v16 = vadd.f32 %v746_v15, %v627_v12  ;;  %v748_v17 = vpop.f32.mrb[2].mxu0 }
 0x1e9   : > { %v753_v18 = vmul.f32 0.044715, %v745_v14  ;;  %v749_v19 = vpop.f32.mrb[3].mxu0  ;;  %v751_v31 = vmul.f32 0.5, %v745_v14 }
 0x1ea   : > { %v754_v20 = vmul.f32 0.044715, %v747_v16  ;;  %v752_v33 = vmul.f32 0.5, %v747_v16 }
 0x1eb   : > { %v755_v21 = vmul.f32 %v753_v18, %v745_v14 }
 0x1ec   : > { %v756_v22 = vmul.f32 %v754_v20, %v747_v16 }
 0x1ed   : > { %v757_v23 = vmul.f32 %v755_v21, %v745_v14 }
 0x1ee   : > { %v758_v24 = vmul.f32 %v756_v22, %v747_v16 }
 0x1ef   : > { %v759_v25 = vadd.f32 %v757_v23, %v745_v14 }
 0x1f0   : > { %v760_v26 = vadd.f32 %v758_v24, %v747_v16 }
 0x1f1   : > { %v761_v27 = vmul.f32 0.7978846, %v759_v25 }
 0x1f2   : > { %v762_v28 = vmul.f32 0.7978846, %v760_v26 }
 0x1f3   : > { %1334 = vtanh.f32 %v761_v27 }
 0x1f4   : > { %1336 = vtanh.f32 %v762_v28 }
 0x1fd   : > { %v1335_v29 = vpop.eup %1334 }
 0x1fe   : > { %v1337_v30 = vpop.eup %1336  ;;  %v765_v32 = vadd.f32 1.0, %v1335_v29 }
 0x1ff   : > { %v766_v34 = vadd.f32 1.0, %v1337_v30 }
 0x200   : > { %v767_v35 = vmul.f32 %v765_v32, %v751_v31 }
 0x201   : > { %v768_v36 = vmul.f32 %v766_v34, %v752_v33 }
 0x202   : > { %v770_v38 = vpack.c.bf16 %v767_v35, %v767_v35 }
 0x203   : > { %v771_v37 = vpack.c.bf16 %v768_v36, %v768_v36 }
 0x205   : > { %932 = vmatprep.mubr.bf16.mxu1 %v771_v37 }
 0x206   : > { %933 = vmatmul.mubr.bf16.vlgmr.msra.gmra.mrb[0].mxu1 %v770_v38 }
 0x2d9   : > { %v1197_v39 = vpop.f32.mrb[0].mxu1  ;;  %945 = sbr.rel (%p1173_p7) target bundleno = 750 (0x2ee), region = 102 }
 0x2da   : > { %v1198_v41 = vpop.f32.mrb[1].mxu1 }
 0x2db   : > { %v1199_v42 = vadd.f32 %v1198_v41, %v1197_v39  ;;  %v1200_v43 = vpop.f32.mrb[2].mxu1 }
 0x2dc   : > { %v1201_v44 = vpop.f32.mrb[3].mxu1 }
 0x2dd   : > { %v940_v45 = vadd.f32 %v1199_v42, %v769_v40 }
 0x2df   : > { %941 = vst [vmem:[#allocation3] sm:$0xff] %v940_v45 }
 0x2e6   : > { %v946_v46 = vld [vmem:[#allocation3] sm:$0xff] }
 0x2e7   : > { %v954_v48 = vadd.f32 %v1174_v47, %v946_v46 }
 0x2e9   : > { %v963_v51 = vmul.f32 %v1175_v49, %v954_v48 }
 0x2eb   : > { %v964_v52 = vadd.f32 %v963_v51, %v955_v50 }
 0x2ed   : > { %965 = vst [vmem:[%s530_s13] sm:$0xff] %v964_v52 }
 0x2ee PF: > { %s1826_s14 = sld [smem:[#allocation9_spill]]  ;;  %s1177_s26 = sshll.u32 %s1436_s15, 7 }
 0x2ef   : > { %s1828_s12 = sld [smem:[#allocation23_spill]]  ;;  %s981_s4 = sshll.u32 %s530_s13, 4  ;;  %s982_s4 = int_to_ptr.vmem [resolvable:$true] %s981_s4 }
 0x2f0   : > { %s1338_s20 = scalar_lea.vmem %s982_s4, 128  ;;  %s1452_s16 = smov [#allocation5]  }
 0x2f1   : > { %p1339_p8 = scmp.ne.s32.totalorder %s982_s4, %s1338_s20  ;;  %s1342_s2 = sshll.u32 %s1452_s16, 4  ;;  %s1343_s2 = int_to_ptr.vmem [resolvable:$false] %s1342_s2 }
 0x2f2   : > { %s1344_s9 = scalar_lea.vmem %s1343_s2, 256  ;;  %p1345_p13 = scmp.lt.s32.totalorder %s982_s4, %s1343_s2 }
 0x2f3   : > { %p1340_p9 = pnand %p1339_p8, %p1582_p10  ;;  %p1346_p0 = scmp.lt.s32.totalorder %s1344_s9, %s1338_s20 }
 0x2f4   : > { %s1830_s10 = sand.u32 1, %s1826_s14  }
 0x2f5   : > { %s1829_s25 = smov %s1828_s12  ;;  %s1723_s17 = scalar_lea.hbm %s1828_s12, %s1177_s26 }
 0x2f6   : > { %s967_s27 = scalar_lea.sflag [#allocation6], %s1830_s10  ;;  %p1341_p11 = pneg %p1340_p9 }
 0x2f7   : > { %p1347_p1 = por %p1346_p0, %p1345_p13 }
 0x2f9   : > { %p1348_p2 = pnand %p1347_p1, %p1341_p11 }
 0x2fb   : > { %1351 = shalt.err (!%p1348_p2)
}
 0x2fc   : > { %s1352_s15 = scalar_lea.hbm %s1723_s17, 128  ;;  %s1356_s30 = scalar_lea.hbm %s1829_s25, 256 }
 0x2fd   : > { %p1353_p3 = scmp.ne.s32.totalorder %s1723_s17, %s1352_s15  ;;  %p1357_p6 = scmp.lt.u32.totalorder %s1723_s17, %s1829_s25 }
 0x2fe   : > { %p1358_p7 = scmp.lt.u32.totalorder %s1356_s30, %s1352_s15  ;;  %p1360_p9 = scmp.lt.u32.totalorder %s1352_s15, %s1723_s17 }
 0x2ff   : > { %p1354_p4 = pnand %p1353_p3, %p1582_p10 }
 0x300   : > { %p1359_p8 = por %p1358_p7, %p1357_p6 }
 0x301   : > { %p1355_p5 = pneg %p1354_p4 }
 0x302   : > { %p1361_p11 = por %p1360_p9, %p1359_p8 }
 0x304   : > { %p1362_p13 = pnand %p1361_p11, %p1355_p5 }
 0x306   : > { %1365 = shalt.err (!%p1362_p13)
}
 0x307   : > { %1203 = dma.vmem_to_hbm [thread:$0]  (%p1582_p10), %s982_s4, 128, %s1723_s17, %s967_s27  }
 0x308 PF: > { %s1831_s21 = sld [smem:[#allocation14_spill]]  ;;  %s1832_s29 = sld [smem:[#allocation8_spill]] }
 0x30e   : > { %p1209_p0 = scmp.ge.s32.totalorder %s1831_s21, 2  ;;  %s993_s14 = sand.u32 1, %s1832_s29  }
 0x30f   : > { %s994_s26 = scalar_lea.sflag [#allocation6], %s993_s14 }
 0x310   : > { %p1206_p1 = pnand %p1209_p0, %p1589_p12 }
 0x312   : > { %1407 = dma.done.wait (!%p1206_p1), %s994_s26, 128  }
 0x313   : > { %1409 = vsyncadd (!%p1206_p1), %s994_s26, 4294967168  ;;  %s22_s18 = sadd.s32 1, %s1831_s21   ;;  %s1834_s30 = sld [smem:[#allocation9_spill]] }
 0x314   : > { %p19_p2 = scmp.ge.s32.totalorder %s22_s18, 6   ;;  %s1835_s10 = sld [smem:[#allocation10_spill]] }
 0x315   : > { %s1836_s11 = sld [smem:[#allocation19_spill]]  ;;  %s1837_s12 = sld [smem:[#allocation11_spill]] }
 0x316   : > { %s1838_s13 = sld [smem:[#allocation17_spill]]  ;;  %s1839_s14 = sld [smem:[#allocation12_spill]] }
 0x317   : > { %s1840_s15 = sld [smem:[#allocation13_spill]]  ;;  %s1841_s16 = sld [smem:[#allocation15_spill]] }
 0x318   : > { %s1842_s17 = sld [smem:[#allocation16_spill]]  ;;  %21 = sbr.rel (!%p19_p2) target bundleno = 10 (0xa), region = 160 }
 0x31f   :  { %999 = vsyncpa [#allocation6], 1 }
 0x320   :  { %1001 = vsyncpa [#allocation6 + $0x1], 1 }

</bundles_post_ra>
